<compile_context>
chip_gen: v6e
topology: v6e:2x2x1
jax: 0.10.0
libtpu: 0.0.40
codegen_flags: <defaults>
</compile_context>

<pallas_src>
import jax
import jax.numpy as jnp
from jax.experimental import pallas as pl
from jax.experimental.pallas import tpu as pltpu

D_IN = 128        # synthetic encoder input dim (lane-aligned: full 128-lane vregs)
D_ENC = 512       # encoder output dim (== fc1 input dim in the torch module)
D_H1 = 1024
D_H2 = 1024
D_H3 = 256
D_OUT = 1
TM_MAX = 1024     # max rows per grid step (reviewed: VMEM is not the constraint)
MIN_TM = 256      # don't shrink per-step tiles below ~256 rows when splitting


def _cdiv(a, b):
    return -(-a // b)


def _round_up(n, m):
    return ((n + m - 1) // m) * m


def _choose_tiling(B):
    """Balanced, sublane-aligned batch tiles.

    Returns (tm, padded_B, n_steps).  Forces >= 2 (even) grid steps when B is
    large enough so the parallel batch axis shards across both v7x TensorCores
    without dropping below MIN_TM rows per step.
    """
    n = _cdiv(B, TM_MAX)
    if n == 1 and B >= 2 * MIN_TM:
        n = 2                                  # engage both v7x TCs
    elif n > 1 and n % 2 == 1 and _cdiv(B, n + 1) >= MIN_TM:
        n += 1                                 # even step count splits evenly across 2 TCs
    tm = _round_up(_cdiv(B, n), 8)
    return tm, tm * n, n


def _make_kernel(manual_w23):
    """Kernel factory.

    manual_w23=True  -> single-step grid: w2/w3 arrive as raw HBM refs and are
                        DMA'd into VMEM scratch, overlapped with encoder+fc1.
    manual_w23=False -> multi-step grid: w2/w3 are resident Buffered(1) blocks.
    """

    def kernel(x_ref, we_ref, be_ref, w1_ref, b1_ref, w2_ref, b2_ref,
               w3_ref, b3_ref, w4_ref, b4_ref, out_ref, enc_ref, *scratch):
        if manual_w23:
            w2_vmem, w3_vmem, dma_sem = scratch
            # Kick off the HBM->VMEM weight copies now; they overlap with the
            # encoder and fc1 matmuls below and are waited on just-in-time.
            cp2 = pltpu.make_async_copy(w2_ref, w2_vmem, dma_sem.at[0])
            cp3 = pltpu.make_async_copy(w3_ref, w3_vmem, dma_sem.at[1])
            cp2.start()
            cp3.start()

        # Activations round to bf16 per matmul (MXU-native); accumulate in f32.
        # NOTE: enc therefore reflects a bf16-rounded input to the encoder
        # (documented; downstream consumers needing f32-grade enc should keep
        # the encoder LHS in f32).
        x = x_ref[...].astype(jnp.bfloat16)

        # synthetic encoder: Linear(D_IN, 512)
        enc = jnp.dot(x, we_ref[...], preferred_element_type=jnp.float32) + be_ref[...]
        enc_ref[...] = enc.astype(enc_ref.dtype)

        # fc1 + ReLU  (dropout == identity in eval mode)
        h = jnp.dot(enc.astype(jnp.bfloat16), w1_ref[...],
                    preferred_element_type=jnp.float32) + b1_ref[...]
        h = jnp.maximum(h, 0.0)

        # fc2 + ReLU
        if manual_w23:
            cp2.wait()
            w2 = w2_vmem[...]
        else:
            w2 = w2_ref[...]
        h = jnp.dot(h.astype(jnp.bfloat16), w2,
                    preferred_element_type=jnp.float32) + b2_ref[...]
        h = jnp.maximum(h, 0.0)

        # fc3 + ReLU
        if manual_w23:
            cp3.wait()
            w3 = w3_vmem[...]
        else:
            w3 = w3_ref[...]
        h = jnp.dot(h.astype(jnp.bfloat16), w3,
                    preferred_element_type=jnp.float32) + b3_ref[...]
        h = jnp.maximum(h, 0.0)

        # fc4: output dim 1 -> VPU multiply + cross-lane reduce instead of an
        # N=1 MXU matmul (keeps the MXU free, avoids a 1-lane result path).
        y = jnp.sum(h * w4_ref[...], axis=-1, keepdims=True) + b4_ref[...]
        out_ref[...] = y.astype(out_ref.dtype)

    return kernel


def count_people_head(x, params, *, enc_dtype=jnp.float32):
    """x: (B, D_IN) float32.  Returns (count (B, 1), enc (B, D_ENC))."""
    B = x.shape[0]
    we, be, w1, b1, w2, b2, w3, b3, w4, b4 = params
    w4_row = w4.reshape(1, D_H3)           # (256, 1) -> (1, 256) for the VPU reduce

    tm, b_pad, n_steps = _choose_tiling(B)
    if b_pad != B:
        x = jnp.pad(x, ((0, b_pad - B), (0, 0)))

    # Single-step grids are weight-DMA-bound -> hide the w2/w3 transfer behind
    # the encoder+fc1 matmuls via manual DMA.  Multi-step grids amortize the
    # one-time DMA and stay megacore-safe with resident pipeline blocks.
    manual_w23 = (n_steps == 1)

    def weight_spec(shape):
        # Grid-invariant (resident) block: constant index_map + single buffer,
        # so each weight occupies one VMEM copy and is DMA'd once per core.
        return pl.BlockSpec(shape, lambda i: (0, 0), pipeline_mode=pl.Buffered(1))

    w2_spec = (pl.BlockSpec(memory_space=pl.ANY) if manual_w23
               else weight_spec((D_H1, D_H2)))
    w3_spec = (pl.BlockSpec(memory_space=pl.ANY) if manual_w23
               else weight_spec((D_H2, D_H3)))
    scratch_shapes = ([pltpu.VMEM((D_H1, D_H2), jnp.bfloat16),
                       pltpu.VMEM((D_H2, D_H3), jnp.bfloat16),
                       pltpu.SemaphoreType.DMA((2,))]
                      if manual_w23 else [])

    grid_spec = pltpu.PrefetchScalarGridSpec(
        num_scalar_prefetch=0,
        grid=(n_steps,),
        in_specs=[
            pl.BlockSpec((tm, D_IN), lambda i: (i, 0)),   # x tile (double-buffered)
            weight_spec((D_IN, D_ENC)), weight_spec((1, D_ENC)),
            weight_spec((D_ENC, D_H1)), weight_spec((1, D_H1)),
            w2_spec,                    weight_spec((1, D_H2)),
            w3_spec,                    weight_spec((1, D_H3)),
            weight_spec((1, D_H3)),     weight_spec((1, D_OUT)),
        ],
        out_specs=[
            pl.BlockSpec((tm, D_OUT), lambda i: (i, 0)),
            pl.BlockSpec((tm, D_ENC), lambda i: (i, 0)),
        ],
        scratch_shapes=scratch_shapes,
    )

    out_shapes = (
        jax.ShapeDtypeStruct((b_pad, D_OUT), jnp.float32),
        jax.ShapeDtypeStruct((b_pad, D_ENC), enc_dtype),
    )

    y, enc = pl.pallas_call(
        _make_kernel(manual_w23),
        out_shape=out_shapes,
        grid_spec=grid_spec,
        compiler_params=pltpu.CompilerParams(
            dimension_semantics=("parallel",),   # batch axis -> both v7x TensorCores
            vmem_limit_bytes=32 << 20,           # ~16-20 MiB used even at tm=1024
        ),
    )(x, we, be, w1, b1, w2, b2, w3, b3, w4_row, b4)

    return y[:B], enc[:B]


def init_params(key):
    """Deterministic Kaiming-uniform-ish init, shapes matching the torch module.

    Weights are bfloat16 (MXU-native, halves VMEM/DMA); biases stay float32.
    """
    keys = jax.random.split(key, 10)

    def linear(kw, kb, fan_in, fan_out):
        bound = 1.0 / jnp.sqrt(fan_in)
        w = jax.random.uniform(kw, (fan_in, fan_out), jnp.float32, -bound, bound)
        b = jax.random.uniform(kb, (1, fan_out), jnp.float32, -bound, bound)
        return w.astype(jnp.bfloat16), b

    we, be = linear(keys[0], keys[1], D_IN, D_ENC)   # synthetic encoder
    w1, b1 = linear(keys[2], keys[3], D_ENC, D_H1)   # fc1: 512 -> 1024
    w2, b2 = linear(keys[4], keys[5], D_H1, D_H2)    # fc2: 1024 -> 1024
    w3, b3 = linear(keys[6], keys[7], D_H2, D_H3)    # fc3: 1024 -> 256
    w4, b4 = linear(keys[8], keys[9], D_H3, D_OUT)   # fc4: 256 -> 1
    return (we, be, w1, b1, w2, b2, w3, b3, w4, b4)


def reference_forward(x, params):
    """Pure-JAX reference: float32 math on the same bf16 weights."""
    we, be, w1, b1, w2, b2, w3, b3, w4, b4 = params
    f32 = lambda a: a.astype(jnp.float32)
    enc = x @ f32(we) + be
    h = jnp.maximum(enc @ f32(w1) + b1, 0.0)
    h = jnp.maximum(h @ f32(w2) + b2, 0.0)
    h = jnp.maximum(h @ f32(w3) + b3, 0.0)
    y = h @ f32(w4) + b4
    return y, enc


if __name__ == "__main__":
    key = jax.random.PRNGKey(0)
    kx, kp, kx2 = jax.random.split(key, 3)
    params = init_params(kp)

    # Small batch -> single-step grid -> manual (overlapped) w2/w3 DMA path.
    B = 16
    x = jax.random.normal(kx, (B, D_IN), jnp.float32)
    y, enc = count_people_head(x, params)
    y, enc = jax.block_until_ready((y, enc))
    y_ref, enc_ref = reference_forward(x, params)
    assert y.shape == (B, D_OUT) and enc.shape == (B, D_ENC)
    # Activations are rounded to bf16 inside the kernel -> modest tolerance.
    assert jnp.allclose(enc, enc_ref, atol=3e-2, rtol=3e-2)
    assert jnp.allclose(y, y_ref, atol=1e-1, rtol=1e-1)

    # Larger batch -> 2-step balanced grid -> resident pipelined-weight path
    # (this is also the 2-TensorCore path on v7x).
    B2 = 520
    x2 = jax.random.normal(kx2, (B2, D_IN), jnp.float32)
    y2, enc2 = count_people_head(x2, params)
    y2, enc2 = jax.block_until_ready((y2, enc2))
    y2_ref, enc2_ref = reference_forward(x2, params)
    assert y2.shape == (B2, D_OUT) and enc2.shape == (B2, D_ENC)
    assert jnp.allclose(enc2, enc2_ref, atol=3e-2, rtol=3e-2)
    assert jnp.allclose(y2, y2_ref, atol=1e-1, rtol=1e-1)

    print("KERNEL_OK")
</pallas_src>

<mosaic_0001>
module attributes {stable_mosaic.version = 11 : i64} {
  func.func @kernel(%arg0: i32, %arg1: memref<16x128xf32, #tpu.memory_space<vmem>>, %arg2: memref<128x512xbf16, #tpu.memory_space<vmem>>, %arg3: memref<1x512xf32, #tpu.memory_space<vmem>>, %arg4: memref<512x1024xbf16, #tpu.memory_space<vmem>>, %arg5: memref<1x1024xf32, #tpu.memory_space<vmem>>, %arg6: memref<1024x1024xbf16, #tpu.memory_space<any>>, %arg7: memref<1x1024xf32, #tpu.memory_space<vmem>>, %arg8: memref<1024x256xbf16, #tpu.memory_space<any>>, %arg9: memref<1x256xf32, #tpu.memory_space<vmem>>, %arg10: memref<1x256xbf16, #tpu.memory_space<vmem>>, %arg11: memref<1x1xf32, #tpu.memory_space<vmem>>, %arg12: memref<16x1xf32, #tpu.memory_space<vmem>>, %arg13: memref<16x512xf32, #tpu.memory_space<vmem>>, %arg14: memref<1024x1024xbf16, #tpu.memory_space<vmem>>, %arg15: memref<1024x256xbf16, #tpu.memory_space<vmem>>, %arg16: memref<2x!tpu.dma_semaphore, #tpu.memory_space<semaphore_mem>>) attributes {dimension_semantics = [#tpu.dimension_semantics<parallel>], iteration_bounds = array<i64: 1>, scalar_prefetch = 0 : i64, scratch_operands = 3 : i64, tpu.core_type = #tpu.core_type<tc>, window_params = [{transform_indices = @transform_0, window_bounds = array<i64: 16, 128>}, {pipeline_mode = #tpu.pipeline_mode<synchronous>, transform_indices = @transform_1, window_bounds = array<i64: 128, 512>}, {pipeline_mode = #tpu.pipeline_mode<synchronous>, transform_indices = @transform_2, window_bounds = array<i64: 1, 512>}, {pipeline_mode = #tpu.pipeline_mode<synchronous>, transform_indices = @transform_3, window_bounds = array<i64: 512, 1024>}, {pipeline_mode = #tpu.pipeline_mode<synchronous>, transform_indices = @transform_4, window_bounds = array<i64: 1, 1024>}, {}, {pipeline_mode = #tpu.pipeline_mode<synchronous>, transform_indices = @transform_6, window_bounds = array<i64: 1, 1024>}, {}, {pipeline_mode = #tpu.pipeline_mode<synchronous>, transform_indices = @transform_8, window_bounds = array<i64: 1, 256>}, {pipeline_mode = #tpu.pipeline_mode<synchronous>, transform_indices = @transform_9, window_bounds = array<i64: 1, 256>}, {pipeline_mode = #tpu.pipeline_mode<synchronous>, transform_indices = @transform_10, window_bounds = array<i64: 1, 1>}, {transform_indices = @transform_11, window_bounds = array<i64: 16, 1>}, {transform_indices = @transform_12, window_bounds = array<i64: 16, 512>}]} {
    %c0_i32 = arith.constant 0 : i32
    %0 = tpu.memref_slice %arg16[%c0_i32] : memref<2x!tpu.dma_semaphore, #tpu.memory_space<semaphore_mem>> -> memref<1x!tpu.dma_semaphore, #tpu.memory_space<semaphore_mem>>
    %1 = tpu.memref_squeeze %0 : memref<1x!tpu.dma_semaphore, #tpu.memory_space<semaphore_mem>> -> memref<!tpu.dma_semaphore, #tpu.memory_space<semaphore_mem>>
    tpu.enqueue_dma source(%arg6 : memref<1024x1024xbf16, #tpu.memory_space<any>>) target(%arg14 : memref<1024x1024xbf16, #tpu.memory_space<vmem>>) target_semaphore(%1 : memref<!tpu.dma_semaphore, #tpu.memory_space<semaphore_mem>>)
    %c1_i32 = arith.constant 1 : i32
    %2 = tpu.memref_slice %arg16[%c1_i32] : memref<2x!tpu.dma_semaphore, #tpu.memory_space<semaphore_mem>> -> memref<1x!tpu.dma_semaphore, #tpu.memory_space<semaphore_mem>>
    %3 = tpu.memref_squeeze %2 : memref<1x!tpu.dma_semaphore, #tpu.memory_space<semaphore_mem>> -> memref<!tpu.dma_semaphore, #tpu.memory_space<semaphore_mem>>
    tpu.enqueue_dma source(%arg8 : memref<1024x256xbf16, #tpu.memory_space<any>>) target(%arg15 : memref<1024x256xbf16, #tpu.memory_space<vmem>>) target_semaphore(%3 : memref<!tpu.dma_semaphore, #tpu.memory_space<semaphore_mem>>)
    %c0 = arith.constant 0 : index
    %c0_0 = arith.constant 0 : index
    %4 = vector.load %arg1[%c0, %c0_0] : memref<16x128xf32, #tpu.memory_space<vmem>>, vector<16x128xf32>
    %5 = arith.truncf %4 : vector<16x128xf32> to vector<16x128xbf16>
    %c0_1 = arith.constant 0 : index
    %c0_2 = arith.constant 0 : index
    %6 = vector.load %arg2[%c0_1, %c0_2] : memref<128x512xbf16, #tpu.memory_space<vmem>>, vector<128x512xbf16>
    %cst = arith.constant dense<0.000000e+00> : vector<16x512xf32>
    %7 = tpu.matmul %5, %6, %cst {dimension_numbers = #tpu.dot_dimension_numbers<[1], [0], [0], [1], [0, 0, 1, 1], [], []>} : vector<16x128xbf16>, vector<128x512xbf16>, vector<16x512xf32> -> vector<16x512xf32>
    %c0_3 = arith.constant 0 : index
    %c0_4 = arith.constant 0 : index
    %8 = vector.load %arg3[%c0_3, %c0_4] : memref<1x512xf32, #tpu.memory_space<vmem>>, vector<1x512xf32>
    %9 = vector.broadcast %8 : vector<1x512xf32> to vector<16x512xf32>
    %10 = arith.addf %7, %9 : vector<16x512xf32>
    %c0_5 = arith.constant 0 : index
    %c0_6 = arith.constant 0 : index
    %11 = vector.load %arg13[%c0_5, %c0_6] : memref<16x512xf32, #tpu.memory_space<vmem>>, vector<16x512xf32>
    tpu.vector_store %arg13[%c0_5, %c0_6], %10 {strides = array<i32>} : memref<16x512xf32, #tpu.memory_space<vmem>>, vector<16x512xf32>,
    %12 = arith.truncf %10 : vector<16x512xf32> to vector<16x512xbf16>
    %c0_7 = arith.constant 0 : index
    %c0_8 = arith.constant 0 : index
    %13 = vector.load %arg4[%c0_7, %c0_8] : memref<512x1024xbf16, #tpu.memory_space<vmem>>, vector<512x1024xbf16>
    %cst_9 = arith.constant dense<0.000000e+00> : vector<16x1024xf32>
    %14 = tpu.matmul %12, %13, %cst_9 {dimension_numbers = #tpu.dot_dimension_numbers<[1], [0], [0], [1], [0, 0, 1, 1], [], []>} : vector<16x512xbf16>, vector<512x1024xbf16>, vector<16x1024xf32> -> vector<16x1024xf32>
    %c0_10 = arith.constant 0 : index
    %c0_11 = arith.constant 0 : index
    %15 = vector.load %arg5[%c0_10, %c0_11] : memref<1x1024xf32, #tpu.memory_space<vmem>>, vector<1x1024xf32>
    %16 = vector.broadcast %15 : vector<1x1024xf32> to vector<16x1024xf32>
    %17 = arith.addf %14, %16 : vector<16x1024xf32>
    %cst_12 = arith.constant 0.000000e+00 : f32
    %18 = vector.broadcast %cst_12 : f32 to vector<16x1024xf32>
    %19 = arith.maximumf %17, %18 : vector<16x1024xf32>
    %c0_i32_13 = arith.constant 0 : i32
    %20 = tpu.memref_slice %arg16[%c0_i32_13] : memref<2x!tpu.dma_semaphore, #tpu.memory_space<semaphore_mem>> -> memref<1x!tpu.dma_semaphore, #tpu.memory_space<semaphore_mem>>
    %21 = tpu.memref_squeeze %20 : memref<1x!tpu.dma_semaphore, #tpu.memory_space<semaphore_mem>> -> memref<!tpu.dma_semaphore, #tpu.memory_space<semaphore_mem>>
    tpu.wait_dma2 semaphore(%21 : memref<!tpu.dma_semaphore, #tpu.memory_space<semaphore_mem>>) src(%arg6 : memref<1024x1024xbf16, #tpu.memory_space<any>>) dst(%arg14 : memref<1024x1024xbf16, #tpu.memory_space<vmem>>)
    %c0_14 = arith.constant 0 : index
    %c0_15 = arith.constant 0 : index
    %22 = vector.load %arg14[%c0_14, %c0_15] : memref<1024x1024xbf16, #tpu.memory_space<vmem>>, vector<1024x1024xbf16>
    %23 = arith.truncf %19 : vector<16x1024xf32> to vector<16x1024xbf16>
    %cst_16 = arith.constant dense<0.000000e+00> : vector<16x1024xf32>
    %24 = tpu.matmul %23, %22, %cst_16 {dimension_numbers = #tpu.dot_dimension_numbers<[1], [0], [0], [1], [0, 0, 1, 1], [], []>} : vector<16x1024xbf16>, vector<1024x1024xbf16>, vector<16x1024xf32> -> vector<16x1024xf32>
    %c0_17 = arith.constant 0 : index
    %c0_18 = arith.constant 0 : index
    %25 = vector.load %arg7[%c0_17, %c0_18] : memref<1x1024xf32, #tpu.memory_space<vmem>>, vector<1x1024xf32>
    %26 = vector.broadcast %25 : vector<1x1024xf32> to vector<16x1024xf32>
    %27 = arith.addf %24, %26 : vector<16x1024xf32>
    %cst_19 = arith.constant 0.000000e+00 : f32
    %28 = vector.broadcast %cst_19 : f32 to vector<16x1024xf32>
    %29 = arith.maximumf %27, %28 : vector<16x1024xf32>
    %c1_i32_20 = arith.constant 1 : i32
    %30 = tpu.memref_slice %arg16[%c1_i32_20] : memref<2x!tpu.dma_semaphore, #tpu.memory_space<semaphore_mem>> -> memref<1x!tpu.dma_semaphore, #tpu.memory_space<semaphore_mem>>
    %31 = tpu.memref_squeeze %30 : memref<1x!tpu.dma_semaphore, #tpu.memory_space<semaphore_mem>> -> memref<!tpu.dma_semaphore, #tpu.memory_space<semaphore_mem>>
    tpu.wait_dma2 semaphore(%31 : memref<!tpu.dma_semaphore, #tpu.memory_space<semaphore_mem>>) src(%arg8 : memref<1024x256xbf16, #tpu.memory_space<any>>) dst(%arg15 : memref<1024x256xbf16, #tpu.memory_space<vmem>>)
    %c0_21 = arith.constant 0 : index
    %c0_22 = arith.constant 0 : index
    %32 = vector.load %arg15[%c0_21, %c0_22] : memref<1024x256xbf16, #tpu.memory_space<vmem>>, vector<1024x256xbf16>
    %33 = arith.truncf %29 : vector<16x1024xf32> to vector<16x1024xbf16>
    %cst_23 = arith.constant dense<0.000000e+00> : vector<16x256xf32>
    %34 = tpu.matmul %33, %32, %cst_23 {dimension_numbers = #tpu.dot_dimension_numbers<[1], [0], [0], [1], [0, 0, 1, 1], [], []>} : vector<16x1024xbf16>, vector<1024x256xbf16>, vector<16x256xf32> -> vector<16x256xf32>
    %c0_24 = arith.constant 0 : index
    %c0_25 = arith.constant 0 : index
    %35 = vector.load %arg9[%c0_24, %c0_25] : memref<1x256xf32, #tpu.memory_space<vmem>>, vector<1x256xf32>
    %36 = vector.broadcast %35 : vector<1x256xf32> to vector<16x256xf32>
    %37 = arith.addf %34, %36 : vector<16x256xf32>
    %cst_26 = arith.constant 0.000000e+00 : f32
    %38 = vector.broadcast %cst_26 : f32 to vector<16x256xf32>
    %39 = arith.maximumf %37, %38 : vector<16x256xf32>
    %c0_27 = arith.constant 0 : index
    %c0_28 = arith.constant 0 : index
    %40 = vector.load %arg10[%c0_27, %c0_28] : memref<1x256xbf16, #tpu.memory_space<vmem>>, vector<1x256xbf16>
    %41 = arith.extf %40 : vector<1x256xbf16> to vector<1x256xf32>
    %42 = vector.broadcast %41 : vector<1x256xf32> to vector<16x256xf32>
    %43 = arith.mulf %39, %42 : vector<16x256xf32>
    %cst_29 = arith.constant dense<0.000000e+00> : vector<16xf32>
    %44 = vector.multi_reduction <add>, %43, %cst_29 [1] : vector<16x256xf32> to vector<16xf32>
    %45 = vector.shape_cast %44 : vector<16xf32> to vector<16x1xf32>
    %c0_30 = arith.constant 0 : index
    %c0_31 = arith.constant 0 : index
    %46 = vector.load %arg11[%c0_30, %c0_31] : memref<1x1xf32, #tpu.memory_space<vmem>>, vector<1x1xf32>
    %47 = vector.broadcast %46 : vector<1x1xf32> to vector<16x1xf32>
    %48 = arith.addf %45, %47 : vector<16x1xf32>
    %c0_32 = arith.constant 0 : index
    %c0_33 = arith.constant 0 : index
    %49 = vector.load %arg12[%c0_32, %c0_33] : memref<16x1xf32, #tpu.memory_space<vmem>>, vector<16x1xf32>
    tpu.vector_store %arg12[%c0_32, %c0_33], %48 {strides = array<i32>} : memref<16x1xf32, #tpu.memory_space<vmem>>, vector<16x1xf32>,
    return
  }
  func.func @transform_0(%arg0: i32) -> (i32, i32) {
    %c0_i32 = arith.constant 0 : i32
    %c0_i32_0 = arith.constant 0 : i32
    return %arg0, %c0_i32 : i32, i32
  }
  func.func @transform_1(%arg0: i32) -> (i32, i32) {
    %c0_i32 = arith.constant 0 : i32
    %c0_i32_0 = arith.constant 0 : i32
    %c0_i32_1 = arith.constant 0 : i32
    return %c0_i32, %c0_i32_0 : i32, i32
  }
  func.func @transform_2(%arg0: i32) -> (i32, i32) {
    %c0_i32 = arith.constant 0 : i32
    %c0_i32_0 = arith.constant 0 : i32
    %c0_i32_1 = arith.constant 0 : i32
    return %c0_i32, %c0_i32_0 : i32, i32
  }
  func.func @transform_3(%arg0: i32) -> (i32, i32) {
    %c0_i32 = arith.constant 0 : i32
    %c0_i32_0 = arith.constant 0 : i32
    %c0_i32_1 = arith.constant 0 : i32
    return %c0_i32, %c0_i32_0 : i32, i32
  }
  func.func @transform_4(%arg0: i32) -> (i32, i32) {
    %c0_i32 = arith.constant 0 : i32
    %c0_i32_0 = arith.constant 0 : i32
    %c0_i32_1 = arith.constant 0 : i32
    return %c0_i32, %c0_i32_0 : i32, i32
  }
  func.func @transform_6(%arg0: i32) -> (i32, i32) {
    %c0_i32 = arith.constant 0 : i32
    %c0_i32_0 = arith.constant 0 : i32
    %c0_i32_1 = arith.constant 0 : i32
    return %c0_i32, %c0_i32_0 : i32, i32
  }
  func.func @transform_8(%arg0: i32) -> (i32, i32) {
    %c0_i32 = arith.constant 0 : i32
    %c0_i32_0 = arith.constant 0 : i32
    %c0_i32_1 = arith.constant 0 : i32
    return %c0_i32, %c0_i32_0 : i32, i32
  }
  func.func @transform_9(%arg0: i32) -> (i32, i32) {
    %c0_i32 = arith.constant 0 : i32
    %c0_i32_0 = arith.constant 0 : i32
    %c0_i32_1 = arith.constant 0 : i32
    return %c0_i32, %c0_i32_0 : i32, i32
  }
  func.func @transform_10(%arg0: i32) -> (i32, i32) {
    %c0_i32 = arith.constant 0 : i32
    %c0_i32_0 = arith.constant 0 : i32
    %c0_i32_1 = arith.constant 0 : i32
    return %c0_i32, %c0_i32_0 : i32, i32
  }
  func.func @transform_11(%arg0: i32) -> (i32, i32) {
    %c0_i32 = arith.constant 0 : i32
    %c0_i32_0 = arith.constant 0 : i32
    return %arg0, %c0_i32 : i32, i32
  }
  func.func @transform_12(%arg0: i32) -> (i32, i32) {
    %c0_i32 = arith.constant 0 : i32
    %c0_i32_0 = arith.constant 0 : i32
    return %arg0, %c0_i32 : i32, i32
  }
}

</mosaic_0001>

<bundles_post_ra>
// kernel: tpu_custom_call.1
= control target key start
LH: loop header
LB: loop body
LE: loop exit
PB: predicated region body
PF: predicated region fallthrough
CT: control target
= control target key end

     0   :  { %s9162_s0 = inlined_call_operand.hbm [shape: f32[16,128], index: 0, kind: input, shape index: {}]   ;;  %s9163_s1 = inlined_call_operand.hbm [shape: bf16[128,512], index: 1, kind: input, shape index: {}]   ;;  %s9164_s2 = inlined_call_operand.hbm [shape: f32[1,512], index: 2, kind: input, shape index: {}]   ;;  %s9165_s3 = inlined_call_operand.hbm [shape: bf16[512,1024], index: 3, kind: input, shape index: {}]   ;;  %s9166_s4 = inlined_call_operand.hbm [shape: f32[1,1024], index: 4, kind: input, shape index: {}]   ;;  %s9167_s5 = inlined_call_operand.hbm [shape: bf16[1024,1024], index: 5, kind: input, shape index: {}]   ;;  %s9168_s6 = inlined_call_operand.hbm [shape: f32[1,1024], index: 6, kind: input, shape index: {}]   ;;  %s9169_s7 = inlined_call_operand.hbm [shape: bf16[1024,256], index: 7, kind: input, shape index: {}]   ;;  %s9170_s8 = inlined_call_operand.hbm [shape: f32[1,256], index: 8, kind: input, shape index: {}]   ;;  %s9171_s9 = inlined_call_operand.hbm [shape: bf16[1,256], index: 9, kind: input, shape index: {}]   ;;  %s9172_s10 = inlined_call_operand.<no memory space> [shape: f32[1,1], index: 10, kind: input, shape index: {}]   ;;  %s9173_s11 = inlined_call_operand.vmem [shape: f32[16,1], index: 11, kind: output, shape index: {0}]   ;;  %s9174_s12 = inlined_call_operand.hbm [shape: f32[16,512], index: 12, kind: output, shape index: {1}]  }
   0x1   :  { %v18_v0 = vstv %s9172_s10 }
   0x2   :  { %19 = vst [vmem:[#allocation5] sm:$0x1] %v18_v0 }
   0x3   :  { %20 = vsyncpa [#allocation7], 0 }
   0x4   :  { %21 = vsyncpa [#allocation10], 0 }
   0x5   :  { %22 = vsyncpa [#allocation13], 0 }
   0x6   :  { %23 = vsyncpa [#allocation16], 0 }
   0x7   :  { %24 = vsyncpa [#allocation19], 0 }
   0x8   :  { %25 = vsyncpa [#allocation8], 0  ;;  %s8719_s23 = smov [#allocation9]  }
   0x9   :  { %s43_s24 = sshll.u32 %s8719_s23, 4  ;;  %s44_s24 = int_to_ptr.vmem [resolvable:$true] %s43_s24 }
   0xa   :  { %s8491_s25 = scalar_lea.vmem %s44_s24, 4096  ;;  %p8496_p1 = scmp.lt.s32.totalorder %s44_s24, %s44_s24 }
   0xb   :  { %p8492_p0 = scmp.ne.s32.totalorder %s44_s24, %s8491_s25  ;;  %p8497_p2 = scmp.lt.s32.totalorder %s8491_s25, %s8491_s25 }
   0xd   :  { %p8498_p3 = por %p8497_p2, %p8496_p1 }
   0xf   :  { %p8499_p4 = pnand %p8498_p3, %p8492_p0 }
  0x11   :  { %8502 = shalt.err (!%p8499_p4)
}
  0x12   :  { %s8720_s26 = smov 256   ;;  %s8721_s27 = smov 16  }
  0x13   :  { %49 = dma.hbm_to_vmem [thread:$0]  %s9163_s1, 4096, %s44_s24, [#allocation10], %s8720_s26, %s8720_s26, %s8721_s27  }
  0x14   :  { %s8722_s29 = smov [#allocation12]  }
  0x15   :  { %s65_s30 = sshll.u32 %s8722_s29, 4  ;;  %s66_s30 = int_to_ptr.vmem [resolvable:$true] %s65_s30 }
  0x16   :  { %s8511_s13 = scalar_lea.vmem %s66_s30, 32768  ;;  %p8516_p6 = scmp.lt.s32.totalorder %s66_s30, %s66_s30 }
  0x17   :  { %p8512_p5 = scmp.ne.s32.totalorder %s66_s30, %s8511_s13  ;;  %p8517_p7 = scmp.lt.s32.totalorder %s8511_s13, %s8511_s13 }
  0x19   :  { %p8518_p8 = por %p8517_p7, %p8516_p6 }
  0x1b   :  { %p8519_p9 = pnand %p8518_p8, %p8512_p5 }
  0x1d   :  { %8522 = shalt.err (!%p8519_p9)
}
  0x1e   :  { %s8723_s14 = smov 512   ;;  %s8724_s15 = smov 32  }
  0x1f   :  { %71 = dma.hbm_to_vmem [thread:$0]  %s9165_s3, 32768, %s66_s30, [#allocation13], %s8723_s14, %s8723_s14, %s8724_s15  }
  0x20   :  { %s8725_s1 = smov [#allocation15]   ;;  %s8726_s19 = smov [#allocation6]  }
  0x21   :  { %s88_s18 = sshll.u32 %s8725_s1, 4  ;;  %s31_s20 = sshll.u32 %s8726_s19, 4  ;;  %s89_s18 = int_to_ptr.vmem [resolvable:$true] %s88_s18  ;;  %s32_s20 = int_to_ptr.vmem [resolvable:$true] %s31_s20 }
  0x22   :  { %s8531_s21 = scalar_lea.vmem %s89_s18, 128  ;;  %p8536_p11 = scmp.lt.s32.totalorder %s89_s18, %s89_s18 }
  0x23   :  { %p8532_p10 = scmp.ne.s32.totalorder %s89_s18, %s8531_s21  ;;  %p8537_p12 = scmp.lt.s32.totalorder %s8531_s21, %s8531_s21 }
  0x25   :  { %p8538_p13 = por %p8537_p12, %p8536_p11 }
  0x27   :  { %p8539_p0 = pnand %p8538_p13, %p8532_p10 }
  0x29   :  { %8542 = shalt.err (!%p8539_p0)
}
  0x2a   :  { %91 = dma.hbm_to_vmem [thread:$0]  %s9168_s6, 128, %s89_s18, [#allocation16]  }
  0x2b   :  { %s8551_s24 = scalar_lea.vmem %s32_s20, 256  ;;  %p8556_p2 = scmp.lt.s32.totalorder %s32_s20, %s32_s20 }
  0x2c   :  { %p8552_p1 = scmp.ne.s32.totalorder %s32_s20, %s8551_s24  ;;  %p8557_p3 = scmp.lt.s32.totalorder %s8551_s24, %s8551_s24 }
  0x2e   :  { %p8558_p4 = por %p8557_p3, %p8556_p2 }
  0x30   :  { %p8559_p5 = pnand %p8558_p4, %p8552_p1 }
  0x32   :  { %8562 = shalt.err (!%p8559_p5)
}
  0x33   :  { %s8727_s3 = smov 128   ;;  %s8728_s25 = smov 8  }
  0x34   :  { %37 = dma.hbm_to_vmem [thread:$0]  %s9162_s0, 256, %s32_s20, [#allocation7], %s8727_s3, %s8727_s3, %s8728_s25  }
  0x35   :  { %s8729_s10 = smov [#allocation11]   ;;  %s8730_s29 = smov [#allocation14]  }
  0x36   :  { %s56_s28 = sshll.u32 %s8729_s10, 4  ;;  %s78_s30 = sshll.u32 %s8730_s29, 4  ;;  %s57_s28 = int_to_ptr.vmem [resolvable:$true] %s56_s28  ;;  %s79_s30 = int_to_ptr.vmem [resolvable:$true] %s78_s30 }
  0x37   :  { %s8571_s6 = scalar_lea.vmem %s57_s28, 64  ;;  %p8576_p7 = scmp.lt.s32.totalorder %s57_s28, %s57_s28 }
  0x38   :  { %p8572_p6 = scmp.ne.s32.totalorder %s57_s28, %s8571_s6  ;;  %p8577_p8 = scmp.lt.s32.totalorder %s8571_s6, %s8571_s6 }
  0x3a   :  { %p8578_p9 = por %p8577_p8, %p8576_p7 }
  0x3c   :  { %p8579_p10 = pnand %p8578_p9, %p8572_p6 }
  0x3e   :  { %8582 = shalt.err (!%p8579_p10)
}
  0x3f   :  { %59 = dma.hbm_to_vmem [thread:$0]  %s9164_s2, 64, %s57_s28, [#allocation10]  }
  0x40   :  { %s8591_s17 = scalar_lea.vmem %s79_s30, 128  ;;  %p8596_p12 = scmp.lt.s32.totalorder %s79_s30, %s79_s30 }
  0x41   :  { %p8592_p11 = scmp.ne.s32.totalorder %s79_s30, %s8591_s17  ;;  %p8597_p13 = scmp.lt.s32.totalorder %s8591_s17, %s8591_s17 }
  0x43   :  { %p8598_p0 = por %p8597_p13, %p8596_p12 }
  0x45   :  { %p8599_p1 = pnand %p8598_p0, %p8592_p11 }
  0x47   :  { %8602 = shalt.err (!%p8599_p1)
}
  0x48   :  { %81 = dma.hbm_to_vmem [thread:$0]  %s9166_s4, 128, %s79_s30, [#allocation13]  }
  0x49   :  { %s8731_s18 = smov [#allocation17]   ;;  %s8732_s20 = smov [#allocation18]  }
  0x4a   :  { %s98_s19 = sshll.u32 %s8731_s18, 4  ;;  %s108_s21 = sshll.u32 %s8732_s20, 4  ;;  %s99_s19 = int_to_ptr.vmem [resolvable:$true] %s98_s19  ;;  %s109_s21 = int_to_ptr.vmem [resolvable:$true] %s108_s21 }
  0x4b   :  { %s8611_s22 = scalar_lea.vmem %s99_s19, 32  ;;  %p8616_p3 = scmp.lt.s32.totalorder %s99_s19, %s99_s19 }
  0x4c   :  { %p8612_p2 = scmp.ne.s32.totalorder %s99_s19, %s8611_s22  ;;  %p8617_p4 = scmp.lt.s32.totalorder %s8611_s22, %s8611_s22 }
  0x4e   :  { %p8618_p5 = por %p8617_p4, %p8616_p3 }
  0x50   :  { %p8619_p6 = pnand %p8618_p5, %p8612_p2 }
  0x52   :  { %8622 = shalt.err (!%p8619_p6)
}
  0x53   :  { %101 = dma.hbm_to_vmem [thread:$0]  %s9170_s8, 32, %s99_s19, [#allocation16]  }
  0x54   :  { %s8631_s24 = scalar_lea.vmem %s109_s21, 32  ;;  %p8636_p8 = scmp.lt.s32.totalorder %s109_s21, %s109_s21 }
  0x55   :  { %p8632_p7 = scmp.ne.s32.totalorder %s109_s21, %s8631_s24  ;;  %p8637_p9 = scmp.lt.s32.totalorder %s8631_s24, %s8631_s24 }
  0x57   :  { %p8638_p10 = por %p8637_p9, %p8636_p8 }
  0x59   :  { %p8639_p11 = pnand %p8638_p10, %p8632_p7 }
  0x5b   :  { %8642 = shalt.err (!%p8639_p11)
}
  0x5c   :  { %111 = dma.hbm_to_vmem [thread:$0]  %s9171_s9, 32, %s109_s21, [#allocation19]  }
  0x5d   :  { %8703 = dma.done.wait [#allocation7], 256  }
  0x5e   :  { %8704 = vsyncadd [#allocation7], 4294967040 }
  0x5f   :  { %8705 = dma.done.wait [#allocation10], 4160  }
  0x60   :  { %8706 = vsyncadd [#allocation10], 4294963136 }
  0x61   :  { %8707 = dma.done.wait [#allocation13], 32896  }
  0x62   :  { %8708 = vsyncadd [#allocation13], 4294934400 }
  0x63   :  { %8709 = dma.done.wait [#allocation16], 160  }
  0x64   :  { %8710 = vsyncadd [#allocation16], 4294967136 }
  0x65   :  { %8711 = dma.done.wait [#allocation19], 32  }
  0x66   :  { %8712 = vsyncadd [#allocation19], 4294967264  ;;  %v8733_v1 = vmov 0   ;;  %v8242_v2 = vld [vmem:[#allocation9 + $0xe4] ss:$16 sps:$4 sm:$0xff]   ;;  %v163_v39 = vld [vmem:[#allocation6 + $0x8] sm:$0xff] }
  0x67   :  { %411 = vmatprep.mubr.bf16.mxu0 %v8733_v1  ;;  %454 = vmatprep.mubr.bf16.mxu1 %v8733_v1  ;;  %v8244_v3 = vld [vmem:[#allocation9 + $0xec] ss:$16 sps:$4 sm:$0xff]   ;;  %v8246_v4 = vld [vmem:[#allocation9 + $0xe0] ss:$16 sps:$4 sm:$0xff]   ;;  %v8247_v5 = vld [vmem:[#allocation9 + $0xe8] ss:$16 sps:$4 sm:$0xff]  }
  0x68   :  { %379 = vmatprep.subr.bf16.mxu0 %v8242_v2  ;;  %422 = vmatprep.subr.bf16.mxu1 %v8244_v3  ;;  %v8248_v6 = vld [vmem:[#allocation9 + $0xc4] ss:$16 sps:$4 sm:$0xff]   ;;  %v8250_v7 = vld [vmem:[#allocation9 + $0xcc] ss:$16 sps:$4 sm:$0xff]   ;;  %v8252_v8 = vld [vmem:[#allocation9 + $0xc0] ss:$16 sps:$4 sm:$0xff]  }
  0x69   :  { %380 = vmatpush1.bf16.msra.mxu0 %v8246_v4  ;;  %423 = vmatpush1.bf16.msra.mxu1 %v8247_v5  ;;  %v8253_v9 = vld [vmem:[#allocation9 + $0xc8] ss:$16 sps:$4 sm:$0xff]   ;;  %v8254_v10 = vld [vmem:[#allocation9 + $0xa4] ss:$16 sps:$4 sm:$0xff]   ;;  %v8256_v11 = vld [vmem:[#allocation9 + $0xac] ss:$16 sps:$4 sm:$0xff]  }
  0x6a   :  { %381 = vmatprep.subr.bf16.mxu0 %v8248_v6  ;;  %424 = vmatprep.subr.bf16.mxu1 %v8250_v7  ;;  %v8258_v12 = vld [vmem:[#allocation9 + $0xa0] ss:$16 sps:$4 sm:$0xff]   ;;  %v8259_v13 = vld [vmem:[#allocation9 + $0xa8] ss:$16 sps:$4 sm:$0xff]   ;;  %v8260_v14 = vld [vmem:[#allocation9 + $0x84] ss:$16 sps:$4 sm:$0xff]  }
  0x6b   :  { %v8262_v15 = vld [vmem:[#allocation9 + $0x8c] ss:$16 sps:$4 sm:$0xff]   ;;  %v8264_v16 = vld [vmem:[#allocation9 + $0x80] ss:$16 sps:$4 sm:$0xff]   ;;  %v8265_v17 = vld [vmem:[#allocation9 + $0x88] ss:$16 sps:$4 sm:$0xff]  }
  0x6c   :  { %v8266_v18 = vld [vmem:[#allocation9 + $0x64] ss:$16 sps:$4 sm:$0xff]   ;;  %v8268_v19 = vld [vmem:[#allocation9 + $0x6c] ss:$16 sps:$4 sm:$0xff]   ;;  %v8270_v20 = vld [vmem:[#allocation9 + $0x60] ss:$16 sps:$4 sm:$0xff]  }
  0x6d   :  { %382 = vmatpush1.bf16.msra.mxu0 %v8252_v8  ;;  %425 = vmatpush1.bf16.msra.mxu1 %v8253_v9  ;;  %v8271_v21 = vld [vmem:[#allocation9 + $0x68] ss:$16 sps:$4 sm:$0xff]   ;;  %v8272_v22 = vld [vmem:[#allocation9 + $0x44] ss:$16 sps:$4 sm:$0xff]   ;;  %v8274_v23 = vld [vmem:[#allocation9 + $0x4c] ss:$16 sps:$4 sm:$0xff]  }
  0x6e   :  { %383 = vmatprep.subr.bf16.mxu0 %v8254_v10  ;;  %426 = vmatprep.subr.bf16.mxu1 %v8256_v11  ;;  %v8276_v24 = vld [vmem:[#allocation9 + $0x40] ss:$16 sps:$4 sm:$0xff]   ;;  %v8277_v25 = vld [vmem:[#allocation9 + $0x48] ss:$16 sps:$4 sm:$0xff]   ;;  %v8278_v26 = vld [vmem:[#allocation9 + $0x24] ss:$16 sps:$4 sm:$0xff]  }
  0x6f   :  { %v8280_v27 = vld [vmem:[#allocation9 + $0x2c] ss:$16 sps:$4 sm:$0xff]   ;;  %v8282_v28 = vld [vmem:[#allocation9 + $0x20] ss:$16 sps:$4 sm:$0xff]   ;;  %v8283_v29 = vld [vmem:[#allocation9 + $0x28] ss:$16 sps:$4 sm:$0xff]  }
  0x70   :  { %v8284_v30 = vld [vmem:[#allocation9 + $0x4] ss:$16 sps:$4 sm:$0xff]   ;;  %v8286_v31 = vld [vmem:[#allocation9 + $0xc] ss:$16 sps:$4 sm:$0xff]   ;;  %v8288_v36 = vld [vmem:[#allocation9] ss:$16 sps:$4 sm:$0xff]  }
  0x71   :  { %384 = vmatpush1.bf16.msra.mxu0 %v8258_v12  ;;  %427 = vmatpush1.bf16.msra.mxu1 %v8259_v13  ;;  %v533_v32 = vld [vmem:[#allocation12 + $0x1c0] sm:$0xff]  ;;  %v162_v38 = vld [vmem:[#allocation6] sm:$0xff]  ;;  %s8734_s8 = smov [#allocation2]   ;;  %s8735_s25 = smov [#allocation3]  }
  0x72   :  { %385 = vmatprep.subr.bf16.mxu0 %v8260_v14  ;;  %428 = vmatprep.subr.bf16.mxu1 %v8262_v15  ;;  %v537_v33 = vld [vmem:[#allocation12 + $0x1e0] sm:$0xff]  ;;  %v164_v46 = vpack.c.bf16 %v163_v39, %v162_v38  ;;  %s146_s9 = sshll.u32 %s8734_s8, 4  ;;  %s158_s26 = sshll.u32 %s8735_s25, 4  ;;  %s147_s9 = int_to_ptr.vmem [resolvable:$true] %s146_s9  ;;  %s159_s26 = int_to_ptr.vmem [resolvable:$true] %s158_s26 }
  0x73   :  { %v661_v34 = vld [vmem:[#allocation12 + $0x5c0] sm:$0xff]  ;;  %v7382_v40 = vcombine.high %v533_v32, %v537_v33  ;;  %v7381_v47 = vcombine.low %v533_v32, %v537_v33  ;;  %s8651_s27 = scalar_lea.vmem %s147_s9, 65536  ;;  %p8656_p13 = scmp.lt.s32.totalorder %s147_s9, %s147_s9 }
  0x74   :  { %v665_v35 = vld [vmem:[#allocation12 + $0x5e0] sm:$0xff]  ;;  %p8652_p12 = scmp.ne.s32.totalorder %s147_s9, %s8651_s27  ;;  %p8657_p0 = scmp.lt.s32.totalorder %s8651_s27, %s8651_s27 }
  0x75   :  { %386 = vmatpush1.bf16.msra.mxu0 %v8264_v16  ;;  %429 = vmatpush1.bf16.msra.mxu1 %v8265_v17  ;;  %v8289_v37 = vld [vmem:[#allocation9 + $0x8] ss:$16 sps:$4 sm:$0xff]   ;;  %v7510_v41 = vcombine.high %v661_v34, %v665_v35  ;;  %v7509_v48 = vcombine.low %v661_v34, %v665_v35 }
  0x76   :  { %387 = vmatprep.subr.bf16.mxu0 %v8266_v18  ;;  %430 = vmatprep.subr.bf16.mxu1 %v8268_v19  ;;  %v525_v42 = vld [vmem:[#allocation12 + $0x180] sm:$0xff]  ;;  %p8658_p1 = por %p8657_p0, %p8656_p13 }
  0x77   :  { %v529_v43 = vld [vmem:[#allocation12 + $0x1a0] sm:$0xff] }
  0x78   :  { %v653_v44 = vld [vmem:[#allocation12 + $0x580] sm:$0xff]  ;;  %v7374_v49 = vcombine.high %v525_v42, %v529_v43  ;;  %v7373_v55 = vcombine.low %v525_v42, %v529_v43  ;;  %p8659_p2 = pnand %p8658_p1, %p8652_p12 }
  0x79   :  { %388 = vmatpush1.bf16.msra.mxu0 %v8270_v20  ;;  %431 = vmatpush1.bf16.msra.mxu1 %v8271_v21  ;;  %v657_v45 = vld [vmem:[#allocation12 + $0x5a0] sm:$0xff] }
  0x7a   :  { %389 = vmatprep.subr.bf16.mxu0 %v8272_v22  ;;  %432 = vmatprep.subr.bf16.mxu1 %v8274_v23  ;;  %v7502_v50 = vcombine.high %v653_v44, %v657_v45  ;;  %v517_v51 = vld [vmem:[#allocation12 + $0x140] sm:$0xff]  ;;  %v7501_v56 = vcombine.low %v653_v44, %v657_v45 }
  0x7b   :  { %v521_v52 = vld [vmem:[#allocation12 + $0x160] sm:$0xff] }
  0x7c   :  { %v645_v53 = vld [vmem:[#allocation12 + $0x540] sm:$0xff]  ;;  %v7366_v57 = vcombine.high %v517_v51, %v521_v52  ;;  %v7365_v63 = vcombine.low %v517_v51, %v521_v52 }
  0x7d   :  { %390 = vmatpush1.bf16.msra.mxu0 %v8276_v24  ;;  %433 = vmatpush1.bf16.msra.mxu1 %v8277_v25  ;;  %v649_v54 = vld [vmem:[#allocation12 + $0x560] sm:$0xff] }
  0x7e   :  { %391 = vmatprep.subr.bf16.mxu0 %v8278_v26  ;;  %434 = vmatprep.subr.bf16.mxu1 %v8280_v27  ;;  %v7494_v58 = vcombine.high %v645_v53, %v649_v54  ;;  %v509_v59 = vld [vmem:[#allocation12 + $0x100] sm:$0xff]  ;;  %v7493_v0 = vcombine.low %v645_v53, %v649_v54 }
  0x7f   :  { %v513_v60 = vld [vmem:[#allocation12 + $0x120] sm:$0xff] }
  0x80   :  { %v637_v61 = vld [vmem:[#allocation12 + $0x500] sm:$0xff]  ;;  %v7358_v1 = vcombine.high %v509_v59, %v513_v60  ;;  %v7357_v7 = vcombine.low %v509_v59, %v513_v60 }
  0x81   :  { %392 = vmatpush1.bf16.msra.mxu0 %v8282_v28  ;;  %435 = vmatpush1.bf16.msra.mxu1 %v8283_v29  ;;  %v641_v62 = vld [vmem:[#allocation12 + $0x520] sm:$0xff] }
  0x82   :  { %393 = vmatprep.subr.bf16.mxu0 %v8284_v30  ;;  %436 = vmatprep.subr.bf16.mxu1 %v8286_v31  ;;  %v7486_v2 = vcombine.high %v637_v61, %v641_v62  ;;  %v501_v3 = vld [vmem:[#allocation12 + $0xc0] sm:$0xff]  ;;  %v7485_v8 = vcombine.low %v637_v61, %v641_v62 }
  0x83   :  { %v505_v4 = vld [vmem:[#allocation12 + $0xe0] sm:$0xff] }
  0x84   :  { %v629_v5 = vld [vmem:[#allocation12 + $0x4c0] sm:$0xff]  ;;  %v7350_v9 = vcombine.high %v501_v3, %v505_v4  ;;  %v7349_v15 = vcombine.low %v501_v3, %v505_v4 }
  0x85   :  { %394 = vmatpush1.bf16.msra.mxu0 %v8288_v36  ;;  %437 = vmatpush1.bf16.msra.mxu1 %v8289_v37  ;;  %v633_v6 = vld [vmem:[#allocation12 + $0x4e0] sm:$0xff] }
  0x86   :  { %2055 = vmatprep.subr.bf16.mxu0 %v7382_v40  ;;  %2098 = vmatprep.subr.bf16.mxu1 %v7510_v41  ;;  %v7478_v10 = vcombine.high %v629_v5, %v633_v6  ;;  %v493_v11 = vld [vmem:[#allocation12 + $0x80] sm:$0xff]  ;;  %v7477_v16 = vcombine.low %v629_v5, %v633_v6 }
  0x87   :  { %v497_v12 = vld [vmem:[#allocation12 + $0xa0] sm:$0xff] }
  0x88   :  { %412 = vmatmul.mubr.bf16.vlgmr.msra.gmra.mxu0 %v164_v46  ;;  %455 = vmatmul.mubr.bf16.vlgmr.msra.gmra.mxu1 %v164_v46  ;;  %v621_v13 = vld [vmem:[#allocation12 + $0x480] sm:$0xff]  ;;  %v7342_v17 = vcombine.high %v493_v11, %v497_v12  ;;  %v7341_v23 = vcombine.low %v493_v11, %v497_v12 }
  0x89   :  { %2056 = vmatpush1.bf16.msra.mxu0 %v7381_v47  ;;  %2099 = vmatpush1.bf16.msra.mxu1 %v7509_v48  ;;  %v625_v14 = vld [vmem:[#allocation12 + $0x4a0] sm:$0xff] }
  0x8a   :  { %2057 = vmatprep.subr.bf16.mxu0 %v7374_v49  ;;  %2100 = vmatprep.subr.bf16.mxu1 %v7502_v50  ;;  %v7470_v18 = vcombine.high %v621_v13, %v625_v14  ;;  %v485_v19 = vld [vmem:[#allocation12 + $0x40] sm:$0xff]  ;;  %v7469_v24 = vcombine.low %v621_v13, %v625_v14 }
  0x8b   :  { %v489_v20 = vld [vmem:[#allocation12 + $0x60] sm:$0xff] }
  0x8c   :  { %v613_v21 = vld [vmem:[#allocation12 + $0x440] sm:$0xff]  ;;  %v7334_v25 = vcombine.high %v485_v19, %v489_v20  ;;  %v7333_v31 = vcombine.low %v485_v19, %v489_v20 }
  0x8d   :  { %2058 = vmatpush1.bf16.msra.mxu0 %v7373_v55  ;;  %2101 = vmatpush1.bf16.msra.mxu1 %v7501_v56  ;;  %v617_v22 = vld [vmem:[#allocation12 + $0x460] sm:$0xff] }
  0x8e   :  { %2059 = vmatprep.subr.bf16.mxu0 %v7366_v57  ;;  %2102 = vmatprep.subr.bf16.mxu1 %v7494_v58  ;;  %v7462_v26 = vcombine.high %v613_v21, %v617_v22  ;;  %v477_v27 = vld [vmem:[#allocation12] sm:$0xff]  ;;  %v7461_v32 = vcombine.low %v613_v21, %v617_v22 }
  0x8f   :  { %v481_v28 = vld [vmem:[#allocation12 + $0x20] sm:$0xff] }
  0x90   :  { %v605_v29 = vld [vmem:[#allocation12 + $0x400] sm:$0xff]  ;;  %v7326_v33 = vcombine.high %v477_v27, %v481_v28  ;;  %v7325_v39 = vcombine.low %v477_v27, %v481_v28 }
  0x91   :  { %2060 = vmatpush1.bf16.msra.mxu0 %v7365_v63  ;;  %2103 = vmatpush1.bf16.msra.mxu1 %v7493_v0  ;;  %v609_v30 = vld [vmem:[#allocation12 + $0x420] sm:$0xff] }
  0x92   :  { %2061 = vmatprep.subr.bf16.mxu0 %v7358_v1  ;;  %2104 = vmatprep.subr.bf16.mxu1 %v7486_v2  ;;  %v7454_v34 = vcombine.high %v605_v29, %v609_v30  ;;  %v597_v35 = vld [vmem:[#allocation12 + $0x3c0] sm:$0xff]  ;;  %v7453_v40 = vcombine.low %v605_v29, %v609_v30 }
  0x93   :  { %v601_v36 = vld [vmem:[#allocation12 + $0x3e0] sm:$0xff] }
  0x94   :  { %v725_v37 = vld [vmem:[#allocation12 + $0x7c0] sm:$0xff]  ;;  %v7446_v41 = vcombine.high %v597_v35, %v601_v36  ;;  %v7445_v47 = vcombine.low %v597_v35, %v601_v36 }
  0x95   :  { %2062 = vmatpush1.bf16.msra.mxu0 %v7357_v7  ;;  %2105 = vmatpush1.bf16.msra.mxu1 %v7485_v8  ;;  %v729_v38 = vld [vmem:[#allocation12 + $0x7e0] sm:$0xff] }
  0x96   :  { %2063 = vmatprep.subr.bf16.mxu0 %v7350_v9  ;;  %2106 = vmatprep.subr.bf16.mxu1 %v7478_v10  ;;  %v7574_v42 = vcombine.high %v725_v37, %v729_v38  ;;  %v589_v43 = vld [vmem:[#allocation12 + $0x380] sm:$0xff]  ;;  %v7573_v48 = vcombine.low %v725_v37, %v729_v38  ;;  %v8832_v37 = vld [vmem:[#allocation12 + $0x1c8] sm:$0xff] }
  0x97   :  { %v593_v44 = vld [vmem:[#allocation12 + $0x3a0] sm:$0xff]  ;;  %v8834_v38 = vld [vmem:[#allocation12 + $0x1e8] sm:$0xff] }
  0x98   :  { %v717_v45 = vld [vmem:[#allocation12 + $0x780] sm:$0xff]  ;;  %v7438_v49 = vcombine.high %v589_v43, %v593_v44  ;;  %v7437_v55 = vcombine.low %v589_v43, %v593_v44 }
  0x99   :  { %2064 = vmatpush1.bf16.msra.mxu0 %v7349_v15  ;;  %2107 = vmatpush1.bf16.msra.mxu1 %v7477_v16  ;;  %v721_v46 = vld [vmem:[#allocation12 + $0x7a0] sm:$0xff] }
  0x9a   :  { %2065 = vmatprep.subr.bf16.mxu0 %v7342_v17  ;;  %2108 = vmatprep.subr.bf16.mxu1 %v7470_v18  ;;  %v7566_v50 = vcombine.high %v717_v45, %v721_v46  ;;  %v581_v51 = vld [vmem:[#allocation12 + $0x340] sm:$0xff]  ;;  %v7565_v56 = vcombine.low %v717_v45, %v721_v46  ;;  %v199_v45 = vlaneseq }
  0x9b   :  { %v585_v52 = vld [vmem:[#allocation12 + $0x360] sm:$0xff] }
  0x9c   :  { %v709_v53 = vld [vmem:[#allocation12 + $0x740] sm:$0xff]  ;;  %v7430_v57 = vcombine.high %v581_v51, %v585_v52  ;;  %v7429_v63 = vcombine.low %v581_v51, %v585_v52  ;;  %v8844_v46 = vshrl.u32 %v199_v45, 7  ;;  %v626_v45 = vld [vmem:[#allocation12 + $0x4a8] sm:$0xff] }
  0x9d   :  { %2066 = vmatpush1.bf16.msra.mxu0 %v7341_v23  ;;  %2109 = vmatpush1.bf16.msra.mxu1 %v7469_v24  ;;  %v713_v54 = vld [vmem:[#allocation12 + $0x760] sm:$0xff] }
  0x9e   :  { %2067 = vmatprep.subr.bf16.mxu0 %v7334_v25  ;;  %2110 = vmatprep.subr.bf16.mxu1 %v7462_v26  ;;  %v7558_v58 = vcombine.high %v709_v53, %v713_v54  ;;  %v573_v59 = vld [vmem:[#allocation12 + $0x300] sm:$0xff]  ;;  %v7557_v0 = vcombine.low %v709_v53, %v713_v54  ;;  %v8856_v51 = vsub.s32 3, %v8844_v46 }
  0x9f   :  { %v577_v60 = vld [vmem:[#allocation12 + $0x320] sm:$0xff] }
  0xa0   :  { %v701_v61 = vld [vmem:[#allocation12 + $0x700] sm:$0xff]  ;;  %v7422_v1 = vcombine.high %v573_v59, %v577_v60  ;;  %v7421_v7 = vcombine.low %v573_v59, %v577_v60 }
  0xa1   :  { %2068 = vmatpush1.bf16.msra.mxu0 %v7333_v31  ;;  %2111 = vmatpush1.bf16.msra.mxu1 %v7461_v32  ;;  %v705_v62 = vld [vmem:[#allocation12 + $0x720] sm:$0xff] }
  0xa2   :  { %2069 = vmatprep.subr.bf16.mxu0 %v7326_v33  ;;  %2112 = vmatprep.subr.bf16.mxu1 %v7454_v34  ;;  %v7550_v2 = vcombine.high %v701_v61, %v705_v62  ;;  %v565_v3 = vld [vmem:[#allocation12 + $0x2c0] sm:$0xff]  ;;  %v7549_v8 = vcombine.low %v701_v61, %v705_v62 }
  0xa3   :  { %v569_v4 = vld [vmem:[#allocation12 + $0x2e0] sm:$0xff] }
  0xa4   :  { %v693_v5 = vld [vmem:[#allocation12 + $0x6c0] sm:$0xff]  ;;  %v7414_v9 = vcombine.high %v565_v3, %v569_v4  ;;  %v7413_v15 = vcombine.low %v565_v3, %v569_v4 }
  0xa5   :  { %2070 = vmatpush1.bf16.msra.mxu0 %v7325_v39  ;;  %2113 = vmatpush1.bf16.msra.mxu1 %v7453_v40  ;;  %v697_v6 = vld [vmem:[#allocation12 + $0x6e0] sm:$0xff]  ;;  %v8836_v39 = vld [vmem:[#allocation12 + $0x5c8] sm:$0xff]  ;;  %v7384_v40 = vcombine.high %v8832_v37, %v8834_v38 }
  0xa6   :  { %2071 = vmatprep.subr.bf16.mxu0 %v7446_v41  ;;  %2114 = vmatprep.subr.bf16.mxu1 %v7574_v42  ;;  %v7542_v10 = vcombine.high %v693_v5, %v697_v6  ;;  %v557_v11 = vld [vmem:[#allocation12 + $0x280] sm:$0xff]  ;;  %v7541_v16 = vcombine.low %v693_v5, %v697_v6  ;;  %v666_v41 = vld [vmem:[#allocation12 + $0x5e8] sm:$0xff]  ;;  %v7383_v42 = vcombine.low %v8832_v37, %v8834_v38 }
  0xa7   :  { %v561_v12 = vld [vmem:[#allocation12 + $0x2a0] sm:$0xff]  ;;  %v7511_v43 = vcombine.low %v8836_v39, %v666_v41  ;;  %v7512_v44 = vcombine.high %v8836_v39, %v666_v41  ;;  %v634_v37 = vld [vmem:[#allocation12 + $0x4e8] sm:$0xff] }
  0xa8   :  { %v685_v13 = vld [vmem:[#allocation12 + $0x680] sm:$0xff]  ;;  %v7406_v17 = vcombine.high %v557_v11, %v561_v12  ;;  %v7405_v19 = vcombine.low %v557_v11, %v561_v12  ;;  %v658_v11 = vld [vmem:[#allocation12 + $0x5a8] sm:$0xff] }
  0xa9   :  { %2072 = vmatpush2.bf16.msra.mxu0 %v7445_v47  ;;  %2115 = vmatpush2.bf16.msra.mxu1 %v7573_v48  ;;  %v689_v14 = vld [vmem:[#allocation12 + $0x6a0] sm:$0xff]  ;;  %v8847_v47 = vsub.s32 0, %v8844_v46  ;;  %v8850_v48 = vsub.s32 2, %v8844_v46 }
  0xaa   :  { %2073 = vmatprep.subr.bf16.mxu0 %v7438_v49  ;;  %2116 = vmatprep.subr.bf16.mxu1 %v7566_v50  ;;  %v7534_v18 = vcombine.high %v685_v13, %v689_v14  ;;  %v7533_v20 = vcombine.low %v685_v13, %v689_v14  ;;  %v549_v21 = vld [vmem:[#allocation12 + $0x240] sm:$0xff]  ;;  %v197_v49 = vld [vmem:[#allocation11] sm:$0xf]  ;;  %v8853_v50 = vsub.s32 1, %v8844_v46 }
  0xab   :  { %v553_v22 = vld [vmem:[#allocation12 + $0x260] sm:$0xff]  ;;  %v202_v52 = vrot.slane %v197_v49, %v8847_v47  ;;  %v210_v53 = vrot.slane %v197_v49, %v8850_v48 }
  0xac   :  { %v677_v23 = vld [vmem:[#allocation12 + $0x640] sm:$0xff]  ;;  %v7398_v24 = vcombine.high %v549_v21, %v553_v22  ;;  %v7397_v26 = vcombine.low %v549_v21, %v553_v22  ;;  %v206_v54 = vrot.slane %v197_v49, %v8853_v50  ;;  %v650_v21 = vld [vmem:[#allocation12 + $0x568] sm:$0xff] }
  0xad   :  { %2074 = vmatpush2.bf16.msra.mxu0 %v7437_v55  ;;  %2117 = vmatpush2.bf16.msra.mxu1 %v7565_v56  ;;  %v681_v25 = vld [vmem:[#allocation12 + $0x660] sm:$0xff]  ;;  %v214_v55 = vrot.slane %v197_v49, %v8856_v51 }
  0xae   :  { %2075 = vmatprep.subr.bf16.mxu0 %v7430_v57  ;;  %2118 = vmatprep.subr.bf16.mxu1 %v7558_v58  ;;  %v7525_v27 = vcombine.low %v677_v23, %v681_v25  ;;  %v7526_v28 = vcombine.high %v677_v23, %v681_v25  ;;  %v541_v29 = vld [vmem:[#allocation12 + $0x200] sm:$0xff] }
  0xaf   :  { %v545_v30 = vld [vmem:[#allocation12 + $0x220] sm:$0xff] }
  0xb0   :  { %v669_v31 = vld [vmem:[#allocation12 + $0x600] sm:$0xff]  ;;  %v7390_v32 = vcombine.high %v541_v29, %v545_v30  ;;  %v7389_v34 = vcombine.low %v541_v29, %v545_v30  ;;  %v642_v29 = vld [vmem:[#allocation12 + $0x528] sm:$0xff] }
  0xb1   :  { %2076 = vmatpush2.bf16.msra.mxu0 %v7429_v63  ;;  %2119 = vmatpush2.bf16.msra.mxu1 %v7557_v0  ;;  %v673_v33 = vld [vmem:[#allocation12 + $0x620] sm:$0xff] }
  0xb2   :  { %2077 = vmatprep.subr.bf16.mxu0 %v7422_v1  ;;  %2120 = vmatprep.subr.bf16.mxu1 %v7550_v2  ;;  %v7517_v35 = vcombine.low %v669_v31, %v673_v33  ;;  %v7518_v36 = vcombine.high %v669_v31, %v673_v33 }
  0xb5   :  { %2078 = vmatpush2.bf16.msra.mxu0 %v7421_v7  ;;  %2121 = vmatpush2.bf16.msra.mxu1 %v7549_v8  ;;  %v526_v8 = vld [vmem:[#allocation12 + $0x188] sm:$0xff] }
  0xb6   :  { %2079 = vmatprep.subr.bf16.mxu0 %v7414_v9  ;;  %2122 = vmatprep.subr.bf16.mxu1 %v7542_v10  ;;  %v530_v9 = vld [vmem:[#allocation12 + $0x1a8] sm:$0xff] }
  0xb7   :  { %v654_v10 = vld [vmem:[#allocation12 + $0x588] sm:$0xff]  ;;  %v7375_v22 = vcombine.low %v526_v8, %v530_v9 }
  0xb8   :  { %v7503_v23 = vcombine.low %v654_v10, %v658_v11 }
  0xb9   :  { %2080 = vmatpush2.bf16.msra.mxu0 %v7413_v15  ;;  %2123 = vmatpush2.bf16.msra.mxu1 %v7541_v16  ;;  %v518_v16 = vld [vmem:[#allocation12 + $0x148] sm:$0xff] }
  0xba   :  { %2081 = vmatprep.subr.bf16.mxu0 %v7406_v17  ;;  %2124 = vmatprep.subr.bf16.mxu1 %v7534_v18  ;;  %v7376_v17 = vcombine.high %v526_v8, %v530_v9  ;;  %v7504_v18 = vcombine.high %v654_v10, %v658_v11  ;;  %v602_v8 = vld [vmem:[#allocation12 + $0x3e8] sm:$0xff] }
  0xbb   :  { %v726_v9 = vld [vmem:[#allocation12 + $0x7c8] sm:$0xff] }
  0xbc   :  { %v730_v10 = vld [vmem:[#allocation12 + $0x7e8] sm:$0xff] }
  0xbd   :  { %2082 = vmatpush2.bf16.msra.mxu0 %v7405_v19  ;;  %2125 = vmatpush2.bf16.msra.mxu1 %v7533_v20  ;;  %v522_v19 = vld [vmem:[#allocation12 + $0x168] sm:$0xff] }
  0xbe   :  { %2083 = vmatprep.subr.bf16.mxu0 %v7398_v24  ;;  %2126 = vmatprep.subr.bf16.mxu1 %v7526_v28  ;;  %v646_v20 = vld [vmem:[#allocation12 + $0x548] sm:$0xff]  ;;  %v7368_v24 = vcombine.high %v518_v16, %v522_v19  ;;  %v7367_v30 = vcombine.low %v518_v16, %v522_v19 }
  0xbf   :  { %v7496_v25 = vcombine.high %v646_v20, %v650_v21  ;;  %v638_v28 = vld [vmem:[#allocation12 + $0x508] sm:$0xff]  ;;  %v7495_v31 = vcombine.low %v646_v20, %v650_v21 }
  0xc0   :  { %v7488_v33 = vcombine.high %v638_v28, %v642_v29  ;;  %v7487_v39 = vcombine.low %v638_v28, %v642_v29  ;;  %v590_v19 = vld [vmem:[#allocation12 + $0x388] sm:$0xff] }
  0xc1   :  { %2084 = vmatpush2.bf16.msra.mxu0 %v7397_v26  ;;  %2127 = vmatpush2.bf16.msra.mxu1 %v7525_v27  ;;  %v510_v26 = vld [vmem:[#allocation12 + $0x108] sm:$0xff] }
  0xc2   :  { %2085 = vmatprep.subr.bf16.mxu0 %v7390_v32  ;;  %2128 = vmatprep.subr.bf16.mxu1 %v7518_v36  ;;  %v514_v27 = vld [vmem:[#allocation12 + $0x128] sm:$0xff] }
  0xc3   :  { %v7360_v32 = vcombine.high %v510_v26, %v514_v27  ;;  %v630_v36 = vld [vmem:[#allocation12 + $0x4c8] sm:$0xff]  ;;  %v7359_v38 = vcombine.low %v510_v26, %v514_v27 }
  0xc4   :  { %v7480_v41 = vcombine.high %v630_v36, %v634_v37  ;;  %v594_v20 = vld [vmem:[#allocation12 + $0x3a8] sm:$0xff] }
  0xc5   :  { %2086 = vmatpush2.bf16.msra.mxu0 %v7389_v34  ;;  %2129 = vmatpush2.bf16.msra.mxu1 %v7517_v35  ;;  %v502_v34 = vld [vmem:[#allocation12 + $0xc8] sm:$0xff] }
  0xc6   :  { %2141 = vmatprep.subr.bf16.mxu0 %v7384_v40  ;;  %2184 = vmatprep.subr.bf16.mxu1 %v7512_v44  ;;  %v506_v35 = vld [vmem:[#allocation12 + $0xe8] sm:$0xff] }
  0xc7   :  { %v7352_v40 = vcombine.high %v502_v34, %v506_v35  ;;  %v622_v44 = vld [vmem:[#allocation12 + $0x488] sm:$0xff]  ;;  %v7351_v49 = vcombine.low %v502_v34, %v506_v35 }
  0xc8   :  { %v718_v21 = vld [vmem:[#allocation12 + $0x788] sm:$0xff] }
  0xc9   :  { %v582_v27 = vld [vmem:[#allocation12 + $0x348] sm:$0xff] }
  0xca   :  { %v586_v28 = vld [vmem:[#allocation12 + $0x368] sm:$0xff] }
  0xcb   :  { %v710_v29 = vld [vmem:[#allocation12 + $0x748] sm:$0xff] }
  0xcc   :  { %v574_v35 = vld [vmem:[#allocation12 + $0x308] sm:$0xff] }
 0x148   :  { %v413_v56 = vpop.f32.mrf.mxu0  ;;  %v456_v57 = vpop.f32.mrf.mxu1 }
 0x149   :  { %v414_v58 = vadd.f32 %v413_v56, %v202_v52  ;;  %v457_v59 = vadd.f32 %v456_v57, %v210_v53  ;;  %v490_v56 = vld [vmem:[#allocation12 + $0x68] sm:$0xff] }
 0x14a   :  { %v415_v60 = vpop.f32.mrf.mxu0  ;;  %v458_v61 = vpop.f32.mrf.mxu1  ;;  %v614_v57 = vld [vmem:[#allocation12 + $0x448] sm:$0xff] }
 0x14b   :  { %465 = vst [vmem:[#allocation20] sm:$0xff] %v414_v58  ;;  %467 = vst [vmem:[#allocation20 + $0x10] sm:$0xff] %v457_v59  ;;  %v416_v62 = vadd.f32 %v415_v60, %v206_v54  ;;  %v459_v63 = vadd.f32 %v458_v61, %v214_v55  ;;  %v7471_v60 = vcombine.low %v622_v44, %v626_v45 }
 0x14c   :  { %v417_v0 = vpop.f32.mrf.mxu0  ;;  %v460_v1 = vpop.f32.mrf.mxu1 }
 0x14d   :  { %466 = vst [vmem:[#allocation20 + $0x8] sm:$0xff] %v416_v62  ;;  %468 = vst [vmem:[#allocation20 + $0x18] sm:$0xff] %v459_v63  ;;  %v418_v2 = vadd.f32 %v417_v0, %v202_v52  ;;  %v461_v3 = vadd.f32 %v460_v1, %v210_v53  ;;  %v7479_v52 = vcombine.low %v630_v36, %v634_v37  ;;  %v482_v0 = vld [vmem:[#allocation12 + $0x28] sm:$0xff] }
 0x14e   :  { %v419_v4 = vpop.f32.mrf.mxu0  ;;  %v462_v5 = vpop.f32.mrf.mxu1  ;;  %v606_v1 = vld [vmem:[#allocation12 + $0x408] sm:$0xff] }
 0x14f   :  { %469 = vst [vmem:[#allocation20 + $0x20] sm:$0xff] %v418_v2  ;;  %471 = vst [vmem:[#allocation20 + $0x30] sm:$0xff] %v461_v3  ;;  %v420_v6 = vadd.f32 %v419_v4, %v206_v54  ;;  %v463_v7 = vadd.f32 %v462_v5, %v214_v55  ;;  %v8866_v14 = vpack.c.bf16 %v418_v2, %v414_v58  ;;  %v486_v55 = vld [vmem:[#allocation12 + $0x48] sm:$0xff] }
 0x150   :  { %v8868_v15 = vpack.c.bf16 %v461_v3, %v457_v59  ;;  %v7472_v54 = vcombine.high %v622_v44, %v626_v45  ;;  %v618_v58 = vld [vmem:[#allocation12 + $0x468] sm:$0xff]  ;;  %v7336_v61 = vcombine.high %v486_v55, %v490_v56  ;;  %v7335_v3 = vcombine.low %v486_v55, %v490_v56 }
 0x151   :  { %470 = vst [vmem:[#allocation20 + $0x28] sm:$0xff] %v420_v6  ;;  %v8862_v12 = vpack.c.bf16 %v420_v6, %v416_v62  ;;  %472 = vst [vmem:[#allocation20 + $0x38] sm:$0xff] %v463_v7  ;;  %v8864_v13 = vpack.c.bf16 %v463_v7, %v459_v63  ;;  %v7464_v62 = vcombine.high %v614_v57, %v618_v58  ;;  %v478_v63 = vld [vmem:[#allocation12 + $0x8] sm:$0xff] }
 0x152   :  { %v610_v2 = vld [vmem:[#allocation12 + $0x428] sm:$0xff]  ;;  %v7463_v4 = vcombine.low %v614_v57, %v618_v58  ;;  %v7328_v5 = vcombine.high %v478_v63, %v482_v0  ;;  %v7327_v11 = vcombine.low %v478_v63, %v482_v0 }
 0x153   :  { %2087 = vmatprep.mubr.bf16.mxu0 %v8862_v12  ;;  %2130 = vmatprep.mubr.bf16.mxu1 %v8864_v13  ;;  %v7456_v6 = vcombine.high %v606_v1, %v610_v2  ;;  %v598_v7 = vld [vmem:[#allocation12 + $0x3c8] sm:$0xff]  ;;  %v7455_v16 = vcombine.low %v606_v1, %v610_v2 }
 0x154   :  { %2088 = vmatmul.mubr.bf16.vlgmr.msra.gmra.mxu0 %v8866_v14  ;;  %2131 = vmatmul.mubr.bf16.vlgmr.msra.gmra.mxu1 %v8868_v15  ;;  %v578_v36 = vld [vmem:[#allocation12 + $0x328] sm:$0xff] }
 0x155   :  { %2142 = vmatpush1.bf16.msra.mxu0 %v7383_v42  ;;  %2185 = vmatpush1.bf16.msra.mxu1 %v7511_v43  ;;  %v494_v42 = vld [vmem:[#allocation12 + $0x88] sm:$0xff] }
 0x156   :  { %2173 = vmatprep.mubr.bf16.mxu0 %v8862_v12  ;;  %2216 = vmatprep.mubr.bf16.mxu1 %v8864_v13  ;;  %v498_v43 = vld [vmem:[#allocation12 + $0xa8] sm:$0xff] }
 0x157   :  { %2143 = vmatprep.subr.bf16.mxu0 %v7376_v17  ;;  %2186 = vmatprep.subr.bf16.mxu1 %v7504_v18  ;;  %v7344_v53 = vcombine.high %v494_v42, %v498_v43  ;;  %v7343_v59 = vcombine.low %v494_v42, %v498_v43  ;;  %v7448_v17 = vcombine.high %v598_v7, %v602_v8  ;;  %v702_v37 = vld [vmem:[#allocation12 + $0x708] sm:$0xff] }
 0x158   :  { %v7576_v18 = vcombine.high %v726_v9, %v730_v10  ;;  %v566_v43 = vld [vmem:[#allocation12 + $0x2c8] sm:$0xff] }
 0x159   :  { %2144 = vmatpush1.bf16.msra.mxu0 %v7375_v22  ;;  %2187 = vmatpush1.bf16.msra.mxu1 %v7503_v23  ;;  %v722_v22 = vld [vmem:[#allocation12 + $0x7a8] sm:$0xff]  ;;  %v7447_v23 = vcombine.low %v598_v7, %v602_v8 }
 0x15a   :  { %2145 = vmatprep.subr.bf16.mxu0 %v7368_v24  ;;  %2188 = vmatprep.subr.bf16.mxu1 %v7496_v25  ;;  %v7575_v24 = vcombine.low %v726_v9, %v730_v10  ;;  %v7440_v25 = vcombine.high %v590_v19, %v594_v20  ;;  %v7568_v26 = vcombine.high %v718_v21, %v722_v22  ;;  %v570_v44 = vld [vmem:[#allocation12 + $0x2e8] sm:$0xff] }
 0x15b   :  { %v694_v45 = vld [vmem:[#allocation12 + $0x6c8] sm:$0xff] }
 0x15c   :  { %v558_v56 = vld [vmem:[#allocation12 + $0x288] sm:$0xff] }
 0x15d   :  { %2146 = vmatpush1.bf16.msra.mxu0 %v7367_v30  ;;  %2189 = vmatpush1.bf16.msra.mxu1 %v7495_v31  ;;  %v714_v30 = vld [vmem:[#allocation12 + $0x768] sm:$0xff]  ;;  %v7439_v31 = vcombine.low %v590_v19, %v594_v20  ;;  %v535_v20 = vld [vmem:[#allocation12 + $0x1d0] sm:$0xff] }
 0x15e   :  { %2147 = vmatprep.subr.bf16.mxu0 %v7360_v32  ;;  %2190 = vmatprep.subr.bf16.mxu1 %v7488_v33  ;;  %v7567_v32 = vcombine.low %v718_v21, %v722_v22  ;;  %v7432_v33 = vcombine.high %v582_v27, %v586_v28  ;;  %v7560_v34 = vcombine.high %v710_v29, %v714_v30  ;;  %v562_v57 = vld [vmem:[#allocation12 + $0x2a8] sm:$0xff]  ;;  %v539_v21 = vld [vmem:[#allocation12 + $0x1f0] sm:$0xff] }
 0x15f   :  { %v686_v58 = vld [vmem:[#allocation12 + $0x688] sm:$0xff]  ;;  %v663_v22 = vld [vmem:[#allocation12 + $0x5d0] sm:$0xff] }
 0x160   :  { %v550_v0 = vld [vmem:[#allocation12 + $0x248] sm:$0xff] }
 0x161   :  { %2148 = vmatpush1.bf16.msra.mxu0 %v7359_v38  ;;  %2191 = vmatpush1.bf16.msra.mxu1 %v7487_v39  ;;  %v706_v38 = vld [vmem:[#allocation12 + $0x728] sm:$0xff]  ;;  %v7431_v39 = vcombine.low %v582_v27, %v586_v28  ;;  %v527_v28 = vld [vmem:[#allocation12 + $0x190] sm:$0xff] }
 0x162   :  { %2149 = vmatprep.subr.bf16.mxu0 %v7352_v40  ;;  %2192 = vmatprep.subr.bf16.mxu1 %v7480_v41  ;;  %v7559_v40 = vcombine.low %v710_v29, %v714_v30  ;;  %v7424_v41 = vcombine.high %v574_v35, %v578_v36  ;;  %v7552_v42 = vcombine.high %v702_v37, %v706_v38  ;;  %v554_v1 = vld [vmem:[#allocation12 + $0x268] sm:$0xff]  ;;  %v531_v29 = vld [vmem:[#allocation12 + $0x1b0] sm:$0xff] }
 0x163   :  { %v678_v2 = vld [vmem:[#allocation12 + $0x648] sm:$0xff]  ;;  %v655_v30 = vld [vmem:[#allocation12 + $0x590] sm:$0xff] }
 0x164   :  { %v542_v8 = vld [vmem:[#allocation12 + $0x208] sm:$0xff] }
 0x165   :  { %2150 = vmatpush1.bf16.msra.mxu0 %v7351_v49  ;;  %2193 = vmatpush1.bf16.msra.mxu1 %v7479_v52  ;;  %v698_v49 = vld [vmem:[#allocation12 + $0x6e8] sm:$0xff]  ;;  %v7423_v52 = vcombine.low %v574_v35, %v578_v36  ;;  %v519_v36 = vld [vmem:[#allocation12 + $0x150] sm:$0xff] }
 0x166   :  { %2151 = vmatprep.subr.bf16.mxu0 %v7344_v53  ;;  %2194 = vmatprep.subr.bf16.mxu1 %v7472_v54  ;;  %v7551_v53 = vcombine.low %v702_v37, %v706_v38  ;;  %v7416_v54 = vcombine.high %v566_v43, %v570_v44  ;;  %v7544_v55 = vcombine.high %v694_v45, %v698_v49  ;;  %v546_v9 = vld [vmem:[#allocation12 + $0x228] sm:$0xff]  ;;  %v523_v37 = vld [vmem:[#allocation12 + $0x170] sm:$0xff] }
 0x167   :  { %v670_v10 = vld [vmem:[#allocation12 + $0x608] sm:$0xff]  ;;  %v647_v38 = vld [vmem:[#allocation12 + $0x550] sm:$0xff] }
 0x169   :  { %2152 = vmatpush1.bf16.msra.mxu0 %v7343_v59  ;;  %2195 = vmatpush1.bf16.msra.mxu1 %v7471_v60  ;;  %v690_v59 = vld [vmem:[#allocation12 + $0x6a8] sm:$0xff]  ;;  %v7415_v60 = vcombine.low %v566_v43, %v570_v44  ;;  %v511_v44 = vld [vmem:[#allocation12 + $0x110] sm:$0xff] }
 0x16a   :  { %2153 = vmatprep.subr.bf16.mxu0 %v7336_v61  ;;  %2196 = vmatprep.subr.bf16.mxu1 %v7464_v62  ;;  %v7543_v61 = vcombine.low %v694_v45, %v698_v49  ;;  %v7408_v62 = vcombine.high %v558_v56, %v562_v57  ;;  %v7536_v63 = vcombine.high %v686_v58, %v690_v59  ;;  %v515_v45 = vld [vmem:[#allocation12 + $0x130] sm:$0xff] }
 0x16b   :  { %v639_v49 = vld [vmem:[#allocation12 + $0x510] sm:$0xff] }
 0x16d   :  { %2154 = vmatpush1.bf16.msra.mxu0 %v7335_v3  ;;  %2197 = vmatpush1.bf16.msra.mxu1 %v7463_v4  ;;  %v682_v3 = vld [vmem:[#allocation12 + $0x668] sm:$0xff]  ;;  %v7407_v4 = vcombine.low %v558_v56, %v562_v57  ;;  %v503_v57 = vld [vmem:[#allocation12 + $0xd0] sm:$0xff] }
 0x16e   :  { %2155 = vmatprep.subr.bf16.mxu0 %v7328_v5  ;;  %2198 = vmatprep.subr.bf16.mxu1 %v7456_v6  ;;  %v7535_v5 = vcombine.low %v686_v58, %v690_v59  ;;  %v7400_v6 = vcombine.high %v550_v0, %v554_v1  ;;  %v7528_v7 = vcombine.high %v678_v2, %v682_v3  ;;  %v507_v58 = vld [vmem:[#allocation12 + $0xf0] sm:$0xff] }
 0x16f   :  { %v631_v59 = vld [vmem:[#allocation12 + $0x4d0] sm:$0xff] }
 0x171   :  { %2156 = vmatpush1.bf16.msra.mxu0 %v7327_v11  ;;  %2199 = vmatpush1.bf16.msra.mxu1 %v7455_v16  ;;  %v674_v11 = vld [vmem:[#allocation12 + $0x628] sm:$0xff]  ;;  %v7399_v16 = vcombine.low %v550_v0, %v554_v1  ;;  %v495_v1 = vld [vmem:[#allocation12 + $0x90] sm:$0xff] }
 0x172   :  { %2157 = vmatprep.subr.bf16.mxu0 %v7448_v17  ;;  %2200 = vmatprep.subr.bf16.mxu1 %v7576_v18  ;;  %v7527_v17 = vcombine.low %v678_v2, %v682_v3  ;;  %v7392_v18 = vcombine.high %v542_v8, %v546_v9  ;;  %v7520_v19 = vcombine.high %v670_v10, %v674_v11  ;;  %v499_v2 = vld [vmem:[#allocation12 + $0xb0] sm:$0xff] }
 0x173   :  { %v623_v3 = vld [vmem:[#allocation12 + $0x490] sm:$0xff] }
 0x175   :  { %2158 = vmatpush2.bf16.msra.mxu0 %v7447_v23  ;;  %2201 = vmatpush2.bf16.msra.mxu1 %v7575_v24  ;;  %v667_v23 = vld [vmem:[#allocation12 + $0x5f0] sm:$0xff]  ;;  %v7391_v24 = vcombine.low %v542_v8, %v546_v9 }
 0x176   :  { %2159 = vmatprep.subr.bf16.mxu0 %v7440_v25  ;;  %2202 = vmatprep.subr.bf16.mxu1 %v7568_v26  ;;  %v7519_v25 = vcombine.low %v670_v10, %v674_v11  ;;  %v7386_v26 = vcombine.high %v535_v20, %v539_v21  ;;  %v7514_v27 = vcombine.high %v663_v22, %v667_v23  ;;  %v487_v9 = vld [vmem:[#allocation12 + $0x50] sm:$0xff] }
 0x177   :  { %v491_v10 = vld [vmem:[#allocation12 + $0x70] sm:$0xff] }
 0x178   :  { %v615_v11 = vld [vmem:[#allocation12 + $0x450] sm:$0xff] }
 0x179   :  { %2160 = vmatpush2.bf16.msra.mxu0 %v7439_v31  ;;  %2203 = vmatpush2.bf16.msra.mxu1 %v7567_v32  ;;  %v659_v31 = vld [vmem:[#allocation12 + $0x5b0] sm:$0xff]  ;;  %v7385_v32 = vcombine.low %v535_v20, %v539_v21 }
 0x17a   :  { %2161 = vmatprep.subr.bf16.mxu0 %v7432_v33  ;;  %2204 = vmatprep.subr.bf16.mxu1 %v7560_v34  ;;  %v7513_v33 = vcombine.low %v663_v22, %v667_v23  ;;  %v7378_v34 = vcombine.high %v527_v28, %v531_v29  ;;  %v7506_v35 = vcombine.high %v655_v30, %v659_v31  ;;  %v479_v21 = vld [vmem:[#allocation12 + $0x10] sm:$0xff] }
 0x17b   :  { %v483_v22 = vld [vmem:[#allocation12 + $0x30] sm:$0xff] }
 0x17c   :  { %v607_v23 = vld [vmem:[#allocation12 + $0x410] sm:$0xff] }
 0x17d   :  { %2162 = vmatpush2.bf16.msra.mxu0 %v7431_v39  ;;  %2205 = vmatpush2.bf16.msra.mxu1 %v7559_v40  ;;  %v651_v39 = vld [vmem:[#allocation12 + $0x570] sm:$0xff]  ;;  %v7377_v40 = vcombine.low %v527_v28, %v531_v29 }
 0x17e   :  { %2163 = vmatprep.subr.bf16.mxu0 %v7424_v41  ;;  %2206 = vmatprep.subr.bf16.mxu1 %v7552_v42  ;;  %v7505_v41 = vcombine.low %v655_v30, %v659_v31  ;;  %v7370_v42 = vcombine.high %v519_v36, %v523_v37  ;;  %v7498_v43 = vcombine.high %v647_v38, %v651_v39  ;;  %v599_v29 = vld [vmem:[#allocation12 + $0x3d0] sm:$0xff] }
 0x17f   :  { %v603_v30 = vld [vmem:[#allocation12 + $0x3f0] sm:$0xff] }
 0x180   :  { %v727_v31 = vld [vmem:[#allocation12 + $0x7d0] sm:$0xff] }
 0x181   :  { %2164 = vmatpush2.bf16.msra.mxu0 %v7423_v52  ;;  %2207 = vmatpush2.bf16.msra.mxu1 %v7551_v53  ;;  %v643_v52 = vld [vmem:[#allocation12 + $0x530] sm:$0xff]  ;;  %v7369_v53 = vcombine.low %v519_v36, %v523_v37 }
 0x182   :  { %2165 = vmatprep.subr.bf16.mxu0 %v7416_v54  ;;  %2208 = vmatprep.subr.bf16.mxu1 %v7544_v55  ;;  %v7497_v54 = vcombine.low %v647_v38, %v651_v39  ;;  %v7362_v55 = vcombine.high %v511_v44, %v515_v45  ;;  %v7490_v56 = vcombine.high %v639_v49, %v643_v52  ;;  %v591_v37 = vld [vmem:[#allocation12 + $0x390] sm:$0xff] }
 0x183   :  { %v595_v38 = vld [vmem:[#allocation12 + $0x3b0] sm:$0xff] }
 0x184   :  { %v719_v39 = vld [vmem:[#allocation12 + $0x790] sm:$0xff] }
 0x185   :  { %2166 = vmatpush2.bf16.msra.mxu0 %v7415_v60  ;;  %2209 = vmatpush2.bf16.msra.mxu1 %v7543_v61  ;;  %v635_v60 = vld [vmem:[#allocation12 + $0x4f0] sm:$0xff]  ;;  %v7361_v61 = vcombine.low %v511_v44, %v515_v45 }
 0x186   :  { %2167 = vmatprep.subr.bf16.mxu0 %v7408_v62  ;;  %2210 = vmatprep.subr.bf16.mxu1 %v7536_v63  ;;  %v7489_v62 = vcombine.low %v639_v49, %v643_v52  ;;  %v7354_v63 = vcombine.high %v503_v57, %v507_v58  ;;  %v7482_v0 = vcombine.high %v631_v59, %v635_v60  ;;  %v583_v45 = vld [vmem:[#allocation12 + $0x350] sm:$0xff] }
 0x187   :  { %v587_v49 = vld [vmem:[#allocation12 + $0x370] sm:$0xff] }
 0x188   :  { %v711_v52 = vld [vmem:[#allocation12 + $0x750] sm:$0xff] }
 0x189   :  { %2168 = vmatpush2.bf16.msra.mxu0 %v7407_v4  ;;  %2211 = vmatpush2.bf16.msra.mxu1 %v7535_v5  ;;  %v627_v4 = vld [vmem:[#allocation12 + $0x4b0] sm:$0xff]  ;;  %v7353_v5 = vcombine.low %v503_v57, %v507_v58 }
 0x18a   :  { %2169 = vmatprep.subr.bf16.mxu0 %v7400_v6  ;;  %2212 = vmatprep.subr.bf16.mxu1 %v7528_v7  ;;  %v7481_v6 = vcombine.low %v631_v59, %v635_v60  ;;  %v7346_v7 = vcombine.high %v495_v1, %v499_v2  ;;  %v7474_v8 = vcombine.high %v623_v3, %v627_v4  ;;  %v575_v58 = vld [vmem:[#allocation12 + $0x310] sm:$0xff] }
 0x18b   :  { %v579_v59 = vld [vmem:[#allocation12 + $0x330] sm:$0xff] }
 0x18c   :  { %v703_v60 = vld [vmem:[#allocation12 + $0x710] sm:$0xff] }
 0x18d   :  { %2170 = vmatpush2.bf16.msra.mxu0 %v7399_v16  ;;  %2213 = vmatpush2.bf16.msra.mxu1 %v7527_v17  ;;  %v619_v16 = vld [vmem:[#allocation12 + $0x470] sm:$0xff]  ;;  %v7345_v17 = vcombine.low %v495_v1, %v499_v2 }
 0x18e   :  { %2171 = vmatprep.subr.bf16.mxu0 %v7392_v18  ;;  %2214 = vmatprep.subr.bf16.mxu1 %v7520_v19  ;;  %v7473_v18 = vcombine.low %v623_v3, %v627_v4  ;;  %v7338_v19 = vcombine.high %v487_v9, %v491_v10  ;;  %v7466_v20 = vcombine.high %v615_v11, %v619_v16  ;;  %v567_v2 = vld [vmem:[#allocation12 + $0x2d0] sm:$0xff] }
 0x18f   :  { %v571_v3 = vld [vmem:[#allocation12 + $0x2f0] sm:$0xff] }
 0x190   :  { %v695_v4 = vld [vmem:[#allocation12 + $0x6d0] sm:$0xff] }
 0x191   :  { %2172 = vmatpush2.bf16.msra.mxu0 %v7391_v24  ;;  %2215 = vmatpush2.bf16.msra.mxu1 %v7519_v25  ;;  %v611_v24 = vld [vmem:[#allocation12 + $0x430] sm:$0xff]  ;;  %v7337_v25 = vcombine.low %v487_v9, %v491_v10 }
 0x192   :  { %2227 = vmatprep.subr.bf16.mxu0 %v7386_v26  ;;  %2270 = vmatprep.subr.bf16.mxu1 %v7514_v27  ;;  %v7465_v26 = vcombine.low %v615_v11, %v619_v16  ;;  %v7330_v27 = vcombine.high %v479_v21, %v483_v22  ;;  %v7458_v28 = vcombine.high %v607_v23, %v611_v24  ;;  %v559_v10 = vld [vmem:[#allocation12 + $0x290] sm:$0xff] }
 0x193   :  { %v563_v11 = vld [vmem:[#allocation12 + $0x2b0] sm:$0xff] }
 0x194   :  { %2174 = vmatmul.mubr.bf16.vlgmr.msra.gmra.mxu0 %v8866_v14  ;;  %2217 = vmatmul.mubr.bf16.vlgmr.msra.gmra.mxu1 %v8868_v15  ;;  %v687_v16 = vld [vmem:[#allocation12 + $0x690] sm:$0xff] }
 0x195   :  { %2228 = vmatpush1.bf16.msra.mxu0 %v7385_v32  ;;  %2259 = vmatprep.mubr.bf16.mxu0 %v8862_v12  ;;  %v731_v32 = vld [vmem:[#allocation12 + $0x7f0] sm:$0xff] }
 0x196   :  { %2271 = vmatpush1.bf16.msra.mxu1 %v7513_v33  ;;  %2302 = vmatprep.mubr.bf16.mxu1 %v8864_v13  ;;  %v7329_v33 = vcombine.low %v479_v21, %v483_v22  ;;  %v7578_v36 = vcombine.high %v727_v31, %v731_v32  ;;  %v551_v22 = vld [vmem:[#allocation12 + $0x250] sm:$0xff] }
 0x197   :  { %2229 = vmatprep.subr.bf16.mxu0 %v7378_v34  ;;  %2272 = vmatprep.subr.bf16.mxu1 %v7506_v35  ;;  %v7457_v34 = vcombine.low %v607_v23, %v611_v24  ;;  %v7450_v35 = vcombine.high %v599_v29, %v603_v30  ;;  %v555_v23 = vld [vmem:[#allocation12 + $0x270] sm:$0xff] }
 0x198   :  { %v679_v24 = vld [vmem:[#allocation12 + $0x650] sm:$0xff] }
 0x199   :  { %2230 = vmatpush1.bf16.msra.mxu0 %v7377_v40  ;;  %v723_v40 = vld [vmem:[#allocation12 + $0x7b0] sm:$0xff] }
 0x19a   :  { %2273 = vmatpush1.bf16.msra.mxu1 %v7505_v41  ;;  %2231 = vmatprep.subr.bf16.mxu0 %v7370_v42  ;;  %v7449_v41 = vcombine.low %v599_v29, %v603_v30  ;;  %v7577_v42 = vcombine.low %v727_v31, %v731_v32  ;;  %v7570_v44 = vcombine.high %v719_v39, %v723_v40  ;;  %v543_v30 = vld [vmem:[#allocation12 + $0x210] sm:$0xff] }
 0x19b   :  { %2274 = vmatprep.subr.bf16.mxu1 %v7498_v43  ;;  %v7442_v43 = vcombine.high %v591_v37, %v595_v38  ;;  %v547_v31 = vld [vmem:[#allocation12 + $0x230] sm:$0xff] }
 0x19c   :  { %v671_v32 = vld [vmem:[#allocation12 + $0x610] sm:$0xff] }
 0x19d   :  { %2232 = vmatpush1.bf16.msra.mxu0 %v7369_v53  ;;  %v715_v53 = vld [vmem:[#allocation12 + $0x770] sm:$0xff] }
 0x19e   :  { %2275 = vmatpush1.bf16.msra.mxu1 %v7497_v54  ;;  %2233 = vmatprep.subr.bf16.mxu0 %v7362_v55  ;;  %v7441_v54 = vcombine.low %v591_v37, %v595_v38  ;;  %v7569_v55 = vcombine.low %v719_v39, %v723_v40  ;;  %v7562_v57 = vcombine.high %v711_v52, %v715_v53  ;;  %v536_v38 = vld [vmem:[#allocation12 + $0x1d8] sm:$0xff] }
 0x19f   :  { %2276 = vmatprep.subr.bf16.mxu1 %v7490_v56  ;;  %v7434_v56 = vcombine.high %v583_v45, %v587_v49  ;;  %v540_v39 = vld [vmem:[#allocation12 + $0x1f8] sm:$0xff] }
 0x1a0   :  { %v664_v40 = vld [vmem:[#allocation12 + $0x5d8] sm:$0xff] }
 0x1a1   :  { %2234 = vmatpush1.bf16.msra.mxu0 %v7361_v61  ;;  %v707_v61 = vld [vmem:[#allocation12 + $0x730] sm:$0xff] }
 0x1a2   :  { %2277 = vmatpush1.bf16.msra.mxu1 %v7489_v62  ;;  %2235 = vmatprep.subr.bf16.mxu0 %v7354_v63  ;;  %v7433_v62 = vcombine.low %v583_v45, %v587_v49  ;;  %v7561_v63 = vcombine.low %v711_v52, %v715_v53  ;;  %v7554_v1 = vcombine.high %v703_v60, %v707_v61  ;;  %v528_v49 = vld [vmem:[#allocation12 + $0x198] sm:$0xff] }
 0x1a3   :  { %2278 = vmatprep.subr.bf16.mxu1 %v7482_v0  ;;  %v7426_v0 = vcombine.high %v575_v58, %v579_v59  ;;  %v532_v52 = vld [vmem:[#allocation12 + $0x1b8] sm:$0xff]  ;;  %v7387_v53 = vcombine.low %v536_v38, %v540_v39 }
 0x1a5   :  { %2236 = vmatpush1.bf16.msra.mxu0 %v7353_v5  ;;  %v699_v5 = vld [vmem:[#allocation12 + $0x6f0] sm:$0xff] }
 0x1a6   :  { %2279 = vmatpush1.bf16.msra.mxu1 %v7481_v6  ;;  %2237 = vmatprep.subr.bf16.mxu0 %v7346_v7  ;;  %v7425_v6 = vcombine.low %v575_v58, %v579_v59  ;;  %v7553_v7 = vcombine.low %v703_v60, %v707_v61  ;;  %v7546_v9 = vcombine.high %v695_v4, %v699_v5  ;;  %v520_v58 = vld [vmem:[#allocation12 + $0x158] sm:$0xff] }
 0x1a7   :  { %2280 = vmatprep.subr.bf16.mxu1 %v7474_v8  ;;  %v7418_v8 = vcombine.high %v567_v2, %v571_v3  ;;  %v524_v59 = vld [vmem:[#allocation12 + $0x178] sm:$0xff] }
 0x1a8   :  { %v648_v61 = vld [vmem:[#allocation12 + $0x558] sm:$0xff] }
 0x1a9   :  { %2238 = vmatpush1.bf16.msra.mxu0 %v7345_v17  ;;  %v691_v17 = vld [vmem:[#allocation12 + $0x6b0] sm:$0xff] }
 0x1aa   :  { %2281 = vmatpush1.bf16.msra.mxu1 %v7473_v18  ;;  %2239 = vmatprep.subr.bf16.mxu0 %v7338_v19  ;;  %v7417_v18 = vcombine.low %v567_v2, %v571_v3  ;;  %v7545_v19 = vcombine.low %v695_v4, %v699_v5  ;;  %v7538_v21 = vcombine.high %v687_v16, %v691_v17  ;;  %v512_v3 = vld [vmem:[#allocation12 + $0x118] sm:$0xff] }
 0x1ab   :  { %2282 = vmatprep.subr.bf16.mxu1 %v7466_v20  ;;  %v7410_v20 = vcombine.high %v559_v10, %v563_v11  ;;  %v516_v4 = vld [vmem:[#allocation12 + $0x138] sm:$0xff] }
 0x1ac   :  { %v640_v5 = vld [vmem:[#allocation12 + $0x518] sm:$0xff] }
 0x1ad   :  { %2240 = vmatpush1.bf16.msra.mxu0 %v7337_v25  ;;  %v683_v25 = vld [vmem:[#allocation12 + $0x670] sm:$0xff] }
 0x1ae   :  { %2283 = vmatpush1.bf16.msra.mxu1 %v7465_v26  ;;  %2241 = vmatprep.subr.bf16.mxu0 %v7330_v27  ;;  %v7409_v26 = vcombine.low %v559_v10, %v563_v11  ;;  %v7537_v27 = vcombine.low %v687_v16, %v691_v17  ;;  %v7530_v29 = vcombine.high %v679_v24, %v683_v25  ;;  %v504_v10 = vld [vmem:[#allocation12 + $0xd8] sm:$0xff] }
 0x1af   :  { %2284 = vmatprep.subr.bf16.mxu1 %v7458_v28  ;;  %v7402_v28 = vcombine.high %v551_v22, %v555_v23  ;;  %v508_v11 = vld [vmem:[#allocation12 + $0xf8] sm:$0xff] }
 0x1b0   :  { %v632_v16 = vld [vmem:[#allocation12 + $0x4d8] sm:$0xff] }
 0x1b1   :  { %2242 = vmatpush1.bf16.msra.mxu0 %v7329_v33  ;;  %v675_v33 = vld [vmem:[#allocation12 + $0x630] sm:$0xff]  ;;  %v636_v17 = vld [vmem:[#allocation12 + $0x4f8] sm:$0xff] }
 0x1b2   :  { %2285 = vmatpush1.bf16.msra.mxu1 %v7457_v34  ;;  %2243 = vmatprep.subr.bf16.mxu0 %v7450_v35  ;;  %v7401_v34 = vcombine.low %v551_v22, %v555_v23  ;;  %v7529_v35 = vcombine.low %v679_v24, %v683_v25  ;;  %v7522_v37 = vcombine.high %v671_v32, %v675_v33  ;;  %v500_v22 = vld [vmem:[#allocation12 + $0xb8] sm:$0xff] }
 0x1b3   :  { %2286 = vmatprep.subr.bf16.mxu1 %v7578_v36  ;;  %v7394_v36 = vcombine.high %v543_v30, %v547_v31  ;;  %v624_v23 = vld [vmem:[#allocation12 + $0x498] sm:$0xff]  ;;  %v7355_v25 = vcombine.low %v504_v10, %v508_v11 }
 0x1b4   :  { %v628_v24 = vld [vmem:[#allocation12 + $0x4b8] sm:$0xff] }
 0x1b5   :  { %2244 = vmatpush2.bf16.msra.mxu0 %v7449_v41  ;;  %v668_v41 = vld [vmem:[#allocation12 + $0x5f8] sm:$0xff] }
 0x1b6   :  { %2287 = vmatpush2.bf16.msra.mxu1 %v7577_v42  ;;  %2245 = vmatprep.subr.bf16.mxu0 %v7442_v43  ;;  %v7393_v42 = vcombine.low %v543_v30, %v547_v31  ;;  %v7521_v43 = vcombine.low %v671_v32, %v675_v33  ;;  %v7516_v45 = vcombine.high %v664_v40, %v668_v41  ;;  %v492_v30 = vld [vmem:[#allocation12 + $0x78] sm:$0xff] }
 0x1b7   :  { %2288 = vmatprep.subr.bf16.mxu1 %v7570_v44  ;;  %v7388_v44 = vcombine.high %v536_v38, %v540_v39  ;;  %v616_v31 = vld [vmem:[#allocation12 + $0x458] sm:$0xff] }
 0x1b8   :  { %v620_v32 = vld [vmem:[#allocation12 + $0x478] sm:$0xff] }
 0x1b9   :  { %2246 = vmatpush2.bf16.msra.mxu0 %v7441_v54  ;;  %v656_v54 = vld [vmem:[#allocation12 + $0x598] sm:$0xff] }
 0x1ba   :  { %2289 = vmatpush2.bf16.msra.mxu1 %v7569_v55  ;;  %2247 = vmatprep.subr.bf16.mxu0 %v7434_v56  ;;  %v660_v55 = vld [vmem:[#allocation12 + $0x5b8] sm:$0xff]  ;;  %v7515_v56 = vcombine.low %v664_v40, %v668_v41 }
 0x1bb   :  { %2290 = vmatprep.subr.bf16.mxu1 %v7562_v57  ;;  %v7380_v57 = vcombine.high %v528_v49, %v532_v52  ;;  %v7508_v60 = vcombine.high %v656_v54, %v660_v55  ;;  %v484_v38 = vld [vmem:[#allocation12 + $0x38] sm:$0xff] }
 0x1bc   :  { %v608_v39 = vld [vmem:[#allocation12 + $0x418] sm:$0xff] }
 0x1bd   :  { %2248 = vmatpush2.bf16.msra.mxu0 %v7433_v62  ;;  %v652_v62 = vld [vmem:[#allocation12 + $0x578] sm:$0xff] }
 0x1be   :  { %2291 = vmatpush2.bf16.msra.mxu1 %v7561_v63  ;;  %2249 = vmatprep.subr.bf16.mxu0 %v7426_v0  ;;  %v7379_v63 = vcombine.low %v528_v49, %v532_v52  ;;  %v7507_v0 = vcombine.low %v656_v54, %v660_v55  ;;  %v7500_v2 = vcombine.high %v648_v61, %v652_v62  ;;  %v612_v40 = vld [vmem:[#allocation12 + $0x438] sm:$0xff] }
 0x1bf   :  { %2292 = vmatprep.subr.bf16.mxu1 %v7554_v1  ;;  %v7372_v1 = vcombine.high %v520_v58, %v524_v59  ;;  %v604_v49 = vld [vmem:[#allocation12 + $0x3f8] sm:$0xff]  ;;  %v7459_v55 = vcombine.low %v608_v39, %v612_v40 }
 0x1c0   :  { %v728_v52 = vld [vmem:[#allocation12 + $0x7d8] sm:$0xff] }
 0x1c1   :  { %2250 = vmatpush2.bf16.msra.mxu0 %v7425_v6  ;;  %v644_v6 = vld [vmem:[#allocation12 + $0x538] sm:$0xff] }
 0x1c2   :  { %2293 = vmatpush2.bf16.msra.mxu1 %v7553_v7  ;;  %2251 = vmatprep.subr.bf16.mxu0 %v7418_v8  ;;  %v7371_v7 = vcombine.low %v520_v58, %v524_v59  ;;  %v7499_v8 = vcombine.low %v648_v61, %v652_v62  ;;  %v592_v58 = vld [vmem:[#allocation12 + $0x398] sm:$0xff] }
 0x1c3   :  { %2294 = vmatprep.subr.bf16.mxu1 %v7546_v9  ;;  %v7364_v9 = vcombine.high %v512_v3, %v516_v4  ;;  %v596_v59 = vld [vmem:[#allocation12 + $0x3b8] sm:$0xff] }
 0x1c4   :  { %v724_v61 = vld [vmem:[#allocation12 + $0x7b8] sm:$0xff] }
 0x1c5   :  { %2252 = vmatpush2.bf16.msra.mxu0 %v7417_v18  ;;  %v7491_v18 = vcombine.low %v640_v5, %v644_v6 }
 0x1c6   :  { %2295 = vmatpush2.bf16.msra.mxu1 %v7545_v19  ;;  %2253 = vmatprep.subr.bf16.mxu0 %v7410_v20  ;;  %v7356_v19 = vcombine.high %v504_v10, %v508_v11  ;;  %v7484_v20 = vcombine.high %v632_v16, %v636_v17  ;;  %v580_v10 = vld [vmem:[#allocation12 + $0x338] sm:$0xff] }
 0x1c7   :  { %2296 = vmatprep.subr.bf16.mxu1 %v7538_v21  ;;  %v496_v21 = vld [vmem:[#allocation12 + $0x98] sm:$0xff] }
 0x1c8   :  { %v7347_v33 = vcombine.low %v496_v21, %v500_v22  ;;  %v704_v11 = vld [vmem:[#allocation12 + $0x718] sm:$0xff] }
 0x1c9   :  { %2254 = vmatpush2.bf16.msra.mxu0 %v7409_v26  ;;  %v7483_v26 = vcombine.low %v632_v16, %v636_v17  ;;  %v708_v16 = vld [vmem:[#allocation12 + $0x738] sm:$0xff] }
 0x1ca   :  { %2297 = vmatpush2.bf16.msra.mxu1 %v7537_v27  ;;  %2255 = vmatprep.subr.bf16.mxu0 %v7402_v28  ;;  %v7348_v27 = vcombine.high %v496_v21, %v500_v22  ;;  %v7476_v28 = vcombine.high %v624_v23, %v628_v24  ;;  %v572_v21 = vld [vmem:[#allocation12 + $0x2f8] sm:$0xff] }
 0x1cb   :  { %2298 = vmatprep.subr.bf16.mxu1 %v7530_v29  ;;  %v488_v29 = vld [vmem:[#allocation12 + $0x58] sm:$0xff] }
 0x1cc   :  { %v7339_v41 = vcombine.low %v488_v29, %v492_v30  ;;  %v696_v22 = vld [vmem:[#allocation12 + $0x6d8] sm:$0xff] }
 0x1cd   :  { %2256 = vmatpush2.bf16.msra.mxu0 %v7401_v34  ;;  %v7475_v34 = vcombine.low %v624_v23, %v628_v24  ;;  %v700_v23 = vld [vmem:[#allocation12 + $0x6f8] sm:$0xff] }
 0x1ce   :  { %2299 = vmatpush2.bf16.msra.mxu1 %v7529_v35  ;;  %2257 = vmatprep.subr.bf16.mxu0 %v7394_v36  ;;  %v7340_v35 = vcombine.high %v488_v29, %v492_v30  ;;  %v7468_v36 = vcombine.high %v616_v31, %v620_v32  ;;  %v564_v29 = vld [vmem:[#allocation12 + $0x2b8] sm:$0xff] }
 0x1cf   :  { %2300 = vmatprep.subr.bf16.mxu1 %v7522_v37  ;;  %v480_v37 = vld [vmem:[#allocation12 + $0x18] sm:$0xff] }
 0x1d0   :  { %v7331_v54 = vcombine.low %v480_v37, %v484_v38  ;;  %v688_v30 = vld [vmem:[#allocation12 + $0x698] sm:$0xff] }
 0x1d1   :  { %2258 = vmatpush2.bf16.msra.mxu0 %v7393_v42  ;;  %v7467_v42 = vcombine.low %v616_v31, %v620_v32  ;;  %v692_v31 = vld [vmem:[#allocation12 + $0x6b8] sm:$0xff] }
 0x1d2   :  { %2301 = vmatpush2.bf16.msra.mxu1 %v7521_v43  ;;  %2313 = vmatprep.subr.bf16.mxu0 %v7388_v44  ;;  %v7332_v43 = vcombine.high %v480_v37, %v484_v38  ;;  %v7460_v44 = vcombine.high %v608_v39, %v612_v40  ;;  %v556_v37 = vld [vmem:[#allocation12 + $0x278] sm:$0xff] }
 0x1d3   :  { %2356 = vmatprep.subr.bf16.mxu1 %v7516_v45  ;;  %v600_v45 = vld [vmem:[#allocation12 + $0x3d8] sm:$0xff] }
 0x1d4   :  { %2260 = vmatmul.mubr.bf16.vlgmr.msra.gmra.mxu0 %v8866_v14  ;;  %v7451_v62 = vcombine.low %v600_v45, %v604_v49  ;;  %v680_v38 = vld [vmem:[#allocation12 + $0x658] sm:$0xff] }
 0x1d5   :  { %2303 = vmatmul.mubr.bf16.vlgmr.msra.gmra.mxu1 %v8868_v15  ;;  %2314 = vmatpush1.bf16.msra.mxu0 %v7387_v53  ;;  %v732_v53 = vld [vmem:[#allocation12 + $0x7f8] sm:$0xff] }
 0x1d6   :  { %2345 = vmatprep.mubr.bf16.mxu0 %v8862_v12  ;;  %2357 = vmatpush1.bf16.msra.mxu1 %v7515_v56  ;;  %v7492_v12 = vcombine.high %v640_v5, %v644_v6  ;;  %v7452_v56 = vcombine.high %v600_v45, %v604_v49  ;;  %v716_v5 = vld [vmem:[#allocation12 + $0x778] sm:$0xff]  ;;  %v7443_v6 = vcombine.low %v592_v58, %v596_v59 }
 0x1d7   :  { %2388 = vmatprep.mubr.bf16.mxu1 %v8864_v13  ;;  %2315 = vmatprep.subr.bf16.mxu0 %v7380_v57  ;;  %v7363_v13 = vcombine.low %v512_v3, %v516_v4  ;;  %v7580_v57 = vcombine.high %v728_v52, %v732_v53  ;;  %v588_v3 = vld [vmem:[#allocation12 + $0x378] sm:$0xff] }
 0x1d8   :  { %2358 = vmatprep.subr.bf16.mxu1 %v7508_v60  ;;  %v720_v60 = vld [vmem:[#allocation12 + $0x798] sm:$0xff] }
 0x1d9   :  { %2316 = vmatpush1.bf16.msra.mxu0 %v7379_v63  ;;  %v7579_v63 = vcombine.low %v728_v52, %v732_v53  ;;  %v712_v4 = vld [vmem:[#allocation12 + $0x758] sm:$0xff] }
 0x1da   :  { %2359 = vmatpush1.bf16.msra.mxu1 %v7507_v0  ;;  %2317 = vmatprep.subr.bf16.mxu0 %v7372_v1  ;;  %v7444_v0 = vcombine.high %v592_v58, %v596_v59  ;;  %v7572_v1 = vcombine.high %v720_v60, %v724_v61  ;;  %v684_v39 = vld [vmem:[#allocation12 + $0x678] sm:$0xff]  ;;  %v8884_v59 = vld [vmem:[#allocation14] sm:$0xff] }
 0x1db   :  { %2360 = vmatprep.subr.bf16.mxu1 %v7500_v2  ;;  %v584_v2 = vld [vmem:[#allocation12 + $0x358] sm:$0xff] }
 0x1dc   :  { %v7435_v17 = vcombine.low %v584_v2, %v588_v3  ;;  %v548_v45 = vld [vmem:[#allocation12 + $0x238] sm:$0xff] }
 0x1dd   :  { %2318 = vmatpush1.bf16.msra.mxu0 %v7371_v7  ;;  %v7571_v7 = vcombine.low %v720_v60, %v724_v61  ;;  %v672_v49 = vld [vmem:[#allocation12 + $0x618] sm:$0xff]  ;;  %v738_v60 = vrot.slane %v8884_v59, %v8847_v47  ;;  %v742_v61 = vrot.slane %v8884_v59, %v8853_v50 }
 0x1de   :  { %2361 = vmatpush1.bf16.msra.mxu1 %v7499_v8  ;;  %2319 = vmatprep.subr.bf16.mxu0 %v7364_v9  ;;  %v7436_v8 = vcombine.high %v584_v2, %v588_v3  ;;  %v7564_v9 = vcombine.high %v712_v4, %v716_v5  ;;  %v676_v52 = vld [vmem:[#allocation12 + $0x638] sm:$0xff] }
 0x1df   :  { %2362 = vmatprep.subr.bf16.mxu1 %v7492_v12  ;;  %v576_v12 = vld [vmem:[#allocation12 + $0x318] sm:$0xff]  ;;  %v7523_v58 = vcombine.low %v672_v49, %v676_v52 }
 0x1e0   :  { %v7427_v24 = vcombine.low %v576_v12, %v580_v10 }
 0x1e1   :  { %2320 = vmatpush1.bf16.msra.mxu0 %v7363_v13  ;;  %v7563_v13 = vcombine.low %v712_v4, %v716_v5 }
 0x1e2   :  { %2363 = vmatpush1.bf16.msra.mxu1 %v7491_v18  ;;  %2321 = vmatprep.subr.bf16.mxu0 %v7356_v19  ;;  %v7428_v18 = vcombine.high %v576_v12, %v580_v10  ;;  %v7556_v19 = vcombine.high %v704_v11, %v708_v16 }
 0x1e3   :  { %2364 = vmatprep.subr.bf16.mxu1 %v7484_v20  ;;  %v568_v20 = vld [vmem:[#allocation12 + $0x2d8] sm:$0xff] }
 0x1e4   :  { %v7419_v32 = vcombine.low %v568_v20, %v572_v21 }
 0x1e5   :  { %2322 = vmatpush1.bf16.msra.mxu0 %v7355_v25  ;;  %v7555_v25 = vcombine.low %v704_v11, %v708_v16 }
 0x1e6   :  { %2365 = vmatpush1.bf16.msra.mxu1 %v7483_v26  ;;  %2323 = vmatprep.subr.bf16.mxu0 %v7348_v27  ;;  %v7420_v26 = vcombine.high %v568_v20, %v572_v21  ;;  %v7548_v27 = vcombine.high %v696_v22, %v700_v23 }
 0x1e7   :  { %2366 = vmatprep.subr.bf16.mxu1 %v7476_v28  ;;  %v560_v28 = vld [vmem:[#allocation12 + $0x298] sm:$0xff] }
 0x1e8   :  { %v7411_v40 = vcombine.low %v560_v28, %v564_v29 }
 0x1e9   :  { %2324 = vmatpush1.bf16.msra.mxu0 %v7347_v33  ;;  %v7547_v33 = vcombine.low %v696_v22, %v700_v23 }
 0x1ea   :  { %2367 = vmatpush1.bf16.msra.mxu1 %v7475_v34  ;;  %2325 = vmatprep.subr.bf16.mxu0 %v7340_v35  ;;  %v7412_v34 = vcombine.high %v560_v28, %v564_v29  ;;  %v7540_v35 = vcombine.high %v688_v30, %v692_v31 }
 0x1eb   :  { %2368 = vmatprep.subr.bf16.mxu1 %v7468_v36  ;;  %v552_v36 = vld [vmem:[#allocation12 + $0x258] sm:$0xff] }
 0x1ec   :  { %v7403_v53 = vcombine.low %v552_v36, %v556_v37 }
 0x1ed   :  { %2326 = vmatpush1.bf16.msra.mxu0 %v7339_v41  ;;  %v7539_v41 = vcombine.low %v688_v30, %v692_v31 }
 0x1ee   :  { %2369 = vmatpush1.bf16.msra.mxu1 %v7467_v42  ;;  %2327 = vmatprep.subr.bf16.mxu0 %v7332_v43  ;;  %v7404_v42 = vcombine.high %v552_v36, %v556_v37  ;;  %v7532_v43 = vcombine.high %v680_v38, %v684_v39 }
 0x1ef   :  { %2370 = vmatprep.subr.bf16.mxu1 %v7460_v44  ;;  %v544_v44 = vld [vmem:[#allocation12 + $0x218] sm:$0xff] }
 0x1f1   :  { %2328 = vmatpush1.bf16.msra.mxu0 %v7331_v54  ;;  %v7531_v54 = vcombine.low %v680_v38, %v684_v39 }
 0x1f2   :  { %2371 = vmatpush1.bf16.msra.mxu1 %v7459_v55  ;;  %2329 = vmatprep.subr.bf16.mxu0 %v7452_v56  ;;  %v7396_v55 = vcombine.high %v544_v44, %v548_v45  ;;  %v7524_v56 = vcombine.high %v672_v49, %v676_v52 }
 0x1f3   :  { %2372 = vmatprep.subr.bf16.mxu1 %v7580_v57  ;;  %v7395_v57 = vcombine.low %v544_v44, %v548_v45 }
 0x1f5   :  { %2330 = vmatpush2.bf16.msra.mxu0 %v7451_v62 }
 0x1f6   :  { %2373 = vmatpush2.bf16.msra.mxu1 %v7579_v63  ;;  %2331 = vmatprep.subr.bf16.mxu0 %v7444_v0 }
 0x1f7   :  { %2374 = vmatprep.subr.bf16.mxu1 %v7572_v1 }
 0x1f9   :  { %2332 = vmatpush2.bf16.msra.mxu0 %v7443_v6 }
 0x1fa   :  { %2375 = vmatpush2.bf16.msra.mxu1 %v7571_v7  ;;  %2333 = vmatprep.subr.bf16.mxu0 %v7436_v8 }
 0x1fb   :  { %2376 = vmatprep.subr.bf16.mxu1 %v7564_v9 }
 0x1fd   :  { %2334 = vmatpush2.bf16.msra.mxu0 %v7435_v17 }
 0x1fe   :  { %2377 = vmatpush2.bf16.msra.mxu1 %v7563_v13  ;;  %2335 = vmatprep.subr.bf16.mxu0 %v7428_v18  ;;  %v746_v18 = vrot.slane %v8884_v59, %v8850_v48 }
 0x1ff   :  { %2378 = vmatprep.subr.bf16.mxu1 %v7556_v19  ;;  %v750_v19 = vrot.slane %v8884_v59, %v8856_v51 }
 0x201   :  { %2336 = vmatpush2.bf16.msra.mxu0 %v7427_v24 }
 0x202   :  { %2379 = vmatpush2.bf16.msra.mxu1 %v7555_v25  ;;  %2337 = vmatprep.subr.bf16.mxu0 %v7420_v26 }
 0x203   :  { %2380 = vmatprep.subr.bf16.mxu1 %v7548_v27 }
 0x205   :  { %2338 = vmatpush2.bf16.msra.mxu0 %v7419_v32 }
 0x206   :  { %2381 = vmatpush2.bf16.msra.mxu1 %v7547_v33  ;;  %2339 = vmatprep.subr.bf16.mxu0 %v7412_v34 }
 0x207   :  { %2382 = vmatprep.subr.bf16.mxu1 %v7540_v35 }
 0x209   :  { %2340 = vmatpush2.bf16.msra.mxu0 %v7411_v40 }
 0x20a   :  { %2383 = vmatpush2.bf16.msra.mxu1 %v7539_v41  ;;  %2341 = vmatprep.subr.bf16.mxu0 %v7404_v42 }
 0x20b   :  { %2384 = vmatprep.subr.bf16.mxu1 %v7532_v43 }
 0x20d   :  { %2342 = vmatpush2.bf16.msra.mxu0 %v7403_v53 }
 0x20e   :  { %2385 = vmatpush2.bf16.msra.mxu1 %v7531_v54  ;;  %2343 = vmatprep.subr.bf16.mxu0 %v7396_v55 }
 0x20f   :  { %2386 = vmatprep.subr.bf16.mxu1 %v7524_v56 }
 0x211   :  { %2344 = vmatpush2.bf16.msra.mxu0 %v7395_v57 }
 0x212   :  { %2387 = vmatpush2.bf16.msra.mxu1 %v7523_v58 }
 0x214   :  { %2346 = vmatmul.mubr.bf16.vlgmr.msra.gmra.mxu0 %v8866_v14  ;;  %v2089_v62 = vpop.f32.mrf.mxu0  ;;  %v2132_v63 = vpop.f32.mrf.mxu1 }
 0x215   :  { %2389 = vmatmul.mubr.bf16.vlgmr.msra.gmra.mxu1 %v8868_v15  ;;  %v2090_v0 = vadd.f32 %v2089_v62, %v738_v60 }
 0x216   :  { %v2091_v1 = vpop.f32.mrf.mxu0  ;;  %v2134_v2 = vpop.f32.mrf.mxu1 }
 0x217   :  { %v8892_v3 = vadd.f32 %v2132_v63, %v2090_v0  ;;  %v2092_v4 = vadd.f32 %v2091_v1, %v742_v61 }
 0x218   :  { %v2093_v5 = vpop.f32.mrf.mxu0  ;;  %v2136_v6 = vpop.f32.mrf.mxu1 }
 0x219   :  { %v2399_v7 = vmax.f32 %v8892_v3, 0.0  ;;  %v8895_v8 = vadd.f32 %v2134_v2, %v2092_v4  ;;  %v2094_v9 = vadd.f32 %v2093_v5, %v738_v60 }
 0x21a   :  { %v2095_v12 = vpop.f32.mrf.mxu0  ;;  %v2138_v15 = vpop.f32.mrf.mxu1 }
 0x21b   :  { %v2400_v14 = vmax.f32 %v8895_v8, 0.0  ;;  %v8898_v10 = vadd.f32 %v2136_v6, %v2094_v9  ;;  %v2096_v11 = vadd.f32 %v2095_v12, %v742_v61 }
 0x21d   :  { %v2407_v16 = vmax.f32 %v8898_v10, 0.0  ;;  %v8901_v17 = vadd.f32 %v2138_v15, %v2096_v11 }
 0x21f   :  { %v2408_v13 = vmax.f32 %v8901_v17, 0.0 }
 0x254   :  { %v2175_v20 = vpop.f32.mrf.mxu0  ;;  %v2218_v21 = vpop.f32.mrf.mxu1 }
 0x255   :  { %v2176_v22 = vadd.f32 %v2175_v20, %v746_v18 }
 0x256   :  { %v2177_v23 = vpop.f32.mrf.mxu0  ;;  %v2220_v24 = vpop.f32.mrf.mxu1 }
 0x257   :  { %v8908_v25 = vadd.f32 %v2218_v21, %v2176_v22  ;;  %v2178_v26 = vadd.f32 %v2177_v23, %v750_v19 }
 0x258   :  { %v2179_v27 = vpop.f32.mrf.mxu0  ;;  %v2222_v28 = vpop.f32.mrf.mxu1 }
 0x259   :  { %v2401_v29 = vmax.f32 %v8908_v25, 0.0  ;;  %v8911_v30 = vadd.f32 %v2220_v24, %v2178_v26  ;;  %v2180_v31 = vadd.f32 %v2179_v27, %v746_v18 }
 0x25a   :  { %v2181_v32 = vpop.f32.mrf.mxu0  ;;  %v2224_v36 = vpop.f32.mrf.mxu1 }
 0x25b   :  { %v2402_v33 = vmax.f32 %v8911_v30, 0.0  ;;  %v8914_v34 = vadd.f32 %v2222_v28, %v2180_v31  ;;  %v2182_v35 = vadd.f32 %v2181_v32, %v750_v19 }
 0x25d   :  { %v2409_v37 = vmax.f32 %v8914_v34, 0.0  ;;  %v8917_v38 = vadd.f32 %v2224_v36, %v2182_v35 }
 0x25f   :  { %v2410_v39 = vmax.f32 %v8917_v38, 0.0 }
 0x260   :  { %8662 = shalt.err (!%p8659_p2)  }
 0x261   :  { %149 = dma.hbm_to_vmem [thread:$0]  %s9167_s5, 65536, %s147_s9, [#allocation4] }
 0x262   :  { %s8671_s29 = scalar_lea.vmem %s159_s26, 16384  ;;  %p8676_p4 = scmp.lt.s32.totalorder %s159_s26, %s159_s26 }
 0x263   :  { %p8672_p3 = scmp.ne.s32.totalorder %s159_s26, %s8671_s29  ;;  %p8677_p5 = scmp.lt.s32.totalorder %s8671_s29, %s8671_s29 }
 0x265   :  { %p8678_p6 = por %p8677_p5, %p8676_p4 }
 0x267   :  { %p8679_p7 = pnand %p8678_p6, %p8672_p3 }
 0x269   :  { %8682 = shalt.err (!%p8679_p7)  }
 0x26a   :  { %161 = dma.hbm_to_vmem [thread:$0]  %s9169_s7, 16384, %s159_s26, [#allocation4 + $0x1]  ;;  %v753_v40 = vsub.s32 4, %v8844_v46  ;;  %v757_v41 = vsub.s32 5, %v8844_v46  ;;  %v761_v9 = vsub.s32 6, %v8844_v46  ;;  %v765_v12 = vsub.s32 7, %v8844_v46 }
 0x26c   :  { %v754_v42 = vrot.slane %v8884_v59, %v753_v40  ;;  %v758_v43 = vrot.slane %v8884_v59, %v757_v41  ;;  %v762_v11 = vrot.slane %v8884_v59, %v761_v9  ;;  %v766_v15 = vrot.slane %v8884_v59, %v765_v12 }
 0x294   :  { %v2261_v44 = vpop.f32.mrf.mxu0 }
 0x295   :  { %v2262_v45 = vadd.f32 %v2261_v44, %v754_v42  ;;  %v2304_v49 = vpop.f32.mrf.mxu1 }
 0x296   :  { %v2263_v52 = vpop.f32.mrf.mxu0 }
 0x297   :  { %v8934_v53 = vadd.f32 %v2304_v49, %v2262_v45  ;;  %v2264_v54 = vadd.f32 %v2263_v52, %v758_v43  ;;  %v2306_v55 = vpop.f32.mrf.mxu1 }
 0x298   :  { %v2265_v56 = vpop.f32.mrf.mxu0 }
 0x299   :  { %v2403_v57 = vmax.f32 %v8934_v53, 0.0  ;;  %v8937_v58 = vadd.f32 %v2306_v55, %v2264_v54  ;;  %v2266_v60 = vadd.f32 %v2265_v56, %v754_v42  ;;  %v2308_v61 = vpop.f32.mrf.mxu1 }
 0x29a   :  { %v2267_v62 = vpop.f32.mrf.mxu0 }
 0x29b   :  { %v2404_v63 = vmax.f32 %v8937_v58, 0.0  ;;  %v8940_v0 = vadd.f32 %v2308_v61, %v2266_v60  ;;  %v2268_v1 = vadd.f32 %v2267_v62, %v758_v43  ;;  %v2310_v2 = vpop.f32.mrf.mxu1 }
 0x29d   :  { %v2411_v4 = vmax.f32 %v8940_v0, 0.0  ;;  %v8943_v5 = vadd.f32 %v2310_v2, %v2268_v1 }
 0x29f   :  { %v2412_v6 = vmax.f32 %v8943_v5, 0.0 }
 0x2d4   :  { %v2347_v18 = vpop.f32.mrf.mxu0 }
 0x2d5   :  { %v2348_v19 = vadd.f32 %v2347_v18, %v762_v11  ;;  %v2390_v20 = vpop.f32.mrf.mxu1 }
 0x2d6   :  { %v2349_v21 = vpop.f32.mrf.mxu0 }
 0x2d7   :  { %v8954_v22 = vadd.f32 %v2390_v20, %v2348_v19  ;;  %v2350_v23 = vadd.f32 %v2349_v21, %v766_v15  ;;  %v2392_v24 = vpop.f32.mrf.mxu1 }
 0x2d8   :  { %v2351_v26 = vpop.f32.mrf.mxu0 }
 0x2d9   :  { %v2405_v27 = vmax.f32 %v8954_v22, 0.0  ;;  %v8957_v28 = vadd.f32 %v2392_v24, %v2350_v23  ;;  %v2352_v31 = vadd.f32 %v2351_v26, %v762_v11  ;;  %v2394_v32 = vpop.f32.mrf.mxu1 }
 0x2da   :  { %v2353_v35 = vpop.f32.mrf.mxu0 }
 0x2db   :  { %v2406_v36 = vmax.f32 %v8957_v28, 0.0  ;;  %v8960_v42 = vadd.f32 %v2394_v32, %v2352_v31  ;;  %v2354_v59 = vadd.f32 %v2353_v35, %v766_v15  ;;  %v2396_v43 = vpop.f32.mrf.mxu1 }
 0x2dd   :  { %v2413_v44 = vmax.f32 %v8960_v42, 0.0  ;;  %v8963_v45 = vadd.f32 %v2396_v43, %v2354_v59 }
 0x2df   :  { %v2414_v49 = vmax.f32 %v8963_v45, 0.0 }
 0x2e0   :  { %8713 = dma.done.wait [#allocation4], 65536 }
 0x2e1   :  { %8714 = vsyncadd [#allocation4], 4294901760  ;;  %v8970_v52 = vpack.c.bf16 %v2408_v13, %v2400_v14  ;;  %v8976_v54 = vpack.c.bf16 %v2410_v39, %v2402_v33  ;;  %v2475_v55 = vld [vmem:[#allocation2 + $0x1c0] sm:$0xff]  ;;  %v2464_v0 = vld [vmem:[#allocation2 + $0x168] sm:$0xff] }
 0x2e2   :  { %v2479_v56 = vld [vmem:[#allocation2 + $0x1e0] sm:$0xff] }
 0x2e3   :  { %5573 = vmatprep.mubr.bf16.mxu0 %v8970_v52  ;;  %5616 = vmatprep.mubr.bf16.mxu1 %v8976_v54  ;;  %v2603_v60 = vld [vmem:[#allocation2 + $0x5c0] sm:$0xff]  ;;  %v7638_v61 = vcombine.high %v2475_v55, %v2479_v56  ;;  %v7637_v8 = vcombine.low %v2475_v55, %v2479_v56 }
 0x2e4   :  { %v2607_v62 = vld [vmem:[#allocation2 + $0x5e0] sm:$0xff] }
 0x2e5   :  { %v2467_v1 = vld [vmem:[#allocation2 + $0x180] sm:$0xff]  ;;  %v7766_v14 = vcombine.high %v2603_v60, %v2607_v62  ;;  %v7765_v13 = vcombine.low %v2603_v60, %v2607_v62  ;;  %5541 = vmatprep.subr.bf16.mxu0 %v7638_v61 }
 0x2e6   :  { %v2471_v17 = vld [vmem:[#allocation2 + $0x1a0] sm:$0xff]  ;;  %5542 = vmatpush1.bf16.msra.mxu0 %v7637_v8 }
 0x2e7   :  { %v7630_v2 = vcombine.high %v2467_v1, %v2471_v17  ;;  %v2595_v30 = vld [vmem:[#allocation2 + $0x580] sm:$0xff]  ;;  %5584 = vmatprep.subr.bf16.mxu1 %v7766_v14  ;;  %v7629_v19 = vcombine.low %v2467_v1, %v2471_v17 }
 0x2e8   :  { %v2599_v11 = vld [vmem:[#allocation2 + $0x5a0] sm:$0xff]  ;;  %5585 = vmatpush1.bf16.msra.mxu1 %v7765_v13 }
 0x2e9   :  { %v2459_v38 = vld [vmem:[#allocation2 + $0x140] sm:$0xff]  ;;  %v7758_v33 = vcombine.high %v2595_v30, %v2599_v11  ;;  %5543 = vmatprep.subr.bf16.mxu0 %v7630_v2  ;;  %v7757_v20 = vcombine.low %v2595_v30, %v2599_v11 }
 0x2ea   :  { %v2463_v39 = vld [vmem:[#allocation2 + $0x160] sm:$0xff]  ;;  %5544 = vmatpush1.bf16.msra.mxu0 %v7629_v19 }
 0x2eb   :  { %v2587_v15 = vld [vmem:[#allocation2 + $0x540] sm:$0xff]  ;;  %v7622_v21 = vcombine.high %v2459_v38, %v2463_v39  ;;  %5586 = vmatprep.subr.bf16.mxu1 %v7758_v33  ;;  %v7621_v35 = vcombine.low %v2459_v38, %v2463_v39 }
 0x2ec   :  { %v2591_v18 = vld [vmem:[#allocation2 + $0x560] sm:$0xff]  ;;  %5587 = vmatpush1.bf16.msra.mxu1 %v7757_v20 }
 0x2ed   :  { %v7750_v23 = vcombine.high %v2587_v15, %v2591_v18  ;;  %v2451_v24 = vld [vmem:[#allocation2 + $0x100] sm:$0xff]  ;;  %5545 = vmatprep.subr.bf16.mxu0 %v7622_v21  ;;  %v7749_v59 = vcombine.low %v2587_v15, %v2591_v18 }
 0x2ee   :  { %v2455_v26 = vld [vmem:[#allocation2 + $0x120] sm:$0xff]  ;;  %5546 = vmatpush1.bf16.msra.mxu0 %v7621_v35 }
 0x2ef   :  { %v2579_v31 = vld [vmem:[#allocation2 + $0x500] sm:$0xff]  ;;  %v7614_v43 = vcombine.high %v2451_v24, %v2455_v26  ;;  %5588 = vmatprep.subr.bf16.mxu1 %v7750_v23  ;;  %v7613_v8 = vcombine.low %v2451_v24, %v2455_v26 }
 0x2f0   :  { %v2583_v32 = vld [vmem:[#allocation2 + $0x520] sm:$0xff]  ;;  %5589 = vmatpush1.bf16.msra.mxu1 %v7749_v59 }
 0x2f1   :  { %v7742_v55 = vcombine.high %v2579_v31, %v2583_v32  ;;  %v2443_v56 = vld [vmem:[#allocation2 + $0xc0] sm:$0xff]  ;;  %5547 = vmatprep.subr.bf16.mxu0 %v7614_v43  ;;  %v7741_v1 = vcombine.low %v2579_v31, %v2583_v32 }
 0x2f2   :  { %v2447_v60 = vld [vmem:[#allocation2 + $0xe0] sm:$0xff]  ;;  %5548 = vmatpush1.bf16.msra.mxu0 %v7613_v8 }
 0x2f3   :  { %v2571_v61 = vld [vmem:[#allocation2 + $0x4c0] sm:$0xff]  ;;  %v7606_v17 = vcombine.high %v2443_v56, %v2447_v60  ;;  %5590 = vmatprep.subr.bf16.mxu1 %v7742_v55  ;;  %v7605_v38 = vcombine.low %v2443_v56, %v2447_v60 }
 0x2f4   :  { %v2575_v62 = vld [vmem:[#allocation2 + $0x4e0] sm:$0xff]  ;;  %5591 = vmatpush1.bf16.msra.mxu1 %v7741_v1 }
 0x2f5   :  { %v7734_v14 = vcombine.high %v2571_v61, %v2575_v62  ;;  %v2435_v13 = vld [vmem:[#allocation2 + $0x80] sm:$0xff]  ;;  %5549 = vmatprep.subr.bf16.mxu0 %v7606_v17  ;;  %v7733_v33 = vcombine.low %v2571_v61, %v2575_v62 }
 0x2f6   :  { %v2439_v2 = vld [vmem:[#allocation2 + $0xa0] sm:$0xff]  ;;  %5550 = vmatpush1.bf16.msra.mxu0 %v7605_v38 }
 0x2f7   :  { %v2563_v30 = vld [vmem:[#allocation2 + $0x480] sm:$0xff]  ;;  %v7598_v39 = vcombine.high %v2435_v13, %v2439_v2  ;;  %5592 = vmatprep.subr.bf16.mxu1 %v7734_v14  ;;  %v7597_v23 = vcombine.low %v2435_v13, %v2439_v2 }
 0x2f8   :  { %v2567_v11 = vld [vmem:[#allocation2 + $0x4a0] sm:$0xff]  ;;  %5593 = vmatpush1.bf16.msra.mxu1 %v7733_v33 }
 0x2f9   :  { %v7726_v15 = vcombine.high %v2563_v30, %v2567_v11  ;;  %v2427_v18 = vld [vmem:[#allocation2 + $0x40] sm:$0xff]  ;;  %5551 = vmatprep.subr.bf16.mxu0 %v7598_v39  ;;  %v7725_v24 = vcombine.low %v2563_v30, %v2567_v11 }
 0x2fa   :  { %v2431_v19 = vld [vmem:[#allocation2 + $0x60] sm:$0xff]  ;;  %5552 = vmatpush1.bf16.msra.mxu0 %v7597_v23 }
 0x2fb   :  { %v2555_v20 = vld [vmem:[#allocation2 + $0x440] sm:$0xff]  ;;  %v7590_v26 = vcombine.high %v2427_v18, %v2431_v19  ;;  %5594 = vmatprep.subr.bf16.mxu1 %v7726_v15  ;;  %v7589_v55 = vcombine.low %v2427_v18, %v2431_v19 }
 0x2fc   :  { %v2559_v21 = vld [vmem:[#allocation2 + $0x460] sm:$0xff]  ;;  %5595 = vmatpush1.bf16.msra.mxu1 %v7725_v24 }
 0x2fd   :  { %v7718_v31 = vcombine.high %v2555_v20, %v2559_v21  ;;  %v2419_v32 = vld [vmem:[#allocation2] sm:$0xff]  ;;  %5553 = vmatprep.subr.bf16.mxu0 %v7590_v26  ;;  %v7717_v56 = vcombine.low %v2555_v20, %v2559_v21 }
 0x2fe   :  { %v2423_v35 = vld [vmem:[#allocation2 + $0x20] sm:$0xff]  ;;  %5554 = vmatpush1.bf16.msra.mxu0 %v7589_v55 }
 0x2ff   :  { %v2547_v59 = vld [vmem:[#allocation2 + $0x400] sm:$0xff]  ;;  %v7582_v60 = vcombine.high %v2419_v32, %v2423_v35  ;;  %5596 = vmatprep.subr.bf16.mxu1 %v7718_v31  ;;  %v7581_v14 = vcombine.low %v2419_v32, %v2423_v35 }
 0x300   :  { %v2551_v43 = vld [vmem:[#allocation2 + $0x420] sm:$0xff]  ;;  %5597 = vmatpush1.bf16.msra.mxu1 %v7717_v56 }
 0x301   :  { %v7710_v61 = vcombine.high %v2547_v59, %v2551_v43  ;;  %v2539_v62 = vld [vmem:[#allocation2 + $0x3c0] sm:$0xff]  ;;  %5555 = vmatprep.subr.bf16.mxu0 %v7582_v60  ;;  %v7709_v13 = vcombine.low %v2547_v59, %v2551_v43 }
 0x302   :  { %v2543_v8 = vld [vmem:[#allocation2 + $0x3e0] sm:$0xff]  ;;  %5556 = vmatpush1.bf16.msra.mxu0 %v7581_v14 }
 0x303   :  { %v2667_v1 = vld [vmem:[#allocation2 + $0x7c0] sm:$0xff]  ;;  %v7702_v2 = vcombine.high %v2539_v62, %v2543_v8  ;;  %5598 = vmatprep.subr.bf16.mxu1 %v7710_v61  ;;  %v7701_v15 = vcombine.low %v2539_v62, %v2543_v8 }
 0x304   :  { %v2671_v17 = vld [vmem:[#allocation2 + $0x7e0] sm:$0xff]  ;;  %5599 = vmatpush1.bf16.msra.mxu1 %v7709_v13 }
 0x305   :  { %v7830_v30 = vcombine.high %v2667_v1, %v2671_v17  ;;  %v2531_v11 = vld [vmem:[#allocation2 + $0x380] sm:$0xff]  ;;  %5557 = vmatprep.subr.bf16.mxu0 %v7702_v2  ;;  %v7829_v18 = vcombine.low %v2667_v1, %v2671_v17 }
 0x306   :  { %v2535_v38 = vld [vmem:[#allocation2 + $0x3a0] sm:$0xff]  ;;  %5558 = vmatpush2.bf16.msra.mxu0 %v7701_v15 }
 0x307   :  { %v2659_v33 = vld [vmem:[#allocation2 + $0x780] sm:$0xff]  ;;  %v7694_v19 = vcombine.high %v2531_v11, %v2535_v38  ;;  %5600 = vmatprep.subr.bf16.mxu1 %v7830_v30  ;;  %v7693_v31 = vcombine.low %v2531_v11, %v2535_v38 }
 0x308   :  { %v2663_v39 = vld [vmem:[#allocation2 + $0x7a0] sm:$0xff]  ;;  %5601 = vmatpush2.bf16.msra.mxu1 %v7829_v18 }
 0x309   :  { %v7822_v20 = vcombine.high %v2659_v33, %v2663_v39  ;;  %v2523_v21 = vld [vmem:[#allocation2 + $0x340] sm:$0xff]  ;;  %5559 = vmatprep.subr.bf16.mxu0 %v7694_v19  ;;  %v7821_v32 = vcombine.low %v2659_v33, %v2663_v39 }
 0x30a   :  { %v2527_v23 = vld [vmem:[#allocation2 + $0x360] sm:$0xff]  ;;  %5560 = vmatpush2.bf16.msra.mxu0 %v7693_v31 }
 0x30b   :  { %v2651_v24 = vld [vmem:[#allocation2 + $0x740] sm:$0xff]  ;;  %v7686_v35 = vcombine.high %v2523_v21, %v2527_v23  ;;  %5602 = vmatprep.subr.bf16.mxu1 %v7822_v20  ;;  %v7685_v61 = vcombine.low %v2523_v21, %v2527_v23 }
 0x30c   :  { %v2655_v26 = vld [vmem:[#allocation2 + $0x760] sm:$0xff]  ;;  %5603 = vmatpush2.bf16.msra.mxu1 %v7821_v32 }
 0x30d   :  { %v7814_v59 = vcombine.high %v2651_v24, %v2655_v26  ;;  %v2515_v43 = vld [vmem:[#allocation2 + $0x300] sm:$0xff]  ;;  %5561 = vmatprep.subr.bf16.mxu0 %v7686_v35  ;;  %v7813_v62 = vcombine.low %v2651_v24, %v2655_v26 }
 0x30e   :  { %v2519_v55 = vld [vmem:[#allocation2 + $0x320] sm:$0xff]  ;;  %5562 = vmatpush2.bf16.msra.mxu0 %v7685_v61 }
 0x30f   :  { %v2643_v56 = vld [vmem:[#allocation2 + $0x700] sm:$0xff]  ;;  %v7678_v8 = vcombine.high %v2515_v43, %v2519_v55  ;;  %5604 = vmatprep.subr.bf16.mxu1 %v7814_v59  ;;  %v7677_v30 = vcombine.low %v2515_v43, %v2519_v55 }
 0x310   :  { %v2647_v60 = vld [vmem:[#allocation2 + $0x720] sm:$0xff]  ;;  %5605 = vmatpush2.bf16.msra.mxu1 %v7813_v62 }
 0x311   :  { %v7806_v1 = vcombine.high %v2643_v56, %v2647_v60  ;;  %v2507_v17 = vld [vmem:[#allocation2 + $0x2c0] sm:$0xff]  ;;  %5563 = vmatprep.subr.bf16.mxu0 %v7678_v8  ;;  %v7805_v11 = vcombine.low %v2643_v56, %v2647_v60 }
 0x312   :  { %v2511_v14 = vld [vmem:[#allocation2 + $0x2e0] sm:$0xff]  ;;  %5564 = vmatpush2.bf16.msra.mxu0 %v7677_v30 }
 0x313   :  { %v2635_v13 = vld [vmem:[#allocation2 + $0x6c0] sm:$0xff]  ;;  %v7670_v38 = vcombine.high %v2507_v17, %v2511_v14  ;;  %5606 = vmatprep.subr.bf16.mxu1 %v7806_v1  ;;  %v7669_v20 = vcombine.low %v2507_v17, %v2511_v14 }
 0x314   :  { %v2639_v2 = vld [vmem:[#allocation2 + $0x6e0] sm:$0xff]  ;;  %5607 = vmatpush2.bf16.msra.mxu1 %v7805_v11 }
 0x315   :  { %v7798_v33 = vcombine.high %v2635_v13, %v2639_v2  ;;  %v2499_v39 = vld [vmem:[#allocation2 + $0x280] sm:$0xff]  ;;  %5565 = vmatprep.subr.bf16.mxu0 %v7670_v38  ;;  %v7797_v21 = vcombine.low %v2635_v13, %v2639_v2 }
 0x316   :  { %v2503_v15 = vld [vmem:[#allocation2 + $0x2a0] sm:$0xff]  ;;  %5566 = vmatpush2.bf16.msra.mxu0 %v7669_v20 }
 0x317   :  { %v2627_v18 = vld [vmem:[#allocation2 + $0x680] sm:$0xff]  ;;  %v7662_v23 = vcombine.high %v2499_v39, %v2503_v15  ;;  %5608 = vmatprep.subr.bf16.mxu1 %v7798_v33  ;;  %v7661_v59 = vcombine.low %v2499_v39, %v2503_v15 }
 0x318   :  { %v2631_v19 = vld [vmem:[#allocation2 + $0x6a0] sm:$0xff]  ;;  %5609 = vmatpush2.bf16.msra.mxu1 %v7797_v21  ;;  %v8984_v21 = vpack.c.bf16 %v2407_v16, %v2399_v7  ;;  %v8996_v7 = vpack.c.bf16 %v2412_v6, %v2404_v63 }
 0x319   :  { %v7790_v24 = vcombine.high %v2627_v18, %v2631_v19  ;;  %v2491_v26 = vld [vmem:[#allocation2 + $0x240] sm:$0xff]  ;;  %5567 = vmatprep.subr.bf16.mxu0 %v7662_v23  ;;  %v7789_v43 = vcombine.low %v2627_v18, %v2631_v19 }
 0x31a   :  { %v2495_v31 = vld [vmem:[#allocation2 + $0x260] sm:$0xff]  ;;  %5568 = vmatpush2.bf16.msra.mxu0 %v7661_v59 }
 0x31b   :  { %v2619_v32 = vld [vmem:[#allocation2 + $0x640] sm:$0xff]  ;;  %v7654_v55 = vcombine.high %v2491_v26, %v2495_v31  ;;  %5610 = vmatprep.subr.bf16.mxu1 %v7790_v24  ;;  %v7653_v1 = vcombine.low %v2491_v26, %v2495_v31  ;;  %v8990_v26 = vpack.c.bf16 %v2409_v37, %v2401_v29  ;;  %v9003_v29 = vpack.c.bf16 %v2414_v49, %v2406_v36 }
 0x31c   :  { %v2623_v35 = vld [vmem:[#allocation2 + $0x660] sm:$0xff]  ;;  %5611 = vmatpush2.bf16.msra.mxu1 %v7789_v43 }
 0x31d   :  { %v7782_v56 = vcombine.high %v2619_v32, %v2623_v35  ;;  %v2483_v60 = vld [vmem:[#allocation2 + $0x200] sm:$0xff]  ;;  %5569 = vmatprep.subr.bf16.mxu0 %v7654_v55  ;;  %v7781_v17 = vcombine.low %v2619_v32, %v2623_v35 }
 0x31e   :  { %v2487_v61 = vld [vmem:[#allocation2 + $0x220] sm:$0xff]  ;;  %5570 = vmatpush2.bf16.msra.mxu0 %v7653_v1 }
 0x31f   :  { %v2611_v62 = vld [vmem:[#allocation2 + $0x600] sm:$0xff]  ;;  %v7646_v14 = vcombine.high %v2483_v60, %v2487_v61  ;;  %5612 = vmatprep.subr.bf16.mxu1 %v7782_v56  ;;  %v7645_v33 = vcombine.low %v2483_v60, %v2487_v61 }
 0x320   :  { %v2615_v8 = vld [vmem:[#allocation2 + $0x620] sm:$0xff]  ;;  %5613 = vmatpush2.bf16.msra.mxu1 %v7781_v17 }
 0x321   :  { %v7774_v13 = vcombine.high %v2611_v62, %v2615_v8  ;;  %v2731_v2 = vld [vmem:[#allocation2 + $0x9c0] sm:$0xff]  ;;  %5571 = vmatprep.subr.bf16.mxu0 %v7646_v14  ;;  %v7773_v39 = vcombine.low %v2611_v62, %v2615_v8 }
 0x322   :  { %v2735_v30 = vld [vmem:[#allocation2 + $0x9e0] sm:$0xff]  ;;  %5572 = vmatpush2.bf16.msra.mxu0 %v7645_v33 }
 0x323   :  { %v2859_v11 = vld [vmem:[#allocation2 + $0xdc0] sm:$0xff]  ;;  %v7894_v15 = vcombine.high %v2731_v2, %v2735_v30  ;;  %5614 = vmatprep.subr.bf16.mxu1 %v7774_v13  ;;  %v7893_v31 = vcombine.low %v2731_v2, %v2735_v30 }
 0x324   :  { %v2863_v38 = vld [vmem:[#allocation2 + $0xde0] sm:$0xff]  ;;  %5615 = vmatpush2.bf16.msra.mxu1 %v7773_v39 }
 0x325   :  { %v8022_v18 = vcombine.high %v2859_v11, %v2863_v38  ;;  %v2723_v19 = vld [vmem:[#allocation2 + $0x980] sm:$0xff]  ;;  %5627 = vmatprep.subr.bf16.mxu0 %v7894_v15  ;;  %v8021_v32 = vcombine.low %v2859_v11, %v2863_v38  ;;  %5574 = vmatmul.mubr.bf16.vlgmr.msra.gmra.mxu0 %v8984_v21 }
 0x326   :  { %v2727_v20 = vld [vmem:[#allocation2 + $0x9a0] sm:$0xff]  ;;  %5628 = vmatpush1.bf16.msra.mxu0 %v7893_v31  ;;  %5659 = vmatprep.mubr.bf16.mxu0 %v8996_v7 }
 0x327   :  { %v2851_v23 = vld [vmem:[#allocation2 + $0xd80] sm:$0xff]  ;;  %v7886_v35 = vcombine.high %v2723_v19, %v2727_v20  ;;  %5670 = vmatprep.subr.bf16.mxu1 %v8022_v18  ;;  %5617 = vmatmul.mubr.bf16.vlgmr.msra.gmra.mxu1 %v8990_v26  ;;  %v7885_v34 = vcombine.low %v2723_v19, %v2727_v20 }
 0x328   :  { %v2855_v24 = vld [vmem:[#allocation2 + $0xda0] sm:$0xff]  ;;  %5671 = vmatpush1.bf16.msra.mxu1 %v8021_v32  ;;  %5702 = vmatprep.mubr.bf16.mxu1 %v9003_v29 }
 0x329   :  { %v8014_v3 = vcombine.high %v2851_v23, %v2855_v24  ;;  %v2715_v59 = vld [vmem:[#allocation2 + $0x940] sm:$0xff]  ;;  %5629 = vmatprep.subr.bf16.mxu0 %v7886_v35  ;;  %v8013_v37 = vcombine.low %v2851_v23, %v2855_v24 }
 0x32a   :  { %v2719_v10 = vld [vmem:[#allocation2 + $0x960] sm:$0xff]  ;;  %5630 = vmatpush1.bf16.msra.mxu0 %v7885_v34 }
 0x32b   :  { %v2843_v16 = vld [vmem:[#allocation2 + $0xd40] sm:$0xff]  ;;  %v7878_v58 = vcombine.high %v2715_v59, %v2719_v10  ;;  %5672 = vmatprep.subr.bf16.mxu1 %v8014_v3  ;;  %v7877_v36 = vcombine.low %v2715_v59, %v2719_v10 }
 0x32c   :  { %v2847_v25 = vld [vmem:[#allocation2 + $0xd60] sm:$0xff]  ;;  %5673 = vmatpush1.bf16.msra.mxu1 %v8013_v37 }
 0x32d   :  { %v8006_v63 = vcombine.high %v2843_v16, %v2847_v25  ;;  %v2707_v5 = vld [vmem:[#allocation2 + $0x900] sm:$0xff]  ;;  %5631 = vmatprep.subr.bf16.mxu0 %v7878_v58  ;;  %v8005_v45 = vcombine.low %v2843_v16, %v2847_v25 }
 0x32e   :  { %v2711_v6 = vld [vmem:[#allocation2 + $0x920] sm:$0xff]  ;;  %5632 = vmatpush1.bf16.msra.mxu0 %v7877_v36 }
 0x32f   :  { %v2835_v43 = vld [vmem:[#allocation2 + $0xd00] sm:$0xff]  ;;  %v7870_v49 = vcombine.high %v2707_v5, %v2711_v6  ;;  %5674 = vmatprep.subr.bf16.mxu1 %v8006_v63  ;;  %v7869_v8 = vcombine.low %v2707_v5, %v2711_v6 }
 0x330   :  { %v2839_v28 = vld [vmem:[#allocation2 + $0xd20] sm:$0xff]  ;;  %5675 = vmatpush1.bf16.msra.mxu1 %v8005_v45 }
 0x331   :  { %v7998_v55 = vcombine.high %v2835_v43, %v2839_v28  ;;  %v2699_v56 = vld [vmem:[#allocation2 + $0x8c0] sm:$0xff]  ;;  %5633 = vmatprep.subr.bf16.mxu0 %v7870_v49  ;;  %v7997_v1 = vcombine.low %v2835_v43, %v2839_v28 }
 0x332   :  { %v2703_v60 = vld [vmem:[#allocation2 + $0x8e0] sm:$0xff]  ;;  %5634 = vmatpush1.bf16.msra.mxu0 %v7869_v8 }
 0x333   :  { %v2827_v61 = vld [vmem:[#allocation2 + $0xcc0] sm:$0xff]  ;;  %v7862_v17 = vcombine.high %v2699_v56, %v2703_v60  ;;  %5676 = vmatprep.subr.bf16.mxu1 %v7998_v55  ;;  %v7861_v38 = vcombine.low %v2699_v56, %v2703_v60 }
 0x334   :  { %v2831_v62 = vld [vmem:[#allocation2 + $0xce0] sm:$0xff]  ;;  %5677 = vmatpush1.bf16.msra.mxu1 %v7997_v1 }
 0x335   :  { %v7990_v14 = vcombine.high %v2827_v61, %v2831_v62  ;;  %v2691_v13 = vld [vmem:[#allocation2 + $0x880] sm:$0xff]  ;;  %5635 = vmatprep.subr.bf16.mxu0 %v7862_v17  ;;  %v7989_v33 = vcombine.low %v2827_v61, %v2831_v62 }
 0x336   :  { %v2695_v2 = vld [vmem:[#allocation2 + $0x8a0] sm:$0xff]  ;;  %5636 = vmatpush1.bf16.msra.mxu0 %v7861_v38 }
 0x337   :  { %v2819_v30 = vld [vmem:[#allocation2 + $0xc80] sm:$0xff]  ;;  %v7854_v39 = vcombine.high %v2691_v13, %v2695_v2  ;;  %5678 = vmatprep.subr.bf16.mxu1 %v7990_v14  ;;  %v7853_v24 = vcombine.low %v2691_v13, %v2695_v2 }
 0x338   :  { %v2823_v11 = vld [vmem:[#allocation2 + $0xca0] sm:$0xff]  ;;  %5679 = vmatpush1.bf16.msra.mxu1 %v7989_v33 }
 0x339   :  { %v7982_v15 = vcombine.high %v2819_v30, %v2823_v11  ;;  %v2683_v18 = vld [vmem:[#allocation2 + $0x840] sm:$0xff]  ;;  %5637 = vmatprep.subr.bf16.mxu0 %v7854_v39  ;;  %v7981_v31 = vcombine.low %v2819_v30, %v2823_v11 }
 0x33a   :  { %v2687_v19 = vld [vmem:[#allocation2 + $0x860] sm:$0xff]  ;;  %5638 = vmatpush1.bf16.msra.mxu0 %v7853_v24 }
 0x33b   :  { %v2811_v20 = vld [vmem:[#allocation2 + $0xc40] sm:$0xff]  ;;  %v7846_v32 = vcombine.high %v2683_v18, %v2687_v19  ;;  %5680 = vmatprep.subr.bf16.mxu1 %v7982_v15  ;;  %v7845_v25 = vcombine.low %v2683_v18, %v2687_v19 }
 0x33c   :  { %v2815_v23 = vld [vmem:[#allocation2 + $0xc60] sm:$0xff]  ;;  %5681 = vmatpush1.bf16.msra.mxu1 %v7981_v31 }
 0x33d   :  { %v7974_v35 = vcombine.high %v2811_v20, %v2815_v23  ;;  %v2675_v3 = vld [vmem:[#allocation2 + $0x800] sm:$0xff]  ;;  %5639 = vmatprep.subr.bf16.mxu0 %v7846_v32  ;;  %v7973_v34 = vcombine.low %v2811_v20, %v2815_v23 }
 0x33e   :  { %v2679_v59 = vld [vmem:[#allocation2 + $0x820] sm:$0xff]  ;;  %5640 = vmatpush1.bf16.msra.mxu0 %v7845_v25 }
 0x33f   :  { %v2803_v10 = vld [vmem:[#allocation2 + $0xc00] sm:$0xff]  ;;  %v7838_v37 = vcombine.high %v2675_v3, %v2679_v59  ;;  %5682 = vmatprep.subr.bf16.mxu1 %v7974_v35  ;;  %v7837_v28 = vcombine.low %v2675_v3, %v2679_v59 }
 0x340   :  { %v2807_v16 = vld [vmem:[#allocation2 + $0xc20] sm:$0xff]  ;;  %5683 = vmatpush1.bf16.msra.mxu1 %v7973_v34 }
 0x341   :  { %v7966_v58 = vcombine.high %v2803_v10, %v2807_v16  ;;  %v2795_v63 = vld [vmem:[#allocation2 + $0xbc0] sm:$0xff]  ;;  %5641 = vmatprep.subr.bf16.mxu0 %v7838_v37  ;;  %v7965_v36 = vcombine.low %v2803_v10, %v2807_v16 }
 0x342   :  { %v2799_v5 = vld [vmem:[#allocation2 + $0xbe0] sm:$0xff]  ;;  %5642 = vmatpush1.bf16.msra.mxu0 %v7837_v28 }
 0x343   :  { %v2923_v6 = vld [vmem:[#allocation2 + $0xfc0] sm:$0xff]  ;;  %v7958_v45 = vcombine.high %v2795_v63, %v2799_v5  ;;  %5684 = vmatprep.subr.bf16.mxu1 %v7966_v58  ;;  %v7957_v62 = vcombine.low %v2795_v63, %v2799_v5 }
 0x344   :  { %v2927_v43 = vld [vmem:[#allocation2 + $0xfe0] sm:$0xff]  ;;  %5685 = vmatpush1.bf16.msra.mxu1 %v7965_v36 }
 0x345   :  { %v8086_v49 = vcombine.high %v2923_v6, %v2927_v43  ;;  %v2787_v55 = vld [vmem:[#allocation2 + $0xb80] sm:$0xff]  ;;  %5643 = vmatprep.subr.bf16.mxu0 %v7958_v45  ;;  %v8085_v8 = vcombine.low %v2923_v6, %v2927_v43 }
 0x346   :  { %v2791_v56 = vld [vmem:[#allocation2 + $0xba0] sm:$0xff]  ;;  %5644 = vmatpush2.bf16.msra.mxu0 %v7957_v62 }
 0x347   :  { %v2915_v60 = vld [vmem:[#allocation2 + $0xf80] sm:$0xff]  ;;  %v7950_v1 = vcombine.high %v2787_v55, %v2791_v56  ;;  %5686 = vmatprep.subr.bf16.mxu1 %v8086_v49  ;;  %v7949_v11 = vcombine.low %v2787_v55, %v2791_v56 }
 0x348   :  { %v2919_v61 = vld [vmem:[#allocation2 + $0xfa0] sm:$0xff]  ;;  %5687 = vmatpush2.bf16.msra.mxu1 %v8085_v8 }
 0x349   :  { %v8078_v17 = vcombine.high %v2915_v60, %v2919_v61  ;;  %v2779_v14 = vld [vmem:[#allocation2 + $0xb40] sm:$0xff]  ;;  %5645 = vmatprep.subr.bf16.mxu0 %v7950_v1  ;;  %v8077_v38 = vcombine.low %v2915_v60, %v2919_v61 }
 0x34a   :  { %v2783_v13 = vld [vmem:[#allocation2 + $0xb60] sm:$0xff]  ;;  %5646 = vmatpush2.bf16.msra.mxu0 %v7949_v11 }
 0x34b   :  { %v2907_v2 = vld [vmem:[#allocation2 + $0xf40] sm:$0xff]  ;;  %v7942_v33 = vcombine.high %v2779_v14, %v2783_v13  ;;  %5688 = vmatprep.subr.bf16.mxu1 %v8078_v17  ;;  %v7941_v23 = vcombine.low %v2779_v14, %v2783_v13 }
 0x34c   :  { %v2911_v30 = vld [vmem:[#allocation2 + $0xf60] sm:$0xff]  ;;  %5689 = vmatpush2.bf16.msra.mxu1 %v8077_v38 }
 0x34d   :  { %v8070_v39 = vcombine.high %v2907_v2, %v2911_v30  ;;  %v2771_v15 = vld [vmem:[#allocation2 + $0xb00] sm:$0xff]  ;;  %5647 = vmatprep.subr.bf16.mxu0 %v7942_v33  ;;  %v8069_v24 = vcombine.low %v2907_v2, %v2911_v30 }
 0x34e   :  { %v2775_v18 = vld [vmem:[#allocation2 + $0xb20] sm:$0xff]  ;;  %5648 = vmatpush2.bf16.msra.mxu0 %v7941_v23 }
 0x34f   :  { %v2899_v19 = vld [vmem:[#allocation2 + $0xf00] sm:$0xff]  ;;  %v7934_v31 = vcombine.high %v2771_v15, %v2775_v18  ;;  %5690 = vmatprep.subr.bf16.mxu1 %v8070_v39  ;;  %v7933_v16 = vcombine.low %v2771_v15, %v2775_v18  ;;  %v2476_v39 = vld [vmem:[#allocation2 + $0x1c8] sm:$0xff] }
 0x350   :  { %v2903_v20 = vld [vmem:[#allocation2 + $0xf20] sm:$0xff]  ;;  %5691 = vmatpush2.bf16.msra.mxu1 %v8069_v24  ;;  %v2480_v15 = vld [vmem:[#allocation2 + $0x1e8] sm:$0xff] }
 0x351   :  { %v8062_v32 = vcombine.high %v2899_v19, %v2903_v20  ;;  %v2763_v35 = vld [vmem:[#allocation2 + $0xac0] sm:$0xff]  ;;  %5649 = vmatprep.subr.bf16.mxu0 %v7934_v31  ;;  %v8061_v25 = vcombine.low %v2899_v19, %v2903_v20  ;;  %v2604_v18 = vld [vmem:[#allocation2 + $0x5c8] sm:$0xff]  ;;  %v7640_v24 = vcombine.high %v2476_v39, %v2480_v15 }
 0x352   :  { %v2767_v3 = vld [vmem:[#allocation2 + $0xae0] sm:$0xff]  ;;  %5650 = vmatpush2.bf16.msra.mxu0 %v7933_v16  ;;  %v2608_v19 = vld [vmem:[#allocation2 + $0x5e8] sm:$0xff]  ;;  %v9018_v16 = vpack.c.bf16 %v2413_v44, %v2405_v27 }
 0x353   :  { %v2891_v59 = vld [vmem:[#allocation2 + $0xec0] sm:$0xff]  ;;  %v7926_v34 = vcombine.high %v2763_v35, %v2767_v3  ;;  %5692 = vmatprep.subr.bf16.mxu1 %v8062_v32  ;;  %v7925_v43 = vcombine.low %v2763_v35, %v2767_v3  ;;  %v7768_v31 = vcombine.high %v2604_v18, %v2608_v19  ;;  %v2468_v32 = vld [vmem:[#allocation2 + $0x188] sm:$0xff]  ;;  %v9012_v3 = vpack.c.bf16 %v2411_v4, %v2403_v57 }
 0x354   :  { %v2895_v10 = vld [vmem:[#allocation2 + $0xee0] sm:$0xff]  ;;  %5693 = vmatpush2.bf16.msra.mxu1 %v8061_v25  ;;  %v2472_v35 = vld [vmem:[#allocation2 + $0x1a8] sm:$0xff]  ;;  %v7639_v25 = vcombine.low %v2476_v39, %v2480_v15 }
 0x355   :  { %v8054_v37 = vcombine.high %v2891_v59, %v2895_v10  ;;  %v2755_v58 = vld [vmem:[#allocation2 + $0xa80] sm:$0xff]  ;;  %5651 = vmatprep.subr.bf16.mxu0 %v7926_v34  ;;  %v8053_v28 = vcombine.low %v2891_v59, %v2895_v10  ;;  %v2596_v59 = vld [vmem:[#allocation2 + $0x588] sm:$0xff]  ;;  %v7767_v34 = vcombine.low %v2604_v18, %v2608_v19  ;;  %v7631_v22 = vcombine.low %v2468_v32, %v2472_v35 }
 0x356   :  { %v2759_v63 = vld [vmem:[#allocation2 + $0xaa0] sm:$0xff]  ;;  %5652 = vmatpush2.bf16.msra.mxu0 %v7925_v43  ;;  %v2600_v10 = vld [vmem:[#allocation2 + $0x5a8] sm:$0xff] }
 0x357   :  { %v2883_v5 = vld [vmem:[#allocation2 + $0xe80] sm:$0xff]  ;;  %v7918_v36 = vcombine.high %v2755_v58, %v2759_v63  ;;  %5694 = vmatprep.subr.bf16.mxu1 %v8054_v37  ;;  %v7917_v61 = vcombine.low %v2755_v58, %v2759_v63  ;;  %v7632_v37 = vcombine.high %v2468_v32, %v2472_v35  ;;  %v7760_v53 = vcombine.high %v2596_v59, %v2600_v10  ;;  %v2460_v58 = vld [vmem:[#allocation2 + $0x148] sm:$0xff] }
 0x358   :  { %v2887_v6 = vld [vmem:[#allocation2 + $0xea0] sm:$0xff]  ;;  %5695 = vmatpush2.bf16.msra.mxu1 %v8053_v28  ;;  %v2588_v57 = vld [vmem:[#allocation2 + $0x548] sm:$0xff]  ;;  %v7759_v27 = vcombine.low %v2596_v59, %v2600_v10  ;;  %v7624_v42 = vcombine.high %v2460_v58, %v2464_v0  ;;  %v7623_v28 = vcombine.low %v2460_v58, %v2464_v0 }
 0x359   :  { %v8046_v45 = vcombine.high %v2883_v5, %v2887_v6  ;;  %v2747_v49 = vld [vmem:[#allocation2 + $0xa40] sm:$0xff]  ;;  %5653 = vmatprep.subr.bf16.mxu0 %v7918_v36  ;;  %v8045_v62 = vcombine.low %v2883_v5, %v2887_v6  ;;  %v2592_v4 = vld [vmem:[#allocation2 + $0x568] sm:$0xff] }
 0x35a   :  { %v2751_v55 = vld [vmem:[#allocation2 + $0xa60] sm:$0xff]  ;;  %5654 = vmatpush2.bf16.msra.mxu0 %v7917_v61  ;;  %v7752_v44 = vcombine.high %v2588_v57, %v2592_v4  ;;  %v2452_v63 = vld [vmem:[#allocation2 + $0x108] sm:$0xff]  ;;  %v7751_v36 = vcombine.low %v2588_v57, %v2592_v4 }
 0x35b   :  { %v2875_v56 = vld [vmem:[#allocation2 + $0xe40] sm:$0xff]  ;;  %v7910_v8 = vcombine.high %v2747_v49, %v2751_v55  ;;  %5696 = vmatprep.subr.bf16.mxu1 %v8046_v45  ;;  %v7909_v30 = vcombine.low %v2747_v49, %v2751_v55  ;;  %v2456_v5 = vld [vmem:[#allocation2 + $0x128] sm:$0xff] }
 0x35c   :  { %v2879_v60 = vld [vmem:[#allocation2 + $0xe60] sm:$0xff]  ;;  %5697 = vmatpush2.bf16.msra.mxu1 %v8045_v62  ;;  %v2580_v6 = vld [vmem:[#allocation2 + $0x508] sm:$0xff]  ;;  %v7616_v45 = vcombine.high %v2452_v63, %v2456_v5  ;;  %v7615_v62 = vcombine.low %v2452_v63, %v2456_v5 }
 0x35d   :  { %v8038_v1 = vcombine.high %v2875_v56, %v2879_v60  ;;  %v2739_v17 = vld [vmem:[#allocation2 + $0xa00] sm:$0xff]  ;;  %5655 = vmatprep.subr.bf16.mxu0 %v7910_v8  ;;  %v8037_v11 = vcombine.low %v2875_v56, %v2879_v60  ;;  %v2584_v43 = vld [vmem:[#allocation2 + $0x528] sm:$0xff] }
 0x35e   :  { %v2743_v14 = vld [vmem:[#allocation2 + $0xa20] sm:$0xff]  ;;  %5656 = vmatpush2.bf16.msra.mxu0 %v7909_v30  ;;  %v7744_v49 = vcombine.high %v2580_v6, %v2584_v43  ;;  %v2444_v55 = vld [vmem:[#allocation2 + $0xc8] sm:$0xff]  ;;  %v7743_v8 = vcombine.low %v2580_v6, %v2584_v43 }
 0x35f   :  { %v2867_v13 = vld [vmem:[#allocation2 + $0xe00] sm:$0xff]  ;;  %v7902_v38 = vcombine.high %v2739_v17, %v2743_v14  ;;  %5698 = vmatprep.subr.bf16.mxu1 %v8038_v1  ;;  %v7901_v20 = vcombine.low %v2739_v17, %v2743_v14  ;;  %v2448_v56 = vld [vmem:[#allocation2 + $0xe8] sm:$0xff] }
 0x360   :  { %v2871_v2 = vld [vmem:[#allocation2 + $0xe20] sm:$0xff]  ;;  %5699 = vmatpush2.bf16.msra.mxu1 %v8037_v11  ;;  %v2572_v60 = vld [vmem:[#allocation2 + $0x4c8] sm:$0xff]  ;;  %v7608_v1 = vcombine.high %v2444_v55, %v2448_v56  ;;  %v7607_v11 = vcombine.low %v2444_v55, %v2448_v56 }
 0x361   :  { %v8030_v33 = vcombine.high %v2867_v13, %v2871_v2  ;;  %5657 = vmatprep.subr.bf16.mxu0 %v7902_v38  ;;  %v8029_v23 = vcombine.low %v2867_v13, %v2871_v2  ;;  %v2576_v61 = vld [vmem:[#allocation2 + $0x4e8] sm:$0xff] }
 0x362   :  { %5658 = vmatpush2.bf16.msra.mxu0 %v7901_v20  ;;  %v7736_v17 = vcombine.high %v2572_v60, %v2576_v61  ;;  %v2436_v14 = vld [vmem:[#allocation2 + $0x88] sm:$0xff]  ;;  %v7735_v38 = vcombine.low %v2572_v60, %v2576_v61 }
 0x363   :  { %5700 = vmatprep.subr.bf16.mxu1 %v8030_v33  ;;  %5713 = vmatprep.subr.bf16.mxu0 %v7640_v24  ;;  %v2440_v13 = vld [vmem:[#allocation2 + $0xa8] sm:$0xff] }
 0x364   :  { %5701 = vmatpush2.bf16.msra.mxu1 %v8029_v23  ;;  %v2564_v2 = vld [vmem:[#allocation2 + $0x488] sm:$0xff]  ;;  %v7600_v33 = vcombine.high %v2436_v14, %v2440_v13  ;;  %v7599_v23 = vcombine.low %v2436_v14, %v2440_v13 }
 0x365   :  { %5756 = vmatprep.subr.bf16.mxu1 %v7768_v31  ;;  %5660 = vmatmul.mubr.bf16.vlgmr.msra.gmra.mxu0 %v9012_v3  ;;  %v2568_v30 = vld [vmem:[#allocation2 + $0x4a8] sm:$0xff] }
 0x366   :  { %5714 = vmatpush1.bf16.msra.mxu0 %v7639_v25  ;;  %5745 = vmatprep.mubr.bf16.mxu0 %v8970_v52  ;;  %v7728_v39 = vcombine.high %v2564_v2, %v2568_v30  ;;  %v2428_v15 = vld [vmem:[#allocation2 + $0x48] sm:$0xff]  ;;  %v7727_v24 = vcombine.low %v2564_v2, %v2568_v30 }
 0x367   :  { %5703 = vmatmul.mubr.bf16.vlgmr.msra.gmra.mxu1 %v9018_v16  ;;  %5715 = vmatprep.subr.bf16.mxu0 %v7632_v37  ;;  %v2432_v18 = vld [vmem:[#allocation2 + $0x68] sm:$0xff] }
 0x368   :  { %5757 = vmatpush1.bf16.msra.mxu1 %v7767_v34  ;;  %5788 = vmatprep.mubr.bf16.mxu1 %v8976_v54  ;;  %v2556_v19 = vld [vmem:[#allocation2 + $0x448] sm:$0xff]  ;;  %v7592_v31 = vcombine.high %v2428_v15, %v2432_v18  ;;  %v7591_v34 = vcombine.low %v2428_v15, %v2432_v18 }
 0x369   :  { %5758 = vmatprep.subr.bf16.mxu1 %v7760_v53  ;;  %v2560_v20 = vld [vmem:[#allocation2 + $0x468] sm:$0xff] }
 0x36a   :  { %5716 = vmatpush1.bf16.msra.mxu0 %v7631_v22  ;;  %v7720_v32 = vcombine.high %v2556_v19, %v2560_v20  ;;  %v2420_v35 = vld [vmem:[#allocation2 + $0x8] sm:$0xff]  ;;  %v7719_v37 = vcombine.low %v2556_v19, %v2560_v20 }
 0x36b   :  { %5717 = vmatprep.subr.bf16.mxu0 %v7624_v42  ;;  %v2424_v59 = vld [vmem:[#allocation2 + $0x28] sm:$0xff] }
 0x36c   :  { %5759 = vmatpush1.bf16.msra.mxu1 %v7759_v27  ;;  %v2548_v10 = vld [vmem:[#allocation2 + $0x408] sm:$0xff]  ;;  %v7584_v53 = vcombine.high %v2420_v35, %v2424_v59  ;;  %v7583_v27 = vcombine.low %v2420_v35, %v2424_v59 }
 0x36d   :  { %5760 = vmatprep.subr.bf16.mxu1 %v7752_v44  ;;  %v2552_v25 = vld [vmem:[#allocation2 + $0x428] sm:$0xff] }
 0x36e   :  { %5718 = vmatpush1.bf16.msra.mxu0 %v7623_v28  ;;  %v7712_v58 = vcombine.high %v2548_v10, %v2552_v25  ;;  %v2540_v0 = vld [vmem:[#allocation2 + $0x3c8] sm:$0xff]  ;;  %v7711_v42 = vcombine.low %v2548_v10, %v2552_v25 }
 0x36f   :  { %5719 = vmatprep.subr.bf16.mxu0 %v7616_v45  ;;  %v2544_v57 = vld [vmem:[#allocation2 + $0x3e8] sm:$0xff] }
 0x370   :  { %5761 = vmatpush1.bf16.msra.mxu1 %v7751_v36  ;;  %v2668_v4 = vld [vmem:[#allocation2 + $0x7c8] sm:$0xff]  ;;  %v7704_v44 = vcombine.high %v2540_v0, %v2544_v57  ;;  %v7703_v36 = vcombine.low %v2540_v0, %v2544_v57 }
 0x371   :  { %5762 = vmatprep.subr.bf16.mxu1 %v7744_v49  ;;  %v2672_v22 = vld [vmem:[#allocation2 + $0x7e8] sm:$0xff] }
 0x372   :  { %5720 = vmatpush1.bf16.msra.mxu0 %v7615_v62  ;;  %v7832_v63 = vcombine.high %v2668_v4, %v2672_v22  ;;  %v2532_v5 = vld [vmem:[#allocation2 + $0x388] sm:$0xff]  ;;  %v7831_v45 = vcombine.low %v2668_v4, %v2672_v22 }
 0x373   :  { %5721 = vmatprep.subr.bf16.mxu0 %v7608_v1  ;;  %v2536_v6 = vld [vmem:[#allocation2 + $0x3a8] sm:$0xff] }
 0x374   :  { %5763 = vmatpush1.bf16.msra.mxu1 %v7743_v8  ;;  %v2660_v43 = vld [vmem:[#allocation2 + $0x788] sm:$0xff]  ;;  %v7696_v49 = vcombine.high %v2532_v5, %v2536_v6  ;;  %v7695_v8 = vcombine.low %v2532_v5, %v2536_v6 }
 0x375   :  { %5764 = vmatprep.subr.bf16.mxu1 %v7736_v17  ;;  %v2664_v28 = vld [vmem:[#allocation2 + $0x7a8] sm:$0xff] }
 0x376   :  { %5722 = vmatpush1.bf16.msra.mxu0 %v7607_v11  ;;  %v7824_v55 = vcombine.high %v2660_v43, %v2664_v28  ;;  %v2524_v56 = vld [vmem:[#allocation2 + $0x348] sm:$0xff]  ;;  %v7823_v1 = vcombine.low %v2660_v43, %v2664_v28 }
 0x377   :  { %5723 = vmatprep.subr.bf16.mxu0 %v7600_v33  ;;  %v2528_v60 = vld [vmem:[#allocation2 + $0x368] sm:$0xff] }
 0x378   :  { %5765 = vmatpush1.bf16.msra.mxu1 %v7735_v38  ;;  %v2652_v61 = vld [vmem:[#allocation2 + $0x748] sm:$0xff]  ;;  %v7688_v17 = vcombine.high %v2524_v56, %v2528_v60  ;;  %v7687_v38 = vcombine.low %v2524_v56, %v2528_v60 }
 0x379   :  { %5766 = vmatprep.subr.bf16.mxu1 %v7728_v39  ;;  %v2656_v62 = vld [vmem:[#allocation2 + $0x768] sm:$0xff] }
 0x37a   :  { %5724 = vmatpush1.bf16.msra.mxu0 %v7599_v23  ;;  %v7816_v14 = vcombine.high %v2652_v61, %v2656_v62  ;;  %v2516_v13 = vld [vmem:[#allocation2 + $0x308] sm:$0xff]  ;;  %v7815_v33 = vcombine.low %v2652_v61, %v2656_v62 }
 0x37b   :  { %5725 = vmatprep.subr.bf16.mxu0 %v7592_v31  ;;  %v2520_v2 = vld [vmem:[#allocation2 + $0x328] sm:$0xff] }
 0x37c   :  { %5767 = vmatpush1.bf16.msra.mxu1 %v7727_v24  ;;  %v2644_v30 = vld [vmem:[#allocation2 + $0x708] sm:$0xff]  ;;  %v7680_v39 = vcombine.high %v2516_v13, %v2520_v2  ;;  %v7679_v24 = vcombine.low %v2516_v13, %v2520_v2 }
 0x37d   :  { %5768 = vmatprep.subr.bf16.mxu1 %v7720_v32  ;;  %v2648_v11 = vld [vmem:[#allocation2 + $0x728] sm:$0xff] }
 0x37e   :  { %5726 = vmatpush1.bf16.msra.mxu0 %v7591_v34  ;;  %v7808_v15 = vcombine.high %v2644_v30, %v2648_v11  ;;  %v2508_v18 = vld [vmem:[#allocation2 + $0x2c8] sm:$0xff]  ;;  %v7807_v31 = vcombine.low %v2644_v30, %v2648_v11 }
 0x37f   :  { %5727 = vmatprep.subr.bf16.mxu0 %v7584_v53  ;;  %v2512_v19 = vld [vmem:[#allocation2 + $0x2e8] sm:$0xff] }
 0x380   :  { %5769 = vmatpush1.bf16.msra.mxu1 %v7719_v37  ;;  %v2636_v20 = vld [vmem:[#allocation2 + $0x6c8] sm:$0xff]  ;;  %v7672_v32 = vcombine.high %v2508_v18, %v2512_v19  ;;  %v7671_v37 = vcombine.low %v2508_v18, %v2512_v19 }
 0x381   :  { %5770 = vmatprep.subr.bf16.mxu1 %v7712_v58  ;;  %v2640_v23 = vld [vmem:[#allocation2 + $0x6e8] sm:$0xff] }
 0x382   :  { %5728 = vmatpush1.bf16.msra.mxu0 %v7583_v27  ;;  %v7800_v35 = vcombine.high %v2636_v20, %v2640_v23  ;;  %v2500_v59 = vld [vmem:[#allocation2 + $0x288] sm:$0xff]  ;;  %v7799_v53 = vcombine.low %v2636_v20, %v2640_v23 }
 0x383   :  { %5729 = vmatprep.subr.bf16.mxu0 %v7704_v44  ;;  %v2504_v10 = vld [vmem:[#allocation2 + $0x2a8] sm:$0xff] }
 0x384   :  { %5771 = vmatpush1.bf16.msra.mxu1 %v7711_v42  ;;  %v2628_v25 = vld [vmem:[#allocation2 + $0x688] sm:$0xff]  ;;  %v7664_v58 = vcombine.high %v2500_v59, %v2504_v10  ;;  %v7663_v42 = vcombine.low %v2500_v59, %v2504_v10 }
 0x385   :  { %5772 = vmatprep.subr.bf16.mxu1 %v7832_v63  ;;  %v2632_v34 = vld [vmem:[#allocation2 + $0x6a8] sm:$0xff] }
 0x386   :  { %5730 = vmatpush2.bf16.msra.mxu0 %v7703_v36  ;;  %v7792_v0 = vcombine.high %v2628_v25, %v2632_v34  ;;  %v2492_v57 = vld [vmem:[#allocation2 + $0x248] sm:$0xff]  ;;  %v7791_v44 = vcombine.low %v2628_v25, %v2632_v34 }
 0x387   :  { %5731 = vmatprep.subr.bf16.mxu0 %v7696_v49  ;;  %v2496_v4 = vld [vmem:[#allocation2 + $0x268] sm:$0xff] }
 0x388   :  { %5773 = vmatpush2.bf16.msra.mxu1 %v7831_v45  ;;  %v2620_v22 = vld [vmem:[#allocation2 + $0x648] sm:$0xff]  ;;  %v7656_v63 = vcombine.high %v2492_v57, %v2496_v4  ;;  %v7655_v45 = vcombine.low %v2492_v57, %v2496_v4 }
 0x389   :  { %5774 = vmatprep.subr.bf16.mxu1 %v7824_v55  ;;  %v2624_v27 = vld [vmem:[#allocation2 + $0x668] sm:$0xff] }
 0x38a   :  { %5732 = vmatpush2.bf16.msra.mxu0 %v7695_v8  ;;  %v7784_v5 = vcombine.high %v2620_v22, %v2624_v27  ;;  %v2484_v6 = vld [vmem:[#allocation2 + $0x208] sm:$0xff]  ;;  %v7783_v49 = vcombine.low %v2620_v22, %v2624_v27 }
 0x38b   :  { %5733 = vmatprep.subr.bf16.mxu0 %v7688_v17  ;;  %v2488_v43 = vld [vmem:[#allocation2 + $0x228] sm:$0xff] }
 0x38c   :  { %5775 = vmatpush2.bf16.msra.mxu1 %v7823_v1  ;;  %v2612_v28 = vld [vmem:[#allocation2 + $0x608] sm:$0xff]  ;;  %v7648_v55 = vcombine.high %v2484_v6, %v2488_v43  ;;  %v7647_v1 = vcombine.low %v2484_v6, %v2488_v43 }
 0x38d   :  { %5776 = vmatprep.subr.bf16.mxu1 %v7816_v14  ;;  %v2616_v36 = vld [vmem:[#allocation2 + $0x628] sm:$0xff] }
 0x38e   :  { %5734 = vmatpush2.bf16.msra.mxu0 %v7687_v38  ;;  %v7776_v56 = vcombine.high %v2612_v28, %v2616_v36  ;;  %v2732_v60 = vld [vmem:[#allocation2 + $0x9c8] sm:$0xff]  ;;  %v7775_v17 = vcombine.low %v2612_v28, %v2616_v36 }
 0x38f   :  { %5735 = vmatprep.subr.bf16.mxu0 %v7680_v39  ;;  %v2736_v61 = vld [vmem:[#allocation2 + $0x9e8] sm:$0xff] }
 0x390   :  { %5777 = vmatpush2.bf16.msra.mxu1 %v7815_v33  ;;  %v2860_v62 = vld [vmem:[#allocation2 + $0xdc8] sm:$0xff]  ;;  %v7896_v14 = vcombine.high %v2732_v60, %v2736_v61  ;;  %v7895_v33 = vcombine.low %v2732_v60, %v2736_v61 }
 0x391   :  { %5778 = vmatprep.subr.bf16.mxu1 %v7808_v15  ;;  %v2864_v8 = vld [vmem:[#allocation2 + $0xde8] sm:$0xff] }
 0x392   :  { %5736 = vmatpush2.bf16.msra.mxu0 %v7679_v24  ;;  %v8024_v13 = vcombine.high %v2860_v62, %v2864_v8  ;;  %v2724_v2 = vld [vmem:[#allocation2 + $0x988] sm:$0xff]  ;;  %v8023_v39 = vcombine.low %v2860_v62, %v2864_v8 }
 0x393   :  { %5737 = vmatprep.subr.bf16.mxu0 %v7672_v32  ;;  %v2728_v30 = vld [vmem:[#allocation2 + $0x9a8] sm:$0xff] }
 0x394   :  { %5779 = vmatpush2.bf16.msra.mxu1 %v7807_v31  ;;  %v2852_v11 = vld [vmem:[#allocation2 + $0xd88] sm:$0xff]  ;;  %v7888_v15 = vcombine.high %v2724_v2, %v2728_v30  ;;  %v7887_v31 = vcombine.low %v2724_v2, %v2728_v30 }
 0x395   :  { %5780 = vmatprep.subr.bf16.mxu1 %v7800_v35  ;;  %v2856_v38 = vld [vmem:[#allocation2 + $0xda8] sm:$0xff] }
 0x396   :  { %5738 = vmatpush2.bf16.msra.mxu0 %v7671_v37  ;;  %v8016_v18 = vcombine.high %v2852_v11, %v2856_v38  ;;  %v2716_v19 = vld [vmem:[#allocation2 + $0x948] sm:$0xff]  ;;  %v8015_v32 = vcombine.low %v2852_v11, %v2856_v38 }
 0x397   :  { %5739 = vmatprep.subr.bf16.mxu0 %v7664_v58  ;;  %v2720_v20 = vld [vmem:[#allocation2 + $0x968] sm:$0xff] }
 0x398   :  { %5781 = vmatpush2.bf16.msra.mxu1 %v7799_v53  ;;  %v2844_v23 = vld [vmem:[#allocation2 + $0xd48] sm:$0xff]  ;;  %v7880_v35 = vcombine.high %v2716_v19, %v2720_v20  ;;  %v7879_v53 = vcombine.low %v2716_v19, %v2720_v20 }
 0x399   :  { %5782 = vmatprep.subr.bf16.mxu1 %v7792_v0  ;;  %v2848_v24 = vld [vmem:[#allocation2 + $0xd68] sm:$0xff] }
 0x39a   :  { %5740 = vmatpush2.bf16.msra.mxu0 %v7663_v42  ;;  %v8008_v59 = vcombine.high %v2844_v23, %v2848_v24  ;;  %v2708_v10 = vld [vmem:[#allocation2 + $0x908] sm:$0xff]  ;;  %v8007_v58 = vcombine.low %v2844_v23, %v2848_v24 }
 0x39b   :  { %5741 = vmatprep.subr.bf16.mxu0 %v7656_v63  ;;  %v2712_v25 = vld [vmem:[#allocation2 + $0x928] sm:$0xff] }
 0x39c   :  { %5783 = vmatpush2.bf16.msra.mxu1 %v7791_v44  ;;  %v2836_v34 = vld [vmem:[#allocation2 + $0xd08] sm:$0xff]  ;;  %v7872_v0 = vcombine.high %v2708_v10, %v2712_v25  ;;  %v7871_v44 = vcombine.low %v2708_v10, %v2712_v25 }
 0x39d   :  { %5784 = vmatprep.subr.bf16.mxu1 %v7784_v5  ;;  %v2840_v37 = vld [vmem:[#allocation2 + $0xd28] sm:$0xff] }
 0x39e   :  { %5742 = vmatpush2.bf16.msra.mxu0 %v7655_v45  ;;  %v8000_v57 = vcombine.high %v2836_v34, %v2840_v37  ;;  %v2700_v4 = vld [vmem:[#allocation2 + $0x8c8] sm:$0xff]  ;;  %v7999_v63 = vcombine.low %v2836_v34, %v2840_v37 }
 0x39f   :  { %5743 = vmatprep.subr.bf16.mxu0 %v7648_v55  ;;  %v2704_v22 = vld [vmem:[#allocation2 + $0x8e8] sm:$0xff] }
 0x3a0   :  { %5785 = vmatpush2.bf16.msra.mxu1 %v7783_v49  ;;  %v2828_v27 = vld [vmem:[#allocation2 + $0xcc8] sm:$0xff]  ;;  %v7864_v5 = vcombine.high %v2700_v4, %v2704_v22  ;;  %v7863_v49 = vcombine.low %v2700_v4, %v2704_v22 }
 0x3a1   :  { %5786 = vmatprep.subr.bf16.mxu1 %v7776_v56  ;;  %v2832_v42 = vld [vmem:[#allocation2 + $0xce8] sm:$0xff] }
 0x3a2   :  { %5744 = vmatpush2.bf16.msra.mxu0 %v7647_v1  ;;  %v7992_v6 = vcombine.high %v2828_v27, %v2832_v42  ;;  %v2692_v43 = vld [vmem:[#allocation2 + $0x888] sm:$0xff]  ;;  %v7991_v55 = vcombine.low %v2828_v27, %v2832_v42 }
 0x3a3   :  { %5799 = vmatprep.subr.bf16.mxu0 %v7896_v14  ;;  %v2696_v28 = vld [vmem:[#allocation2 + $0x8a8] sm:$0xff] }
 0x3a4   :  { %5787 = vmatpush2.bf16.msra.mxu1 %v7775_v17  ;;  %v2820_v36 = vld [vmem:[#allocation2 + $0xc88] sm:$0xff]  ;;  %v7856_v56 = vcombine.high %v2692_v43, %v2696_v28  ;;  %v7855_v17 = vcombine.low %v2692_v43, %v2696_v28 }
 0x3a5   :  { %5842 = vmatprep.subr.bf16.mxu1 %v8024_v13  ;;  %5746 = vmatmul.mubr.bf16.vlgmr.msra.gmra.mxu0 %v8984_v21  ;;  %v2824_v45 = vld [vmem:[#allocation2 + $0xca8] sm:$0xff] }
 0x3a6   :  { %5800 = vmatpush1.bf16.msra.mxu0 %v7895_v33  ;;  %5831 = vmatprep.mubr.bf16.mxu0 %v8996_v7  ;;  %v7984_v60 = vcombine.high %v2820_v36, %v2824_v45  ;;  %v2684_v61 = vld [vmem:[#allocation2 + $0x848] sm:$0xff]  ;;  %v7983_v14 = vcombine.low %v2820_v36, %v2824_v45 }
 0x3a7   :  { %5789 = vmatmul.mubr.bf16.vlgmr.msra.gmra.mxu1 %v8990_v26  ;;  %5801 = vmatprep.subr.bf16.mxu0 %v7888_v15  ;;  %v2688_v62 = vld [vmem:[#allocation2 + $0x868] sm:$0xff] }
 0x3a8   :  { %5843 = vmatpush1.bf16.msra.mxu1 %v8023_v39  ;;  %5874 = vmatprep.mubr.bf16.mxu1 %v9003_v29  ;;  %v2812_v8 = vld [vmem:[#allocation2 + $0xc48] sm:$0xff]  ;;  %v7848_v13 = vcombine.high %v2684_v61, %v2688_v62  ;;  %v7847_v39 = vcombine.low %v2684_v61, %v2688_v62 }
 0x3a9   :  { %5844 = vmatprep.subr.bf16.mxu1 %v8016_v18  ;;  %v2816_v1 = vld [vmem:[#allocation2 + $0xc68] sm:$0xff] }
 0x3aa   :  { %5802 = vmatpush1.bf16.msra.mxu0 %v7887_v31  ;;  %v7976_v2 = vcombine.high %v2812_v8, %v2816_v1  ;;  %v2676_v30 = vld [vmem:[#allocation2 + $0x808] sm:$0xff]  ;;  %v7975_v15 = vcombine.low %v2812_v8, %v2816_v1 }
 0x3ab   :  { %5803 = vmatprep.subr.bf16.mxu0 %v7880_v35  ;;  %v2680_v11 = vld [vmem:[#allocation2 + $0x828] sm:$0xff] }
 0x3ac   :  { %5845 = vmatpush1.bf16.msra.mxu1 %v8015_v32  ;;  %v2804_v38 = vld [vmem:[#allocation2 + $0xc08] sm:$0xff]  ;;  %v7840_v18 = vcombine.high %v2676_v30, %v2680_v11  ;;  %v7839_v32 = vcombine.low %v2676_v30, %v2680_v11 }
 0x3ad   :  { %5846 = vmatprep.subr.bf16.mxu1 %v8008_v59  ;;  %v2808_v33 = vld [vmem:[#allocation2 + $0xc28] sm:$0xff] }
 0x3ae   :  { %5804 = vmatpush1.bf16.msra.mxu0 %v7879_v53  ;;  %v7968_v19 = vcombine.high %v2804_v38, %v2808_v33  ;;  %v2796_v20 = vld [vmem:[#allocation2 + $0xbc8] sm:$0xff]  ;;  %v7967_v35 = vcombine.low %v2804_v38, %v2808_v33 }
 0x3af   :  { %5805 = vmatprep.subr.bf16.mxu0 %v7872_v0  ;;  %v2800_v23 = vld [vmem:[#allocation2 + $0xbe8] sm:$0xff] }
 0x3b0   :  { %5847 = vmatpush1.bf16.msra.mxu1 %v8007_v58  ;;  %v2924_v24 = vld [vmem:[#allocation2 + $0xfc8] sm:$0xff]  ;;  %v7960_v59 = vcombine.high %v2796_v20, %v2800_v23  ;;  %v7959_v58 = vcombine.low %v2796_v20, %v2800_v23 }
 0x3b1   :  { %5848 = vmatprep.subr.bf16.mxu1 %v8000_v57  ;;  %v2928_v31 = vld [vmem:[#allocation2 + $0xfe8] sm:$0xff] }
 0x3b2   :  { %5806 = vmatpush1.bf16.msra.mxu0 %v7871_v44  ;;  %v8088_v10 = vcombine.high %v2924_v24, %v2928_v31  ;;  %v2788_v25 = vld [vmem:[#allocation2 + $0xb88] sm:$0xff]  ;;  %v8087_v0 = vcombine.low %v2924_v24, %v2928_v31 }
 0x3b3   :  { %5807 = vmatprep.subr.bf16.mxu0 %v7864_v5  ;;  %v2792_v34 = vld [vmem:[#allocation2 + $0xba8] sm:$0xff] }
 0x3b4   :  { %5849 = vmatpush1.bf16.msra.mxu1 %v7999_v63  ;;  %v2916_v37 = vld [vmem:[#allocation2 + $0xf88] sm:$0xff]  ;;  %v7952_v57 = vcombine.high %v2788_v25, %v2792_v34  ;;  %v7951_v63 = vcombine.low %v2788_v25, %v2792_v34 }
 0x3b5   :  { %5850 = vmatprep.subr.bf16.mxu1 %v7992_v6  ;;  %v2920_v53 = vld [vmem:[#allocation2 + $0xfa8] sm:$0xff] }
 0x3b6   :  { %5808 = vmatpush1.bf16.msra.mxu0 %v7863_v49  ;;  %v8080_v4 = vcombine.high %v2916_v37, %v2920_v53  ;;  %v2780_v22 = vld [vmem:[#allocation2 + $0xb48] sm:$0xff]  ;;  %v8079_v5 = vcombine.low %v2916_v37, %v2920_v53 }
 0x3b7   :  { %5809 = vmatprep.subr.bf16.mxu0 %v7856_v56  ;;  %v2784_v27 = vld [vmem:[#allocation2 + $0xb68] sm:$0xff] }
 0x3b8   :  { %5851 = vmatpush1.bf16.msra.mxu1 %v7991_v55  ;;  %v2908_v42 = vld [vmem:[#allocation2 + $0xf48] sm:$0xff]  ;;  %v7944_v6 = vcombine.high %v2780_v22, %v2784_v27  ;;  %v7943_v55 = vcombine.low %v2780_v22, %v2784_v27  ;;  %v2477_v27 = vld [vmem:[#allocation2 + $0x1d0] sm:$0xff] }
 0x3b9   :  { %5852 = vmatprep.subr.bf16.mxu1 %v7984_v60  ;;  %v2912_v44 = vld [vmem:[#allocation2 + $0xf68] sm:$0xff] }
 0x3ba   :  { %5810 = vmatpush1.bf16.msra.mxu0 %v7855_v17  ;;  %v8072_v43 = vcombine.high %v2908_v42, %v2912_v44  ;;  %v2772_v28 = vld [vmem:[#allocation2 + $0xb08] sm:$0xff]  ;;  %v8071_v56 = vcombine.low %v2908_v42, %v2912_v44  ;;  %v2481_v42 = vld [vmem:[#allocation2 + $0x1f0] sm:$0xff] }
 0x3bb   :  { %5811 = vmatprep.subr.bf16.mxu0 %v7848_v13  ;;  %v2776_v36 = vld [vmem:[#allocation2 + $0xb28] sm:$0xff]  ;;  %v2605_v44 = vld [vmem:[#allocation2 + $0x5d0] sm:$0xff] }
 0x3bc   :  { %5853 = vmatpush1.bf16.msra.mxu1 %v7983_v14  ;;  %v2900_v45 = vld [vmem:[#allocation2 + $0xf08] sm:$0xff]  ;;  %v7936_v60 = vcombine.high %v2772_v28, %v2776_v36  ;;  %v7935_v14 = vcombine.low %v2772_v28, %v2776_v36  ;;  %v2469_v36 = vld [vmem:[#allocation2 + $0x190] sm:$0xff] }
 0x3bd   :  { %5854 = vmatprep.subr.bf16.mxu1 %v7976_v2  ;;  %v2904_v49 = vld [vmem:[#allocation2 + $0xf28] sm:$0xff] }
 0x3be   :  { %5812 = vmatpush1.bf16.msra.mxu0 %v7847_v39  ;;  %v8064_v61 = vcombine.high %v2900_v45, %v2904_v49  ;;  %v2764_v62 = vld [vmem:[#allocation2 + $0xac8] sm:$0xff]  ;;  %v8063_v13 = vcombine.low %v2900_v45, %v2904_v49  ;;  %v2473_v45 = vld [vmem:[#allocation2 + $0x1b0] sm:$0xff] }
 0x3bf   :  { %5813 = vmatprep.subr.bf16.mxu0 %v7840_v18  ;;  %v2768_v8 = vld [vmem:[#allocation2 + $0xae8] sm:$0xff]  ;;  %v2597_v49 = vld [vmem:[#allocation2 + $0x590] sm:$0xff] }
 0x3c0   :  { %5855 = vmatpush1.bf16.msra.mxu1 %v7975_v15  ;;  %v2892_v1 = vld [vmem:[#allocation2 + $0xec8] sm:$0xff]  ;;  %v7928_v2 = vcombine.high %v2764_v62, %v2768_v8  ;;  %v7927_v15 = vcombine.low %v2764_v62, %v2768_v8  ;;  %v2461_v8 = vld [vmem:[#allocation2 + $0x150] sm:$0xff] }
 0x3c1   :  { %5856 = vmatprep.subr.bf16.mxu1 %v7968_v19  ;;  %v2896_v17 = vld [vmem:[#allocation2 + $0xee8] sm:$0xff] }
 0x3c2   :  { %5814 = vmatpush1.bf16.msra.mxu0 %v7839_v32  ;;  %v8056_v30 = vcombine.high %v2892_v1, %v2896_v17  ;;  %v2756_v11 = vld [vmem:[#allocation2 + $0xa88] sm:$0xff]  ;;  %v8055_v18 = vcombine.low %v2892_v1, %v2896_v17  ;;  %v2465_v1 = vld [vmem:[#allocation2 + $0x170] sm:$0xff] }
 0x3c3   :  { %5815 = vmatprep.subr.bf16.mxu0 %v7960_v59  ;;  %v2760_v38 = vld [vmem:[#allocation2 + $0xaa8] sm:$0xff]  ;;  %v2589_v17 = vld [vmem:[#allocation2 + $0x550] sm:$0xff] }
 0x3c4   :  { %5857 = vmatpush1.bf16.msra.mxu1 %v7967_v35  ;;  %v2884_v33 = vld [vmem:[#allocation2 + $0xe88] sm:$0xff]  ;;  %v7920_v19 = vcombine.high %v2756_v11, %v2760_v38  ;;  %v7919_v35 = vcombine.low %v2756_v11, %v2760_v38  ;;  %v2453_v38 = vld [vmem:[#allocation2 + $0x110] sm:$0xff] }
 0x3c5   :  { %5858 = vmatprep.subr.bf16.mxu1 %v8088_v10  ;;  %v2888_v39 = vld [vmem:[#allocation2 + $0xea8] sm:$0xff] }
 0x3c6   :  { %5816 = vmatpush2.bf16.msra.mxu0 %v7959_v58  ;;  %v8048_v20 = vcombine.high %v2884_v33, %v2888_v39  ;;  %v2748_v23 = vld [vmem:[#allocation2 + $0xa48] sm:$0xff]  ;;  %v8047_v59 = vcombine.low %v2884_v33, %v2888_v39  ;;  %v2457_v33 = vld [vmem:[#allocation2 + $0x130] sm:$0xff] }
 0x3c7   :  { %5817 = vmatprep.subr.bf16.mxu0 %v7952_v57  ;;  %v2752_v24 = vld [vmem:[#allocation2 + $0xa68] sm:$0xff]  ;;  %v2581_v39 = vld [vmem:[#allocation2 + $0x510] sm:$0xff] }
 0x3c8   :  { %5859 = vmatpush2.bf16.msra.mxu1 %v8087_v0  ;;  %v2876_v31 = vld [vmem:[#allocation2 + $0xe48] sm:$0xff]  ;;  %v7912_v10 = vcombine.high %v2748_v23, %v2752_v24  ;;  %v7911_v0 = vcombine.low %v2748_v23, %v2752_v24  ;;  %v2445_v24 = vld [vmem:[#allocation2 + $0xd0] sm:$0xff] }
 0x3c9   :  { %5860 = vmatprep.subr.bf16.mxu1 %v8080_v4  ;;  %v2880_v32 = vld [vmem:[#allocation2 + $0xe68] sm:$0xff] }
 0x3ca   :  { %5818 = vmatpush2.bf16.msra.mxu0 %v7951_v63  ;;  %v8040_v25 = vcombine.high %v2876_v31, %v2880_v32  ;;  %v2740_v34 = vld [vmem:[#allocation2 + $0xa08] sm:$0xff]  ;;  %v8039_v57 = vcombine.low %v2876_v31, %v2880_v32  ;;  %v2609_v63 = vld [vmem:[#allocation2 + $0x5f0] sm:$0xff] }
 0x3cb   :  { %5819 = vmatprep.subr.bf16.mxu0 %v7944_v6  ;;  %v2744_v37 = vld [vmem:[#allocation2 + $0xa28] sm:$0xff]  ;;  %v7770_v28 = vcombine.high %v2605_v44, %v2609_v63  ;;  %v2449_v31 = vld [vmem:[#allocation2 + $0xf0] sm:$0xff] }
 0x3cc   :  { %5861 = vmatpush2.bf16.msra.mxu1 %v8079_v5  ;;  %v2868_v53 = vld [vmem:[#allocation2 + $0xe08] sm:$0xff]  ;;  %v7904_v4 = vcombine.high %v2740_v34, %v2744_v37  ;;  %v7903_v5 = vcombine.low %v2740_v34, %v2744_v37  ;;  %v2573_v32 = vld [vmem:[#allocation2 + $0x4d0] sm:$0xff] }
 0x3cd   :  { %5862 = vmatprep.subr.bf16.mxu1 %v8072_v43  ;;  %v2872_v58 = vld [vmem:[#allocation2 + $0xe28] sm:$0xff]  ;;  %v7642_v43 = vcombine.high %v2477_v27, %v2481_v42  ;;  %v2437_v37 = vld [vmem:[#allocation2 + $0x90] sm:$0xff] }
 0x3ce   :  { %5820 = vmatpush2.bf16.msra.mxu0 %v7943_v55  ;;  %v8032_v22 = vcombine.high %v2868_v53, %v2872_v58  ;;  %v8031_v6 = vcombine.low %v2868_v53, %v2872_v58  ;;  %v2601_v55 = vld [vmem:[#allocation2 + $0x5b0] sm:$0xff] }
 0x3cf   :  { %5821 = vmatprep.subr.bf16.mxu0 %v7936_v60  ;;  %v7769_v60 = vcombine.low %v2605_v44, %v2609_v63  ;;  %v7762_v62 = vcombine.high %v2597_v49, %v2601_v55  ;;  %v2441_v53 = vld [vmem:[#allocation2 + $0xb0] sm:$0xff] }
 0x3d0   :  { %5863 = vmatpush2.bf16.msra.mxu1 %v8071_v56  ;;  %v7641_v56 = vcombine.low %v2477_v27, %v2481_v42  ;;  %v2565_v58 = vld [vmem:[#allocation2 + $0x490] sm:$0xff] }
 0x3d1   :  { %5864 = vmatprep.subr.bf16.mxu1 %v8064_v61  ;;  %v7634_v61 = vcombine.high %v2469_v36, %v2473_v45  ;;  %v2429_v42 = vld [vmem:[#allocation2 + $0x50] sm:$0xff] }
 0x3d2   :  { %5822 = vmatpush2.bf16.msra.mxu0 %v7935_v14  ;;  %v2593_v14 = vld [vmem:[#allocation2 + $0x570] sm:$0xff] }
 0x3d3   :  { %5823 = vmatprep.subr.bf16.mxu0 %v7928_v2  ;;  %v7761_v2 = vcombine.low %v2597_v49, %v2601_v55  ;;  %v7754_v11 = vcombine.high %v2589_v17, %v2593_v14  ;;  %v2433_v44 = vld [vmem:[#allocation2 + $0x70] sm:$0xff] }
 0x3d4   :  { %5865 = vmatpush2.bf16.msra.mxu1 %v8063_v13  ;;  %v7633_v13 = vcombine.low %v2469_v36, %v2473_v45  ;;  %v2557_v63 = vld [vmem:[#allocation2 + $0x450] sm:$0xff] }
 0x3d5   :  { %5866 = vmatprep.subr.bf16.mxu1 %v8056_v30  ;;  %v7626_v30 = vcombine.high %v2461_v8, %v2465_v1  ;;  %v2421_v45 = vld [vmem:[#allocation2 + $0x10] sm:$0xff] }
 0x3d6   :  { %5824 = vmatpush2.bf16.msra.mxu0 %v7927_v15  ;;  %v2585_v15 = vld [vmem:[#allocation2 + $0x530] sm:$0xff] }
 0x3d7   :  { %5825 = vmatprep.subr.bf16.mxu0 %v7920_v19  ;;  %v7753_v19 = vcombine.low %v2589_v17, %v2593_v14  ;;  %v7746_v23 = vcombine.high %v2581_v39, %v2585_v15  ;;  %v2425_v49 = vld [vmem:[#allocation2 + $0x30] sm:$0xff] }
 0x3d8   :  { %5867 = vmatpush2.bf16.msra.mxu1 %v8055_v18  ;;  %v7625_v18 = vcombine.low %v2461_v8, %v2465_v1  ;;  %v2549_v55 = vld [vmem:[#allocation2 + $0x410] sm:$0xff] }
 0x3d9   :  { %5868 = vmatprep.subr.bf16.mxu1 %v8048_v20  ;;  %v7618_v20 = vcombine.high %v2453_v38, %v2457_v33  ;;  %v2541_v1 = vld [vmem:[#allocation2 + $0x3d0] sm:$0xff] }
 0x3da   :  { %5826 = vmatpush2.bf16.msra.mxu0 %v7919_v35  ;;  %v2577_v35 = vld [vmem:[#allocation2 + $0x4f0] sm:$0xff] }
 0x3db   :  { %5827 = vmatprep.subr.bf16.mxu0 %v7912_v10  ;;  %v7745_v10 = vcombine.low %v2581_v39, %v2585_v15  ;;  %v7738_v34 = vcombine.high %v2573_v32, %v2577_v35  ;;  %v2545_v17 = vld [vmem:[#allocation2 + $0x3f0] sm:$0xff] }
 0x3dc   :  { %5869 = vmatpush2.bf16.msra.mxu1 %v8047_v59  ;;  %v7617_v59 = vcombine.low %v2453_v38, %v2457_v33  ;;  %v2669_v14 = vld [vmem:[#allocation2 + $0x7d0] sm:$0xff] }
 0x3dd   :  { %5870 = vmatprep.subr.bf16.mxu1 %v8040_v25  ;;  %v7610_v25 = vcombine.high %v2445_v24, %v2449_v31  ;;  %v2533_v33 = vld [vmem:[#allocation2 + $0x390] sm:$0xff] }
 0x3de   :  { %5828 = vmatpush2.bf16.msra.mxu0 %v7911_v0  ;;  %v2569_v0 = vld [vmem:[#allocation2 + $0x4b0] sm:$0xff] }
 0x3df   :  { %5829 = vmatprep.subr.bf16.mxu0 %v7904_v4  ;;  %v7737_v4 = vcombine.low %v2573_v32, %v2577_v35  ;;  %v7730_v27 = vcombine.high %v2565_v58, %v2569_v0  ;;  %v2537_v39 = vld [vmem:[#allocation2 + $0x3b0] sm:$0xff] }
 0x3e0   :  { %5871 = vmatpush2.bf16.msra.mxu1 %v8039_v57  ;;  %v7609_v57 = vcombine.low %v2445_v24, %v2449_v31  ;;  %v2661_v15 = vld [vmem:[#allocation2 + $0x790] sm:$0xff] }
 0x3e1   :  { %5872 = vmatprep.subr.bf16.mxu1 %v8032_v22  ;;  %v7602_v22 = vcombine.high %v2437_v37, %v2441_v53  ;;  %v2525_v31 = vld [vmem:[#allocation2 + $0x350] sm:$0xff] }
 0x3e2   :  { %5830 = vmatpush2.bf16.msra.mxu0 %v7903_v5  ;;  %v2561_v5 = vld [vmem:[#allocation2 + $0x470] sm:$0xff] }
 0x3e3   :  { %5885 = vmatprep.subr.bf16.mxu0 %v7642_v43  ;;  %v7729_v43 = vcombine.low %v2565_v58, %v2569_v0  ;;  %v7722_v36 = vcombine.high %v2557_v63, %v2561_v5  ;;  %v2529_v32 = vld [vmem:[#allocation2 + $0x370] sm:$0xff] }
 0x3e4   :  { %5873 = vmatpush2.bf16.msra.mxu1 %v8031_v6  ;;  %v7601_v6 = vcombine.low %v2437_v37, %v2441_v53  ;;  %v2653_v35 = vld [vmem:[#allocation2 + $0x750] sm:$0xff] }
 0x3e5   :  { %5928 = vmatprep.subr.bf16.mxu1 %v7770_v28  ;;  %5832 = vmatmul.mubr.bf16.vlgmr.msra.gmra.mxu0 %v9012_v3  ;;  %v7594_v28 = vcombine.high %v2429_v42, %v2433_v44  ;;  %v2517_v53 = vld [vmem:[#allocation2 + $0x310] sm:$0xff] }
 0x3e6   :  { %5886 = vmatpush1.bf16.msra.mxu0 %v7641_v56  ;;  %5917 = vmatprep.mubr.bf16.mxu0 %v8970_v52  ;;  %v2553_v56 = vld [vmem:[#allocation2 + $0x430] sm:$0xff] }
 0x3e7   :  { %5875 = vmatmul.mubr.bf16.vlgmr.msra.gmra.mxu1 %v9018_v16  ;;  %5887 = vmatprep.subr.bf16.mxu0 %v7634_v61  ;;  %v7721_v61 = vcombine.low %v2557_v63, %v2561_v5  ;;  %v7714_v8 = vcombine.high %v2549_v55, %v2553_v56  ;;  %v2521_v58 = vld [vmem:[#allocation2 + $0x330] sm:$0xff] }
 0x3e8   :  { %5929 = vmatpush1.bf16.msra.mxu1 %v7769_v60  ;;  %5960 = vmatprep.mubr.bf16.mxu1 %v8976_v54  ;;  %v7593_v60 = vcombine.low %v2429_v42, %v2433_v44  ;;  %v2645_v0 = vld [vmem:[#allocation2 + $0x710] sm:$0xff] }
 0x3e9   :  { %5930 = vmatprep.subr.bf16.mxu1 %v7762_v62  ;;  %v7586_v62 = vcombine.high %v2421_v45, %v2425_v49  ;;  %v2509_v44 = vld [vmem:[#allocation2 + $0x2d0] sm:$0xff] }
 0x3ea   :  { %5888 = vmatpush1.bf16.msra.mxu0 %v7633_v13  ;;  %v2673_v13 = vld [vmem:[#allocation2 + $0x7f0] sm:$0xff] }
 0x3eb   :  { %5889 = vmatprep.subr.bf16.mxu0 %v7626_v30  ;;  %v7713_v30 = vcombine.low %v2549_v55, %v2553_v56  ;;  %v7834_v38 = vcombine.high %v2669_v14, %v2673_v13  ;;  %v2513_v63 = vld [vmem:[#allocation2 + $0x2f0] sm:$0xff] }
 0x3ec   :  { %5931 = vmatpush1.bf16.msra.mxu1 %v7761_v2  ;;  %v7585_v2 = vcombine.low %v2421_v45, %v2425_v49  ;;  %v2637_v5 = vld [vmem:[#allocation2 + $0x6d0] sm:$0xff] }
 0x3ed   :  { %5932 = vmatprep.subr.bf16.mxu1 %v7754_v11  ;;  %v7706_v11 = vcombine.high %v2541_v1, %v2545_v17  ;;  %v2501_v49 = vld [vmem:[#allocation2 + $0x290] sm:$0xff] }
 0x3ee   :  { %5890 = vmatpush1.bf16.msra.mxu0 %v7625_v18  ;;  %v2665_v18 = vld [vmem:[#allocation2 + $0x7b0] sm:$0xff] }
 0x3ef   :  { %5891 = vmatprep.subr.bf16.mxu0 %v7618_v20  ;;  %v7833_v20 = vcombine.low %v2669_v14, %v2673_v13  ;;  %v7826_v24 = vcombine.high %v2661_v15, %v2665_v18  ;;  %v2505_v55 = vld [vmem:[#allocation2 + $0x2b0] sm:$0xff] }
 0x3f0   :  { %5933 = vmatpush1.bf16.msra.mxu1 %v7753_v19  ;;  %v7705_v19 = vcombine.low %v2541_v1, %v2545_v17  ;;  %v2629_v56 = vld [vmem:[#allocation2 + $0x690] sm:$0xff] }
 0x3f1   :  { %5934 = vmatprep.subr.bf16.mxu1 %v7746_v23  ;;  %v7698_v23 = vcombine.high %v2533_v33, %v2537_v39  ;;  %v2493_v17 = vld [vmem:[#allocation2 + $0x250] sm:$0xff] }
 0x3f2   :  { %5892 = vmatpush1.bf16.msra.mxu0 %v7617_v59  ;;  %v2657_v59 = vld [vmem:[#allocation2 + $0x770] sm:$0xff] }
 0x3f3   :  { %5893 = vmatprep.subr.bf16.mxu0 %v7610_v25  ;;  %v7825_v25 = vcombine.low %v2661_v15, %v2665_v18  ;;  %v7818_v37 = vcombine.high %v2653_v35, %v2657_v59  ;;  %v2497_v14 = vld [vmem:[#allocation2 + $0x270] sm:$0xff] }
 0x3f4   :  { %5935 = vmatpush1.bf16.msra.mxu1 %v7745_v10  ;;  %v7697_v10 = vcombine.low %v2533_v33, %v2537_v39  ;;  %v2621_v13 = vld [vmem:[#allocation2 + $0x650] sm:$0xff]  ;;  %v7658_v33 = vcombine.high %v2493_v17, %v2497_v14  ;;  %v5618_v39 = vpop.f32.mrf.mxu1 }
 0x3f5   :  { %5936 = vmatprep.subr.bf16.mxu1 %v7738_v34  ;;  %v7690_v34 = vcombine.high %v2525_v31, %v2529_v32  ;;  %v2485_v18 = vld [vmem:[#allocation2 + $0x210] sm:$0xff] }
 0x3f6   :  { %5894 = vmatpush1.bf16.msra.mxu0 %v7609_v57  ;;  %v2649_v57 = vld [vmem:[#allocation2 + $0x730] sm:$0xff] }
 0x3f7   :  { %5895 = vmatprep.subr.bf16.mxu0 %v7602_v22  ;;  %v7817_v22 = vcombine.low %v2653_v35, %v2657_v59  ;;  %v7810_v42 = vcombine.high %v2645_v0, %v2649_v57 }
 0x3f8   :  { %5937 = vmatpush1.bf16.msra.mxu1 %v7737_v4  ;;  %v7689_v4 = vcombine.low %v2525_v31, %v2529_v32  ;;  %v7657_v31 = vcombine.low %v2493_v17, %v2497_v14  ;;  %v2721_v14 = vld [vmem:[#allocation2 + $0x970] sm:$0xff] }
 0x3f9   :  { %5938 = vmatprep.subr.bf16.mxu1 %v7730_v27  ;;  %v7682_v27 = vcombine.high %v2517_v53, %v2521_v58 }
 0x3fa   :  { %5896 = vmatpush1.bf16.msra.mxu0 %v7601_v6  ;;  %v2641_v6 = vld [vmem:[#allocation2 + $0x6f0] sm:$0xff] }
 0x3fb   :  { %5897 = vmatprep.subr.bf16.mxu0 %v7594_v28  ;;  %v7809_v28 = vcombine.low %v2645_v0, %v2649_v57  ;;  %v7802_v45 = vcombine.high %v2637_v5, %v2641_v6  ;;  %v2865_v0 = vld [vmem:[#allocation2 + $0xdf0] sm:$0xff] }
 0x3fc   :  { %5939 = vmatpush1.bf16.msra.mxu1 %v7729_v43  ;;  %v7681_v43 = vcombine.low %v2517_v53, %v2521_v58  ;;  %v2737_v53 = vld [vmem:[#allocation2 + $0x9f0] sm:$0xff] }
 0x3fd   :  { %5940 = vmatprep.subr.bf16.mxu1 %v7722_v36  ;;  %v7674_v36 = vcombine.high %v2509_v44, %v2513_v63  ;;  %v2861_v58 = vld [vmem:[#allocation2 + $0xdd0] sm:$0xff] }
 0x3fe   :  { %5898 = vmatpush1.bf16.msra.mxu0 %v7593_v60  ;;  %v2633_v60 = vld [vmem:[#allocation2 + $0x6b0] sm:$0xff] }
 0x3ff   :  { %5899 = vmatprep.subr.bf16.mxu0 %v7586_v62  ;;  %v7801_v62 = vcombine.low %v2637_v5, %v2641_v6  ;;  %v7794_v1 = vcombine.high %v2629_v56, %v2633_v60  ;;  %v8026_v5 = vcombine.high %v2861_v58, %v2865_v0  ;;  %v2725_v6 = vld [vmem:[#allocation2 + $0x990] sm:$0xff] }
 0x400   :  { %5941 = vmatpush1.bf16.msra.mxu1 %v7721_v61  ;;  %v7673_v61 = vcombine.low %v2509_v44, %v2513_v63 }
 0x401   :  { %5942 = vmatprep.subr.bf16.mxu1 %v7714_v8  ;;  %v7666_v8 = vcombine.high %v2501_v49, %v2505_v55 }
 0x402   :  { %5900 = vmatpush1.bf16.msra.mxu0 %v7585_v2  ;;  %v2625_v2 = vld [vmem:[#allocation2 + $0x670] sm:$0xff] }
 0x403   :  { %5901 = vmatprep.subr.bf16.mxu0 %v7706_v11  ;;  %v5575_v11 = vpop.f32.mrf.mxu0  ;;  %v7786_v15 = vcombine.high %v2621_v13, %v2625_v2  ;;  %v7785_v35 = vcombine.low %v2621_v13, %v2625_v2  ;;  %v2845_v13 = vld [vmem:[#allocation2 + $0xd50] sm:$0xff] }
 0x404   :  { %5943 = vmatpush1.bf16.msra.mxu1 %v7713_v30  ;;  %v7665_v30 = vcombine.low %v2501_v49, %v2505_v55  ;;  %v2849_v2 = vld [vmem:[#allocation2 + $0xd70] sm:$0xff] }
 0x405   :  { %5944 = vmatprep.subr.bf16.mxu1 %v7834_v38  ;;  %v7793_v38 = vcombine.low %v2629_v56, %v2633_v60  ;;  %v5577_v32 = vpop.f32.mrf.mxu0  ;;  %v8025_v56 = vcombine.low %v2861_v58, %v2865_v0  ;;  %v2841_v58 = vld [vmem:[#allocation2 + $0xd30] sm:$0xff] }
 0x406   :  { %5902 = vmatpush2.bf16.msra.mxu0 %v7705_v19  ;;  %v2489_v19 = vld [vmem:[#allocation2 + $0x230] sm:$0xff] }
 0x407   :  { %5903 = vmatprep.subr.bf16.mxu0 %v7698_v23  ;;  %v2613_v23 = vld [vmem:[#allocation2 + $0x610] sm:$0xff]  ;;  %v7650_v59 = vcombine.high %v2485_v18, %v2489_v19 }
 0x408   :  { %5945 = vmatpush2.bf16.msra.mxu1 %v7833_v20  ;;  %v9032_v20 = vld [vmem:[#allocation15] sm:$0xff] }
 0x409   :  { %5946 = vmatprep.subr.bf16.mxu1 %v7826_v24  ;;  %v2617_v24 = vld [vmem:[#allocation2 + $0x630] sm:$0xff]  ;;  %v2948_v57 = vrot.slane %v9032_v20, %v8853_v50 }
 0x40a   :  { %5904 = vmatpush2.bf16.msra.mxu0 %v7697_v10  ;;  %v2944_v10 = vrot.slane %v9032_v20, %v8847_v47 }
 0x40b   :  { %5905 = vmatprep.subr.bf16.mxu0 %v7690_v34  ;;  %v7778_v34 = vcombine.high %v2613_v23, %v2617_v24 }
 0x40c   :  { %5947 = vmatpush2.bf16.msra.mxu1 %v7825_v25  ;;  %v5620_v25 = vpop.f32.mrf.mxu1  ;;  %v5576_v44 = vadd.f32 %v5575_v11, %v2944_v10 }
 0x40d   :  { %5948 = vmatprep.subr.bf16.mxu1 %v7818_v37  ;;  %v2733_v37 = vld [vmem:[#allocation2 + $0x9d0] sm:$0xff] }
 0x40e   :  { %5906 = vmatpush2.bf16.msra.mxu0 %v7689_v4  ;;  %v7649_v4 = vcombine.low %v2485_v18, %v2489_v19  ;;  %v5622_v63 = vpop.f32.mrf.mxu1  ;;  %v7897_v49 = vcombine.low %v2733_v37, %v2737_v53 }
 0x40f   :  { %5907 = vmatprep.subr.bf16.mxu0 %v7682_v27  ;;  %v7777_v27 = vcombine.low %v2613_v23, %v2617_v24  ;;  %v8010_v24 = vcombine.high %v2845_v13, %v2849_v2 }
 0x410   :  { %5949 = vmatpush2.bf16.msra.mxu1 %v7817_v22  ;;  %v5579_v22 = vpop.f32.mrf.mxu0 }
 0x411   :  { %5950 = vmatprep.subr.bf16.mxu1 %v7810_v42  ;;  %v7898_v42 = vcombine.high %v2733_v37, %v2737_v53  ;;  %v2837_v53 = vld [vmem:[#allocation2 + $0xd10] sm:$0xff] }
 0x412   :  { %5908 = vmatpush2.bf16.msra.mxu0 %v7681_v43  ;;  %v2729_v43 = vld [vmem:[#allocation2 + $0x9b0] sm:$0xff]  ;;  %v5581_v55 = vpop.f32.mrf.mxu0 }
 0x413   :  { %5909 = vmatprep.subr.bf16.mxu0 %v7674_v36  ;;  %v2857_v36 = vld [vmem:[#allocation2 + $0xdb0] sm:$0xff]  ;;  %v7890_v60 = vcombine.high %v2725_v6, %v2729_v43  ;;  %v7889_v11 = vcombine.low %v2725_v6, %v2729_v43 }
 0x414   :  { %5951 = vmatpush2.bf16.msra.mxu1 %v7809_v28  ;;  %v2853_v28 = vld [vmem:[#allocation2 + $0xd90] sm:$0xff] }
 0x415   :  { %5952 = vmatprep.subr.bf16.mxu1 %v7802_v45  ;;  %v5578_v45 = vadd.f32 %v5577_v32, %v2948_v57  ;;  %v8018_v17 = vcombine.high %v2853_v28, %v2857_v36  ;;  %v8017_v19 = vcombine.low %v2853_v28, %v2857_v36  ;;  %v8002_v28 = vcombine.high %v2837_v53, %v2841_v58  ;;  %v2701_v36 = vld [vmem:[#allocation2 + $0x8d0] sm:$0xff] }
 0x416   :  { %5910 = vmatpush2.bf16.msra.mxu0 %v7673_v61  ;;  %v2717_v61 = vld [vmem:[#allocation2 + $0x950] sm:$0xff] }
 0x417   :  { %5911 = vmatprep.subr.bf16.mxu0 %v7666_v8  ;;  %v5580_v8 = vadd.f32 %v5579_v22, %v2944_v10  ;;  %v7882_v23 = vcombine.high %v2717_v61, %v2721_v14  ;;  %v2709_v10 = vld [vmem:[#allocation2 + $0x910] sm:$0xff]  ;;  %v7881_v37 = vcombine.low %v2717_v61, %v2721_v14 }
 0x418   :  { %5953 = vmatpush2.bf16.msra.mxu1 %v7801_v62  ;;  %v5619_v62 = vadd.f32 %v5618_v39, %v5576_v44  ;;  %v8009_v44 = vcombine.low %v2845_v13, %v2849_v2  ;;  %v2693_v13 = vld [vmem:[#allocation2 + $0x890] sm:$0xff] }
 0x419   :  { %5954 = vmatprep.subr.bf16.mxu1 %v7794_v1  ;;  %v5624_v1 = vpop.f32.mrf.mxu1  ;;  %v2697_v2 = vld [vmem:[#allocation2 + $0x8b0] sm:$0xff] }
 0x41a   :  { %5912 = vmatpush2.bf16.msra.mxu0 %v7665_v30 }
 0x41b   :  { %5913 = vmatprep.subr.bf16.mxu0 %v7658_v33  ;;  %v5582_v33 = vadd.f32 %v5581_v55, %v2948_v57  ;;  %v2829_v55 = vld [vmem:[#allocation2 + $0xcd0] sm:$0xff] }
 0x41c   :  { %5955 = vmatpush2.bf16.msra.mxu1 %v7793_v38  ;;  %v5621_v38 = vadd.f32 %v5620_v25, %v5578_v45  ;;  %v2713_v25 = vld [vmem:[#allocation2 + $0x930] sm:$0xff] }
 0x41d   :  { %5956 = vmatprep.subr.bf16.mxu1 %v7786_v15  ;;  %v5625_v0 = vadd.f32 %v5624_v1, %v5582_v33  ;;  %v2705_v45 = vld [vmem:[#allocation2 + $0x8f0] sm:$0xff] }
 0x41e   :  { %5914 = vmatpush2.bf16.msra.mxu0 %v7657_v31  ;;  %v5623_v31 = vadd.f32 %v5622_v63, %v5580_v8  ;;  %v7874_v63 = vcombine.high %v2709_v10, %v2713_v25  ;;  %v8001_v8 = vcombine.low %v2837_v53, %v2841_v58  ;;  %v7866_v1 = vcombine.high %v2701_v36, %v2705_v45  ;;  %v2809_v53 = vld [vmem:[#allocation2 + $0xc30] sm:$0xff] }
 0x41f   :  { %5915 = vmatprep.subr.bf16.mxu0 %v7650_v59 }
 0x420   :  { %5957 = vmatpush2.bf16.msra.mxu1 %v7785_v35 }
 0x421   :  { %5958 = vmatprep.subr.bf16.mxu1 %v7778_v34 }
 0x422   :  { %5916 = vmatpush2.bf16.msra.mxu0 %v7649_v4 }
 0x423   :  { %5971 = vmatprep.subr.bf16.mxu0 %v7898_v42 }
 0x424   :  { %5959 = vmatpush2.bf16.msra.mxu1 %v7777_v27 }
 0x425   :  { %6014 = vmatprep.subr.bf16.mxu1 %v8026_v5  ;;  %v5661_v30 = vpop.f32.mrf.mxu0  ;;  %5918 = vmatmul.mubr.bf16.vlgmr.msra.gmra.mxu0 %v8984_v21 }
 0x426   :  { %v5662_v15 = vadd.f32 %v5661_v30, %v5619_v62  ;;  %5972 = vmatpush1.bf16.msra.mxu0 %v7897_v49  ;;  %6003 = vmatprep.mubr.bf16.mxu0 %v8996_v7  ;;  %v7873_v62 = vcombine.low %v2709_v10, %v2713_v25  ;;  %v2821_v30 = vld [vmem:[#allocation2 + $0xc90] sm:$0xff] }
 0x427   :  { %v5704_v18 = vpop.f32.mrf.mxu1  ;;  %5961 = vmatmul.mubr.bf16.vlgmr.msra.gmra.mxu1 %v8990_v26  ;;  %v5663_v39 = vpop.f32.mrf.mxu0  ;;  %5973 = vmatprep.subr.bf16.mxu0 %v7890_v60  ;;  %v2677_v25 = vld [vmem:[#allocation2 + $0x810] sm:$0xff] }
 0x428   :  { %6015 = vmatpush1.bf16.msra.mxu1 %v8025_v56  ;;  %v9040_v32 = vadd.f32 %v5704_v18, %v5662_v15  ;;  %v5664_v35 = vadd.f32 %v5663_v39, %v5621_v38  ;;  %6046 = vmatprep.mubr.bf16.mxu1 %v9003_v29  ;;  %v2833_v56 = vld [vmem:[#allocation2 + $0xcf0] sm:$0xff]  ;;  %v7865_v38 = vcombine.low %v2701_v36, %v2705_v45 }
 0x429   :  { %v5706_v59 = vpop.f32.mrf.mxu1  ;;  %6016 = vmatprep.subr.bf16.mxu1 %v8018_v17  ;;  %v5665_v34 = vpop.f32.mrf.mxu0  ;;  %v7994_v14 = vcombine.high %v2829_v55, %v2833_v56  ;;  %v7993_v33 = vcombine.low %v2829_v55, %v2833_v56  ;;  %v7858_v15 = vcombine.high %v2693_v13, %v2697_v2  ;;  %v2685_v39 = vld [vmem:[#allocation2 + $0x850] sm:$0xff] }
 0x42a   :  { %v6229_v57 = vmax.f32 %v9040_v32, 0.0  ;;  %v9045_v4 = vadd.f32 %v5706_v59, %v5664_v35  ;;  %v5666_v22 = vadd.f32 %v5665_v34, %v5623_v31  ;;  %5974 = vmatpush1.bf16.msra.mxu0 %v7889_v11  ;;  %v2825_v11 = vld [vmem:[#allocation2 + $0xcb0] sm:$0xff]  ;;  %v7857_v31 = vcombine.low %v2693_v13, %v2697_v2 }
 0x42b   :  { %v5708_v27 = vpop.f32.mrf.mxu1  ;;  %v5667_v42 = vpop.f32.mrf.mxu0  ;;  %5975 = vmatprep.subr.bf16.mxu0 %v7882_v23  ;;  %v7986_v18 = vcombine.high %v2821_v30, %v2825_v11  ;;  %v2813_v23 = vld [vmem:[#allocation2 + $0xc50] sm:$0xff]  ;;  %v7985_v35 = vcombine.low %v2821_v30, %v2825_v11 }
 0x42c   :  { %6017 = vmatpush1.bf16.msra.mxu1 %v8017_v19  ;;  %v6230_v5 = vmax.f32 %v9045_v4, 0.0  ;;  %v9048_v6 = vadd.f32 %v5708_v27, %v5666_v22  ;;  %v5668_v43 = vadd.f32 %v5667_v42, %v5625_v0  ;;  %v2689_v19 = vld [vmem:[#allocation2 + $0x870] sm:$0xff] }
 0x42d   :  { %6018 = vmatprep.subr.bf16.mxu1 %v8010_v24  ;;  %v5710_v49 = vpop.f32.mrf.mxu1  ;;  %v2817_v24 = vld [vmem:[#allocation2 + $0xc70] sm:$0xff]  ;;  %v7850_v59 = vcombine.high %v2685_v39, %v2689_v19  ;;  %v7849_v58 = vcombine.low %v2685_v39, %v2689_v19 }
 0x42e   :  { %v6237_v60 = vmax.f32 %v9048_v6, 0.0  ;;  %v9051_v61 = vadd.f32 %v5710_v49, %v5668_v43  ;;  %5976 = vmatpush1.bf16.msra.mxu0 %v7881_v37  ;;  %v7978_v10 = vcombine.high %v2813_v23, %v2817_v24  ;;  %v2681_v34 = vld [vmem:[#allocation2 + $0x830] sm:$0xff]  ;;  %v7977_v0 = vcombine.low %v2813_v23, %v2817_v24 }
 0x42f   :  { %5977 = vmatprep.subr.bf16.mxu0 %v7874_v63  ;;  %v2805_v37 = vld [vmem:[#allocation2 + $0xc10] sm:$0xff]  ;;  %v7842_v22 = vcombine.high %v2677_v25, %v2681_v34 }
 0x430   :  { %6019 = vmatpush1.bf16.msra.mxu1 %v8009_v44  ;;  %v6238_v17 = vmax.f32 %v9051_v61, 0.0  ;;  %v7970_v27 = vcombine.high %v2805_v37, %v2809_v53  ;;  %v2797_v42 = vld [vmem:[#allocation2 + $0xbd0] sm:$0xff]  ;;  %v7969_v36 = vcombine.low %v2805_v37, %v2809_v53 }
 0x431   :  { %6020 = vmatprep.subr.bf16.mxu1 %v8002_v28  ;;  %v2801_v44 = vld [vmem:[#allocation2 + $0xbf0] sm:$0xff]  ;;  %v7841_v28 = vcombine.low %v2677_v25, %v2681_v34 }
 0x432   :  { %5978 = vmatpush1.bf16.msra.mxu0 %v7873_v62  ;;  %v2925_v63 = vld [vmem:[#allocation2 + $0xfd0] sm:$0xff]  ;;  %v7962_v45 = vcombine.high %v2797_v42, %v2801_v44 }
 0x433   :  { %5979 = vmatprep.subr.bf16.mxu0 %v7866_v1  ;;  %v2929_v43 = vld [vmem:[#allocation2 + $0xff0] sm:$0xff]  ;;  %v7961_v1 = vcombine.low %v2797_v42, %v2801_v44 }
 0x434   :  { %6021 = vmatpush1.bf16.msra.mxu1 %v8001_v8  ;;  %v8090_v49 = vcombine.high %v2925_v63, %v2929_v43  ;;  %v2789_v55 = vld [vmem:[#allocation2 + $0xb90] sm:$0xff] }
 0x435   :  { %6022 = vmatprep.subr.bf16.mxu1 %v7994_v14  ;;  %v2793_v56 = vld [vmem:[#allocation2 + $0xbb0] sm:$0xff]  ;;  %v8089_v14 = vcombine.low %v2925_v63, %v2929_v43 }
 0x436   :  { %5980 = vmatpush1.bf16.msra.mxu0 %v7865_v38  ;;  %v2917_v62 = vld [vmem:[#allocation2 + $0xf90] sm:$0xff]  ;;  %v7954_v13 = vcombine.high %v2789_v55, %v2793_v56 }
 0x437   :  { %5981 = vmatprep.subr.bf16.mxu0 %v7858_v15  ;;  %v2921_v8 = vld [vmem:[#allocation2 + $0xfb0] sm:$0xff]  ;;  %v7953_v15 = vcombine.low %v2789_v55, %v2793_v56 }
 0x438   :  { %6023 = vmatpush1.bf16.msra.mxu1 %v7993_v33  ;;  %v8082_v2 = vcombine.high %v2917_v62, %v2921_v8  ;;  %v2781_v30 = vld [vmem:[#allocation2 + $0xb50] sm:$0xff] }
 0x439   :  { %6024 = vmatprep.subr.bf16.mxu1 %v7986_v18  ;;  %v2785_v11 = vld [vmem:[#allocation2 + $0xb70] sm:$0xff]  ;;  %v8081_v18 = vcombine.low %v2917_v62, %v2921_v8 }
 0x43a   :  { %5982 = vmatpush1.bf16.msra.mxu0 %v7857_v31  ;;  %v2909_v38 = vld [vmem:[#allocation2 + $0xf50] sm:$0xff]  ;;  %v7946_v39 = vcombine.high %v2781_v30, %v2785_v11 }
 0x43b   :  { %5983 = vmatprep.subr.bf16.mxu0 %v7850_v59  ;;  %v2913_v33 = vld [vmem:[#allocation2 + $0xf70] sm:$0xff]  ;;  %v7945_v59 = vcombine.low %v2781_v30, %v2785_v11 }
 0x43c   :  { %6025 = vmatpush1.bf16.msra.mxu1 %v7985_v35  ;;  %v8074_v19 = vcombine.high %v2909_v38, %v2913_v33  ;;  %v2773_v23 = vld [vmem:[#allocation2 + $0xb10] sm:$0xff] }
 0x43d   :  { %6026 = vmatprep.subr.bf16.mxu1 %v7978_v10  ;;  %v2777_v24 = vld [vmem:[#allocation2 + $0xb30] sm:$0xff]  ;;  %v8073_v10 = vcombine.low %v2909_v38, %v2913_v33 }
 0x43e   :  { %5984 = vmatpush1.bf16.msra.mxu0 %v7849_v58  ;;  %v2901_v31 = vld [vmem:[#allocation2 + $0xf10] sm:$0xff]  ;;  %v7938_v25 = vcombine.high %v2773_v23, %v2777_v24 }
 0x43f   :  { %5985 = vmatprep.subr.bf16.mxu0 %v7842_v22  ;;  %v2905_v35 = vld [vmem:[#allocation2 + $0xf30] sm:$0xff]  ;;  %v7937_v22 = vcombine.low %v2773_v23, %v2777_v24 }
 0x440   :  { %6027 = vmatpush1.bf16.msra.mxu1 %v7977_v0  ;;  %v8066_v34 = vcombine.high %v2901_v31, %v2905_v35  ;;  %v2765_v37 = vld [vmem:[#allocation2 + $0xad0] sm:$0xff] }
 0x441   :  { %6028 = vmatprep.subr.bf16.mxu1 %v7970_v27  ;;  %v2769_v53 = vld [vmem:[#allocation2 + $0xaf0] sm:$0xff]  ;;  %v8065_v27 = vcombine.low %v2901_v31, %v2905_v35  ;;  %v2478_v31 = vld [vmem:[#allocation2 + $0x1d8] sm:$0xff] }
 0x442   :  { %5986 = vmatpush1.bf16.msra.mxu0 %v7841_v28  ;;  %v2893_v58 = vld [vmem:[#allocation2 + $0xed0] sm:$0xff]  ;;  %v7930_v42 = vcombine.high %v2765_v37, %v2769_v53  ;;  %v2482_v35 = vld [vmem:[#allocation2 + $0x1f8] sm:$0xff] }
 0x443   :  { %5987 = vmatprep.subr.bf16.mxu0 %v7962_v45  ;;  %v2897_v0 = vld [vmem:[#allocation2 + $0xef0] sm:$0xff]  ;;  %v7929_v45 = vcombine.low %v2765_v37, %v2769_v53  ;;  %v7644_v37 = vcombine.high %v2478_v31, %v2482_v35 }
 0x444   :  { %6029 = vmatpush1.bf16.msra.mxu1 %v7969_v36  ;;  %v8058_v44 = vcombine.high %v2893_v58, %v2897_v0  ;;  %v2757_v63 = vld [vmem:[#allocation2 + $0xa90] sm:$0xff] }
 0x445   :  { %6030 = vmatprep.subr.bf16.mxu1 %v8090_v49  ;;  %v2761_v43 = vld [vmem:[#allocation2 + $0xab0] sm:$0xff]  ;;  %v8057_v49 = vcombine.low %v2893_v58, %v2897_v0  ;;  %v2470_v58 = vld [vmem:[#allocation2 + $0x198] sm:$0xff] }
 0x446   :  { %5988 = vmatpush2.bf16.msra.mxu0 %v7961_v1  ;;  %v2885_v28 = vld [vmem:[#allocation2 + $0xe90] sm:$0xff]  ;;  %v7922_v55 = vcombine.high %v2757_v63, %v2761_v43  ;;  %v2474_v0 = vld [vmem:[#allocation2 + $0x1b8] sm:$0xff] }
 0x447   :  { %5989 = vmatprep.subr.bf16.mxu0 %v7954_v13  ;;  %v2889_v36 = vld [vmem:[#allocation2 + $0xeb0] sm:$0xff]  ;;  %v7921_v13 = vcombine.low %v2757_v63, %v2761_v43  ;;  %v7636_v63 = vcombine.high %v2470_v58, %v2474_v0 }
 0x448   :  { %6031 = vmatpush2.bf16.msra.mxu1 %v8089_v14  ;;  %v8050_v56 = vcombine.high %v2885_v28, %v2889_v36  ;;  %v2749_v62 = vld [vmem:[#allocation2 + $0xa50] sm:$0xff] }
 0x449   :  { %6032 = vmatprep.subr.bf16.mxu1 %v8082_v2  ;;  %v2753_v8 = vld [vmem:[#allocation2 + $0xa70] sm:$0xff]  ;;  %v8049_v2 = vcombine.low %v2885_v28, %v2889_v36  ;;  %v2462_v28 = vld [vmem:[#allocation2 + $0x158] sm:$0xff] }
 0x44a   :  { %5990 = vmatpush2.bf16.msra.mxu0 %v7953_v15  ;;  %v2877_v1 = vld [vmem:[#allocation2 + $0xe50] sm:$0xff]  ;;  %v7914_v30 = vcombine.high %v2749_v62, %v2753_v8  ;;  %v2466_v36 = vld [vmem:[#allocation2 + $0x178] sm:$0xff] }
 0x44b   :  { %5991 = vmatprep.subr.bf16.mxu0 %v7946_v39  ;;  %v2881_v14 = vld [vmem:[#allocation2 + $0xe70] sm:$0xff]  ;;  %v7913_v39 = vcombine.low %v2749_v62, %v2753_v8  ;;  %v7628_v62 = vcombine.high %v2462_v28, %v2466_v36 }
 0x44c   :  { %6033 = vmatpush2.bf16.msra.mxu1 %v8081_v18  ;;  %v8042_v11 = vcombine.high %v2877_v1, %v2881_v14  ;;  %v2741_v38 = vld [vmem:[#allocation2 + $0xa10] sm:$0xff] }
 0x44d   :  { %6034 = vmatprep.subr.bf16.mxu1 %v8074_v19  ;;  %v2745_v33 = vld [vmem:[#allocation2 + $0xa30] sm:$0xff]  ;;  %v8041_v19 = vcombine.low %v2877_v1, %v2881_v14  ;;  %v2454_v1 = vld [vmem:[#allocation2 + $0x118] sm:$0xff] }
 0x44e   :  { %5992 = vmatpush2.bf16.msra.mxu0 %v7945_v59  ;;  %v2869_v15 = vld [vmem:[#allocation2 + $0xe10] sm:$0xff]  ;;  %v7906_v23 = vcombine.high %v2741_v38, %v2745_v33  ;;  %v2606_v59 = vld [vmem:[#allocation2 + $0x5d8] sm:$0xff] }
 0x44f   :  { %5993 = vmatprep.subr.bf16.mxu0 %v7938_v25  ;;  %v2873_v18 = vld [vmem:[#allocation2 + $0xe30] sm:$0xff]  ;;  %v7905_v25 = vcombine.low %v2741_v38, %v2745_v33  ;;  %v2458_v14 = vld [vmem:[#allocation2 + $0x138] sm:$0xff] }
 0x450   :  { %6035 = vmatpush2.bf16.msra.mxu1 %v8073_v10  ;;  %v8034_v24 = vcombine.high %v2869_v15, %v2873_v18  ;;  %v2610_v10 = vld [vmem:[#allocation2 + $0x5f8] sm:$0xff]  ;;  %v7620_v38 = vcombine.high %v2454_v1, %v2458_v14 }
 0x451   :  { %6036 = vmatprep.subr.bf16.mxu1 %v8066_v34  ;;  %v8033_v34 = vcombine.low %v2869_v15, %v2873_v18  ;;  %v7772_v53 = vcombine.high %v2606_v59, %v2610_v10  ;;  %v2446_v15 = vld [vmem:[#allocation2 + $0xd8] sm:$0xff] }
 0x452   :  { %5994 = vmatpush2.bf16.msra.mxu0 %v7937_v22  ;;  %v2598_v22 = vld [vmem:[#allocation2 + $0x598] sm:$0xff] }
 0x453   :  { %5995 = vmatprep.subr.bf16.mxu0 %v7930_v42  ;;  %v7643_v42 = vcombine.low %v2478_v31, %v2482_v35  ;;  %v2450_v18 = vld [vmem:[#allocation2 + $0xf8] sm:$0xff] }
 0x454   :  { %6037 = vmatpush2.bf16.msra.mxu1 %v8065_v27  ;;  %v2602_v27 = vld [vmem:[#allocation2 + $0x5b8] sm:$0xff] }
 0x455   :  { %6038 = vmatprep.subr.bf16.mxu1 %v8058_v44  ;;  %v7771_v44 = vcombine.low %v2606_v59, %v2610_v10  ;;  %v7764_v43 = vcombine.high %v2598_v22, %v2602_v27  ;;  %v2438_v31 = vld [vmem:[#allocation2 + $0x98] sm:$0xff] }
 0x456   :  { %5996 = vmatpush2.bf16.msra.mxu0 %v7929_v45  ;;  %v2590_v45 = vld [vmem:[#allocation2 + $0x558] sm:$0xff] }
 0x457   :  { %5997 = vmatprep.subr.bf16.mxu0 %v7922_v55  ;;  %v7635_v55 = vcombine.low %v2470_v58, %v2474_v0  ;;  %v2442_v35 = vld [vmem:[#allocation2 + $0xb8] sm:$0xff] }
 0x458   :  { %6039 = vmatpush2.bf16.msra.mxu1 %v8057_v49  ;;  %v2594_v49 = vld [vmem:[#allocation2 + $0x578] sm:$0xff] }
 0x459   :  { %6040 = vmatprep.subr.bf16.mxu1 %v8050_v56  ;;  %v7763_v56 = vcombine.low %v2598_v22, %v2602_v27  ;;  %v7756_v8 = vcombine.high %v2590_v45, %v2594_v49  ;;  %v2566_v59 = vld [vmem:[#allocation2 + $0x498] sm:$0xff] }
 0x45a   :  { %5998 = vmatpush2.bf16.msra.mxu0 %v7921_v13  ;;  %v2582_v13 = vld [vmem:[#allocation2 + $0x518] sm:$0xff] }
 0x45b   :  { %5999 = vmatprep.subr.bf16.mxu0 %v7914_v30  ;;  %v7627_v30 = vcombine.low %v2462_v28, %v2466_v36  ;;  %v2570_v10 = vld [vmem:[#allocation2 + $0x4b8] sm:$0xff] }
 0x45c   :  { %6041 = vmatpush2.bf16.msra.mxu1 %v8049_v2  ;;  %v2586_v2 = vld [vmem:[#allocation2 + $0x538] sm:$0xff] }
 0x45d   :  { %6042 = vmatprep.subr.bf16.mxu1 %v8042_v11  ;;  %v7755_v11 = vcombine.low %v2590_v45, %v2594_v49  ;;  %v7748_v33 = vcombine.high %v2582_v13, %v2586_v2  ;;  %v2430_v58 = vld [vmem:[#allocation2 + $0x58] sm:$0xff] }
 0x45e   :  { %6000 = vmatpush2.bf16.msra.mxu0 %v7913_v39  ;;  %v2574_v39 = vld [vmem:[#allocation2 + $0x4d8] sm:$0xff] }
 0x45f   :  { %6001 = vmatprep.subr.bf16.mxu0 %v7906_v23  ;;  %v7619_v23 = vcombine.low %v2454_v1, %v2458_v14  ;;  %v2434_v0 = vld [vmem:[#allocation2 + $0x78] sm:$0xff] }
 0x460   :  { %6043 = vmatpush2.bf16.msra.mxu1 %v8041_v19  ;;  %v2578_v19 = vld [vmem:[#allocation2 + $0x4f8] sm:$0xff] }
 0x461   :  { %6044 = vmatprep.subr.bf16.mxu1 %v8034_v24  ;;  %v7612_v24 = vcombine.high %v2446_v15, %v2450_v18  ;;  %v2558_v22 = vld [vmem:[#allocation2 + $0x458] sm:$0xff] }
 0x462   :  { %6002 = vmatpush2.bf16.msra.mxu0 %v7905_v25  ;;  %v7611_v25 = vcombine.low %v2446_v15, %v2450_v18  ;;  %v2562_v27 = vld [vmem:[#allocation2 + $0x478] sm:$0xff] }
 0x463   :  { %6057 = vmatprep.subr.bf16.mxu0 %v7644_v37  ;;  %v7604_v37 = vcombine.high %v2438_v31, %v2442_v35  ;;  %v2422_v28 = vld [vmem:[#allocation2 + $0x18] sm:$0xff] }
 0x464   :  { %6045 = vmatpush2.bf16.msra.mxu1 %v8033_v34  ;;  %v7739_v34 = vcombine.low %v2574_v39, %v2578_v19  ;;  %v2426_v36 = vld [vmem:[#allocation2 + $0x38] sm:$0xff] }
 0x465   :  { %6100 = vmatprep.subr.bf16.mxu1 %v7772_v53  ;;  %6004 = vmatmul.mubr.bf16.vlgmr.msra.gmra.mxu0 %v9012_v3  ;;  %v7732_v53 = vcombine.high %v2566_v59, %v2570_v10  ;;  %v2550_v45 = vld [vmem:[#allocation2 + $0x418] sm:$0xff] }
 0x466   :  { %6058 = vmatpush1.bf16.msra.mxu0 %v7643_v42  ;;  %6089 = vmatprep.mubr.bf16.mxu0 %v8970_v52  ;;  %v7747_v52 = vcombine.low %v2582_v13, %v2586_v2  ;;  %v7603_v42 = vcombine.low %v2438_v31, %v2442_v35  ;;  %v2554_v49 = vld [vmem:[#allocation2 + $0x438] sm:$0xff] }
 0x467   :  { %6047 = vmatmul.mubr.bf16.vlgmr.msra.gmra.mxu1 %v9018_v16  ;;  %6059 = vmatprep.subr.bf16.mxu0 %v7636_v63  ;;  %v7596_v63 = vcombine.high %v2430_v58, %v2434_v0  ;;  %v2542_v1 = vld [vmem:[#allocation2 + $0x3d8] sm:$0xff] }
 0x468   :  { %6101 = vmatpush1.bf16.msra.mxu1 %v7771_v44  ;;  %6132 = vmatprep.mubr.bf16.mxu1 %v8976_v54  ;;  %v7740_v54 = vcombine.high %v2574_v39, %v2578_v19  ;;  %v7731_v44 = vcombine.low %v2566_v59, %v2570_v10  ;;  %v2546_v14 = vld [vmem:[#allocation2 + $0x3f8] sm:$0xff] }
 0x469   :  { %6102 = vmatprep.subr.bf16.mxu1 %v7764_v43  ;;  %v7724_v43 = vcombine.high %v2558_v22, %v2562_v27  ;;  %v2670_v13 = vld [vmem:[#allocation2 + $0x7d8] sm:$0xff] }
 0x46a   :  { %6060 = vmatpush1.bf16.msra.mxu0 %v7635_v55  ;;  %v7595_v55 = vcombine.low %v2430_v58, %v2434_v0  ;;  %v2674_v2 = vld [vmem:[#allocation2 + $0x7f8] sm:$0xff] }
 0x46b   :  { %6061 = vmatprep.subr.bf16.mxu0 %v7628_v62  ;;  %v7588_v62 = vcombine.high %v2422_v28, %v2426_v36  ;;  %v2534_v15 = vld [vmem:[#allocation2 + $0x398] sm:$0xff] }
 0x46c   :  { %6103 = vmatpush1.bf16.msra.mxu1 %v7763_v56  ;;  %v7723_v56 = vcombine.low %v2558_v22, %v2562_v27  ;;  %v2538_v18 = vld [vmem:[#allocation2 + $0x3b8] sm:$0xff] }
 0x46d   :  { %6104 = vmatprep.subr.bf16.mxu1 %v7756_v8  ;;  %v7716_v8 = vcombine.high %v2550_v45, %v2554_v49  ;;  %v2662_v39 = vld [vmem:[#allocation2 + $0x798] sm:$0xff] }
 0x46e   :  { %6062 = vmatpush1.bf16.msra.mxu0 %v7627_v30  ;;  %v7587_v30 = vcombine.low %v2422_v28, %v2426_v36  ;;  %v2666_v19 = vld [vmem:[#allocation2 + $0x7b8] sm:$0xff] }
 0x46f   :  { %6063 = vmatprep.subr.bf16.mxu0 %v7620_v38  ;;  %v7708_v38 = vcombine.high %v2542_v1, %v2546_v14  ;;  %v2526_v31 = vld [vmem:[#allocation2 + $0x358] sm:$0xff] }
 0x470   :  { %6105 = vmatpush1.bf16.msra.mxu1 %v7755_v11  ;;  %v7715_v11 = vcombine.low %v2550_v45, %v2554_v49  ;;  %v2530_v35 = vld [vmem:[#allocation2 + $0x378] sm:$0xff] }
 0x471   :  { %6106 = vmatprep.subr.bf16.mxu1 %v7748_v33  ;;  %v7836_v33 = vcombine.high %v2670_v13, %v2674_v2  ;;  %v2654_v59 = vld [vmem:[#allocation2 + $0x758] sm:$0xff] }
 0x472   :  { %6064 = vmatpush1.bf16.msra.mxu0 %v7619_v23  ;;  %v7707_v23 = vcombine.low %v2542_v1, %v2546_v14  ;;  %v2658_v10 = vld [vmem:[#allocation2 + $0x778] sm:$0xff] }
 0x473   :  { %6065 = vmatprep.subr.bf16.mxu0 %v7612_v24  ;;  %v7700_v24 = vcombine.high %v2534_v15, %v2538_v18  ;;  %v2518_v58 = vld [vmem:[#allocation2 + $0x318] sm:$0xff] }
 0x474   :  { %6107 = vmatpush1.bf16.msra.mxu1 %v7747_v52  ;;  %v7835_v52 = vcombine.low %v2670_v13, %v2674_v2  ;;  %v2522_v0 = vld [vmem:[#allocation2 + $0x338] sm:$0xff] }
 0x475   :  { %6108 = vmatprep.subr.bf16.mxu1 %v7740_v54  ;;  %v7828_v54 = vcombine.high %v2662_v39, %v2666_v19  ;;  %v2646_v22 = vld [vmem:[#allocation2 + $0x718] sm:$0xff] }
 0x476   :  { %6066 = vmatpush1.bf16.msra.mxu0 %v7611_v25  ;;  %v7699_v25 = vcombine.low %v2534_v15, %v2538_v18  ;;  %v2650_v27 = vld [vmem:[#allocation2 + $0x738] sm:$0xff] }
 0x477   :  { %6067 = vmatprep.subr.bf16.mxu0 %v7604_v37  ;;  %v7692_v37 = vcombine.high %v2526_v31, %v2530_v35  ;;  %v2510_v28 = vld [vmem:[#allocation2 + $0x2d8] sm:$0xff] }
 0x478   :  { %6109 = vmatpush1.bf16.msra.mxu1 %v7739_v34  ;;  %v7827_v34 = vcombine.low %v2662_v39, %v2666_v19  ;;  %v2514_v36 = vld [vmem:[#allocation2 + $0x2f8] sm:$0xff] }
 0x479   :  { %6110 = vmatprep.subr.bf16.mxu1 %v7732_v53  ;;  %v7820_v53 = vcombine.high %v2654_v59, %v2658_v10  ;;  %v2638_v45 = vld [vmem:[#allocation2 + $0x6d8] sm:$0xff] }
 0x47a   :  { %6068 = vmatpush1.bf16.msra.mxu0 %v7603_v42  ;;  %v7691_v42 = vcombine.low %v2526_v31, %v2530_v35  ;;  %v2642_v49 = vld [vmem:[#allocation2 + $0x6f8] sm:$0xff]  ;;  %v5790_v31 = vpop.f32.mrf.mxu1 }
 0x47b   :  { %6069 = vmatprep.subr.bf16.mxu0 %v7596_v63  ;;  %v7684_v63 = vcombine.high %v2518_v58, %v2522_v0  ;;  %v2502_v1 = vld [vmem:[#allocation2 + $0x298] sm:$0xff] }
 0x47c   :  { %6111 = vmatpush1.bf16.msra.mxu1 %v7731_v44  ;;  %v7819_v44 = vcombine.low %v2654_v59, %v2658_v10  ;;  %v2506_v14 = vld [vmem:[#allocation2 + $0x2b8] sm:$0xff] }
 0x47d   :  { %6112 = vmatprep.subr.bf16.mxu1 %v7724_v43  ;;  %v7812_v43 = vcombine.high %v2646_v22, %v2650_v27  ;;  %v2630_v13 = vld [vmem:[#allocation2 + $0x698] sm:$0xff] }
 0x47e   :  { %6070 = vmatpush1.bf16.msra.mxu0 %v7595_v55  ;;  %v7683_v55 = vcombine.low %v2518_v58, %v2522_v0  ;;  %v2634_v2 = vld [vmem:[#allocation2 + $0x6b8] sm:$0xff] }
 0x47f   :  { %6071 = vmatprep.subr.bf16.mxu0 %v7588_v62  ;;  %v7676_v62 = vcombine.high %v2510_v28, %v2514_v36  ;;  %v2494_v15 = vld [vmem:[#allocation2 + $0x258] sm:$0xff] }
 0x480   :  { %6113 = vmatpush1.bf16.msra.mxu1 %v7723_v56  ;;  %v7811_v56 = vcombine.low %v2646_v22, %v2650_v27  ;;  %v2498_v18 = vld [vmem:[#allocation2 + $0x278] sm:$0xff]  ;;  %v2952_v22 = vrot.slane %v9032_v20, %v8850_v48  ;;  %v5792_v27 = vpop.f32.mrf.mxu1 }
 0x481   :  { %6114 = vmatprep.subr.bf16.mxu1 %v7716_v8  ;;  %v7804_v8 = vcombine.high %v2638_v45, %v2642_v49  ;;  %v2622_v39 = vld [vmem:[#allocation2 + $0x658] sm:$0xff] }
 0x482   :  { %6072 = vmatpush1.bf16.msra.mxu0 %v7587_v30  ;;  %v7675_v30 = vcombine.low %v2510_v28, %v2514_v36  ;;  %v2626_v19 = vld [vmem:[#allocation2 + $0x678] sm:$0xff]  ;;  %v2956_v36 = vrot.slane %v9032_v20, %v8856_v51 }
 0x483   :  { %6073 = vmatprep.subr.bf16.mxu0 %v7708_v38  ;;  %v7668_v38 = vcombine.high %v2502_v1, %v2506_v14  ;;  %v7788_v35 = vcombine.high %v2622_v39, %v2626_v19  ;;  %v2486_v59 = vld [vmem:[#allocation2 + $0x218] sm:$0xff]  ;;  %v7787_v58 = vcombine.low %v2622_v39, %v2626_v19 }
 0x484   :  { %6115 = vmatpush1.bf16.msra.mxu1 %v7715_v11  ;;  %v7803_v11 = vcombine.low %v2638_v45, %v2642_v49  ;;  %v2490_v10 = vld [vmem:[#allocation2 + $0x238] sm:$0xff] }
 0x485   :  { %6116 = vmatprep.subr.bf16.mxu1 %v7836_v33  ;;  %v7796_v33 = vcombine.high %v2630_v13, %v2634_v2  ;;  %v7652_v0 = vcombine.high %v2486_v59, %v2490_v10  ;;  %v2866_v28 = vld [vmem:[#allocation2 + $0xdf8] sm:$0xff]  ;;  %v7651_v45 = vcombine.low %v2486_v59, %v2490_v10 }
 0x486   :  { %6074 = vmatpush2.bf16.msra.mxu0 %v7707_v23  ;;  %v7667_v23 = vcombine.low %v2502_v1, %v2506_v14  ;;  %v2726_v14 = vld [vmem:[#allocation2 + $0x998] sm:$0xff] }
 0x487   :  { %6075 = vmatprep.subr.bf16.mxu0 %v7700_v24  ;;  %v7795_v24 = vcombine.low %v2630_v13, %v2634_v2  ;;  %v2730_v13 = vld [vmem:[#allocation2 + $0x9b8] sm:$0xff] }
 0x488   :  { %6117 = vmatpush2.bf16.msra.mxu1 %v7835_v52  ;;  %v5747_v52 = vpop.f32.mrf.mxu0  ;;  %v2854_v2 = vld [vmem:[#allocation2 + $0xd98] sm:$0xff]  ;;  %v7892_v20 = vcombine.high %v2726_v14, %v2730_v13  ;;  %v7891_v59 = vcombine.low %v2726_v14, %v2730_v13 }
 0x489   :  { %6118 = vmatprep.subr.bf16.mxu1 %v7828_v54  ;;  %v7660_v54 = vcombine.high %v2494_v15, %v2498_v18 }
 0x48a   :  { %6076 = vmatpush2.bf16.msra.mxu0 %v7699_v25  ;;  %v2614_v25 = vld [vmem:[#allocation2 + $0x618] sm:$0xff] }
 0x48b   :  { %6077 = vmatprep.subr.bf16.mxu0 %v7692_v37  ;;  %v7659_v37 = vcombine.low %v2494_v15, %v2498_v18  ;;  %v2718_v15 = vld [vmem:[#allocation2 + $0x958] sm:$0xff] }
 0x48c   :  { %6119 = vmatpush2.bf16.msra.mxu1 %v7827_v34  ;;  %v2618_v34 = vld [vmem:[#allocation2 + $0x638] sm:$0xff] }
 0x48d   :  { %6120 = vmatprep.subr.bf16.mxu1 %v7820_v53  ;;  %v5749_v53 = vpop.f32.mrf.mxu0 }
 0x48e   :  { %6078 = vmatpush2.bf16.msra.mxu0 %v7691_v42  ;;  %v7780_v42 = vcombine.high %v2614_v25, %v2618_v34 }
 0x48f   :  { %6079 = vmatprep.subr.bf16.mxu0 %v7684_v63  ;;  %v2738_v63 = vld [vmem:[#allocation2 + $0x9f8] sm:$0xff]  ;;  %v5751_v49 = vpop.f32.mrf.mxu0 }
 0x490   :  { %6121 = vmatpush2.bf16.msra.mxu1 %v7819_v44  ;;  %v2734_v44 = vld [vmem:[#allocation2 + $0x9d8] sm:$0xff]  ;;  %v5752_v39 = vadd.f32 %v5751_v49, %v2952_v22 }
 0x491   :  { %6122 = vmatprep.subr.bf16.mxu1 %v7812_v43  ;;  %v2862_v43 = vld [vmem:[#allocation2 + $0xdd8] sm:$0xff] }
 0x492   :  { %6080 = vmatpush2.bf16.msra.mxu0 %v7683_v55  ;;  %v7779_v55 = vcombine.low %v2614_v25, %v2618_v34  ;;  %v8028_v1 = vcombine.high %v2862_v43, %v2866_v28  ;;  %v8027_v51 = vcombine.low %v2862_v43, %v2866_v28 }
 0x493   :  { %6081 = vmatprep.subr.bf16.mxu0 %v7676_v62  ;;  %v5748_v62 = vadd.f32 %v5747_v52, %v2952_v22  ;;  %v2722_v52 = vld [vmem:[#allocation2 + $0x978] sm:$0xff] }
 0x494   :  { %6123 = vmatpush2.bf16.msra.mxu1 %v7811_v56  ;;  %v7900_v56 = vcombine.high %v2734_v44, %v2738_v63  ;;  %v7883_v28 = vcombine.low %v2718_v15, %v2722_v52 }
 0x495   :  { %6124 = vmatprep.subr.bf16.mxu1 %v7804_v8  ;;  %v5794_v8 = vpop.f32.mrf.mxu1  ;;  %v5791_v18 = vadd.f32 %v5790_v31, %v5748_v62 }
 0x496   :  { %6082 = vmatpush2.bf16.msra.mxu0 %v7675_v30  ;;  %v2858_v30 = vld [vmem:[#allocation2 + $0xdb8] sm:$0xff]  ;;  %v5795_v22 = vadd.f32 %v5794_v8, %v5752_v39 }
 0x497   :  { %6083 = vmatprep.subr.bf16.mxu0 %v7668_v38  ;;  %v7899_v38 = vcombine.low %v2734_v44, %v2738_v63  ;;  %v5796_v19 = vpop.f32.mrf.mxu1 }
 0x498   :  { %6125 = vmatpush2.bf16.msra.mxu1 %v7803_v11  ;;  %v5750_v11 = vadd.f32 %v5749_v53, %v2956_v36  ;;  %v8019_v53 = vcombine.low %v2854_v2, %v2858_v30 }
 0x499   :  { %6126 = vmatprep.subr.bf16.mxu1 %v7796_v33  ;;  %v5753_v33 = vpop.f32.mrf.mxu0 }
 0x49a   :  { %6084 = vmatpush2.bf16.msra.mxu0 %v7667_v23  ;;  %v8020_v23 = vcombine.high %v2854_v2, %v2858_v30  ;;  %v5793_v10 = vadd.f32 %v5792_v27, %v5750_v11  ;;  %v5754_v25 = vadd.f32 %v5753_v33, %v2956_v36  ;;  %v2714_v27 = vld [vmem:[#allocation2 + $0x938] sm:$0xff] }
 0x49b   :  { %6085 = vmatprep.subr.bf16.mxu0 %v7660_v54  ;;  %v2850_v54 = vld [vmem:[#allocation2 + $0xd78] sm:$0xff] }
 0x49c   :  { %6127 = vmatpush2.bf16.msra.mxu1 %v7795_v24  ;;  %v2846_v24 = vld [vmem:[#allocation2 + $0xd58] sm:$0xff] }
 0x49d   :  { %6128 = vmatprep.subr.bf16.mxu1 %v7788_v35  ;;  %v2842_v36 = vld [vmem:[#allocation2 + $0xd38] sm:$0xff] }
 0x49e   :  { %6086 = vmatpush2.bf16.msra.mxu0 %v7659_v37  ;;  %v2702_v30 = vld [vmem:[#allocation2 + $0x8d8] sm:$0xff] }
 0x49f   :  { %6087 = vmatprep.subr.bf16.mxu0 %v7652_v0  ;;  %v8012_v0 = vcombine.high %v2846_v24, %v2850_v54  ;;  %v2706_v11 = vld [vmem:[#allocation2 + $0x8f8] sm:$0xff] }
 0x4a0   :  { %6129 = vmatpush2.bf16.msra.mxu1 %v7787_v58  ;;  %v7884_v58 = vcombine.high %v2718_v15, %v2722_v52  ;;  %v2830_v33 = vld [vmem:[#allocation2 + $0xcd8] sm:$0xff] }
 0x4a1   :  { %6130 = vmatprep.subr.bf16.mxu1 %v7780_v42 }
 0x4a2   :  { %6088 = vmatpush2.bf16.msra.mxu0 %v7651_v45  ;;  %v5797_v45 = vadd.f32 %v5796_v19, %v5754_v25  ;;  %v7868_v19 = vcombine.high %v2702_v30, %v2706_v11 }
 0x4a3   :  { %6143 = vmatprep.subr.bf16.mxu0 %v7900_v56 }
 0x4a4   :  { %6131 = vmatpush2.bf16.msra.mxu1 %v7779_v55 }
 0x4a5   :  { %6186 = vmatprep.subr.bf16.mxu1 %v8028_v1  ;;  %v5833_v35 = vpop.f32.mrf.mxu0  ;;  %6090 = vmatmul.mubr.bf16.vlgmr.msra.gmra.mxu0 %v8984_v21  ;;  %v2710_v21 = vld [vmem:[#allocation2 + $0x918] sm:$0xff]  ;;  %v8011_v1 = vcombine.low %v2846_v24, %v2850_v54 }
 0x4a6   :  { %v5834_v34 = vadd.f32 %v5833_v35, %v5791_v18  ;;  %6144 = vmatpush1.bf16.msra.mxu0 %v7899_v38  ;;  %6175 = vmatprep.mubr.bf16.mxu0 %v8996_v7  ;;  %v7876_v14 = vcombine.high %v2710_v21, %v2714_v27  ;;  %v7875_v18 = vcombine.low %v2710_v21, %v2714_v27  ;;  %v2694_v24 = vld [vmem:[#allocation2 + $0x898] sm:$0xff] }
 0x4a7   :  { %v5876_v37 = vpop.f32.mrf.mxu1  ;;  %6133 = vmatmul.mubr.bf16.vlgmr.msra.gmra.mxu1 %v8990_v26  ;;  %v5835_v31 = vpop.f32.mrf.mxu0  ;;  %6145 = vmatprep.subr.bf16.mxu0 %v7892_v20  ;;  %v2838_v26 = vld [vmem:[#allocation2 + $0xd18] sm:$0xff] }
 0x4a8   :  { %6187 = vmatpush1.bf16.msra.mxu1 %v8027_v51  ;;  %v9064_v42 = vadd.f32 %v5876_v37, %v5834_v34  ;;  %v5836_v44 = vadd.f32 %v5835_v31, %v5793_v10  ;;  %6218 = vmatprep.mubr.bf16.mxu1 %v9003_v29  ;;  %v8004_v29 = vcombine.high %v2838_v26, %v2842_v36  ;;  %v2834_v51 = vld [vmem:[#allocation2 + $0xcf8] sm:$0xff] }
 0x4a9   :  { %v5878_v63 = vpop.f32.mrf.mxu1  ;;  %6188 = vmatprep.subr.bf16.mxu1 %v8020_v23  ;;  %v5837_v43 = vpop.f32.mrf.mxu0  ;;  %v8003_v39 = vcombine.low %v2838_v26, %v2842_v36  ;;  %v7996_v52 = vcombine.high %v2830_v33, %v2834_v51  ;;  %v2698_v54 = vld [vmem:[#allocation2 + $0x8b8] sm:$0xff]  ;;  %v7867_v10 = vcombine.low %v2702_v30, %v2706_v11  ;;  %v7995_v25 = vcombine.low %v2830_v33, %v2834_v51 }
 0x4aa   :  { %v6231_v49 = vmax.f32 %v9064_v42, 0.0  ;;  %v9069_v55 = vadd.f32 %v5878_v63, %v5836_v44  ;;  %v5838_v56 = vadd.f32 %v5837_v43, %v5795_v22  ;;  %6146 = vmatpush1.bf16.msra.mxu0 %v7891_v59  ;;  %v2822_v35 = vld [vmem:[#allocation2 + $0xc98] sm:$0xff]  ;;  %v7860_v34 = vcombine.high %v2694_v24, %v2698_v54 }
 0x4ab   :  { %v5880_v62 = vpop.f32.mrf.mxu1  ;;  %v5839_v8 = vpop.f32.mrf.mxu0  ;;  %6147 = vmatprep.subr.bf16.mxu0 %v7884_v58  ;;  %v2826_v59 = vld [vmem:[#allocation2 + $0xcb8] sm:$0xff]  ;;  %v7859_v22 = vcombine.low %v2694_v24, %v2698_v54 }
 0x4ac   :  { %6189 = vmatpush1.bf16.msra.mxu1 %v8019_v53  ;;  %v6232_v7 = vmax.f32 %v9069_v55, 0.0  ;;  %v9072_v13 = vadd.f32 %v5880_v62, %v5838_v56  ;;  %v5840_v2 = vadd.f32 %v5839_v8, %v5797_v45  ;;  %v7988_v37 = vcombine.high %v2822_v35, %v2826_v59  ;;  %v2686_v31 = vld [vmem:[#allocation2 + $0x858] sm:$0xff] }
 0x4ad   :  { %6190 = vmatprep.subr.bf16.mxu1 %v8012_v0  ;;  %v5882_v38 = vpop.f32.mrf.mxu1  ;;  %v2690_v53 = vld [vmem:[#allocation2 + $0x878] sm:$0xff]  ;;  %v7987_v44 = vcombine.low %v2822_v35, %v2826_v59 }
 0x4ae   :  { %v6239_v20 = vmax.f32 %v9072_v13, 0.0  ;;  %v9075_v15 = vadd.f32 %v5882_v38, %v5840_v2  ;;  %6148 = vmatpush1.bf16.msra.mxu0 %v7883_v28  ;;  %v2814_v58 = vld [vmem:[#allocation2 + $0xc58] sm:$0xff]  ;;  %v7852_v63 = vcombine.high %v2686_v31, %v2690_v53  ;;  %v7851_v36 = vcombine.low %v2686_v31, %v2690_v53 }
 0x4af   :  { %6149 = vmatprep.subr.bf16.mxu0 %v7876_v14  ;;  %v2818_v0 = vld [vmem:[#allocation2 + $0xc78] sm:$0xff] }
 0x4b0   :  { %6191 = vmatpush1.bf16.msra.mxu1 %v8011_v1  ;;  %v6240_v23 = vmax.f32 %v9075_v15, 0.0  ;;  %v7980_v21 = vcombine.high %v2814_v58, %v2818_v0  ;;  %v2678_v27 = vld [vmem:[#allocation2 + $0x818] sm:$0xff]  ;;  %v7979_v45 = vcombine.low %v2814_v58, %v2818_v0 }
 0x4b1   :  { %6192 = vmatprep.subr.bf16.mxu1 %v8004_v29  ;;  %v2682_v43 = vld [vmem:[#allocation2 + $0x838] sm:$0xff] }
 0x4b2   :  { %6150 = vmatpush1.bf16.msra.mxu0 %v7875_v18  ;;  %v2806_v28 = vld [vmem:[#allocation2 + $0xc18] sm:$0xff]  ;;  %v7844_v56 = vcombine.high %v2678_v27, %v2682_v43  ;;  %v7843_v29 = vcombine.low %v2678_v27, %v2682_v43 }
 0x4b3   :  { %6151 = vmatprep.subr.bf16.mxu0 %v7868_v19  ;;  %v2810_v26 = vld [vmem:[#allocation2 + $0xc38] sm:$0xff] }
 0x4b4   :  { %6193 = vmatpush1.bf16.msra.mxu1 %v8003_v39  ;;  %v7972_v62 = vcombine.high %v2806_v28, %v2810_v26  ;;  %v2798_v8 = vld [vmem:[#allocation2 + $0xbd8] sm:$0xff]  ;;  %v7971_v30 = vcombine.low %v2806_v28, %v2810_v26 }
 0x4b5   :  { %6194 = vmatprep.subr.bf16.mxu1 %v7996_v52  ;;  %v2802_v1 = vld [vmem:[#allocation2 + $0xbf8] sm:$0xff] }
 0x4b6   :  { %6152 = vmatpush1.bf16.msra.mxu0 %v7867_v10  ;;  %v2926_v14 = vld [vmem:[#allocation2 + $0xfd8] sm:$0xff]  ;;  %v7964_v11 = vcombine.high %v2798_v8, %v2802_v1  ;;  %v7963_v19 = vcombine.low %v2798_v8, %v2802_v1 }
 0x4b7   :  { %6153 = vmatprep.subr.bf16.mxu0 %v7860_v34  ;;  %v2930_v2 = vld [vmem:[#allocation2 + $0xff8] sm:$0xff] }
 0x4b8   :  { %6195 = vmatpush1.bf16.msra.mxu1 %v7995_v25  ;;  %v8092_v38 = vcombine.high %v2926_v14, %v2930_v2  ;;  %v2790_v33 = vld [vmem:[#allocation2 + $0xb98] sm:$0xff]  ;;  %v8091_v52 = vcombine.low %v2926_v14, %v2930_v2 }
 0x4b9   :  { %6196 = vmatprep.subr.bf16.mxu1 %v7988_v37  ;;  %v2794_v51 = vld [vmem:[#allocation2 + $0xbb8] sm:$0xff] }
 0x4ba   :  { %6154 = vmatpush1.bf16.msra.mxu0 %v7859_v22  ;;  %v2918_v18 = vld [vmem:[#allocation2 + $0xf98] sm:$0xff]  ;;  %v7956_v24 = vcombine.high %v2790_v33, %v2794_v51  ;;  %v7955_v34 = vcombine.low %v2790_v33, %v2794_v51 }
 0x4bb   :  { %6155 = vmatprep.subr.bf16.mxu0 %v7852_v63  ;;  %v2922_v39 = vld [vmem:[#allocation2 + $0xfb8] sm:$0xff] }
 0x4bc   :  { %6197 = vmatpush1.bf16.msra.mxu1 %v7987_v44  ;;  %v8084_v54 = vcombine.high %v2918_v18, %v2922_v39  ;;  %v2782_v35 = vld [vmem:[#allocation2 + $0xb58] sm:$0xff]  ;;  %v8083_v37 = vcombine.low %v2918_v18, %v2922_v39 }
 0x4bd   :  { %6198 = vmatprep.subr.bf16.mxu1 %v7980_v21  ;;  %v2786_v59 = vld [vmem:[#allocation2 + $0xb78] sm:$0xff] }
 0x4be   :  { %6156 = vmatpush1.bf16.msra.mxu0 %v7851_v36  ;;  %v2910_v10 = vld [vmem:[#allocation2 + $0xf58] sm:$0xff]  ;;  %v7948_v31 = vcombine.high %v2782_v35, %v2786_v59  ;;  %v7947_v63 = vcombine.low %v2782_v35, %v2786_v59 }
 0x4bf   :  { %6157 = vmatprep.subr.bf16.mxu0 %v7844_v56  ;;  %v2914_v25 = vld [vmem:[#allocation2 + $0xf78] sm:$0xff] }
 0x4c0   :  { %6199 = vmatpush1.bf16.msra.mxu1 %v7979_v45  ;;  %v8076_v53 = vcombine.high %v2910_v10, %v2914_v25  ;;  %v2774_v58 = vld [vmem:[#allocation2 + $0xb18] sm:$0xff]  ;;  %v8075_v21 = vcombine.low %v2910_v10, %v2914_v25 }
 0x4c1   :  { %6200 = vmatprep.subr.bf16.mxu1 %v7972_v62  ;;  %v2778_v0 = vld [vmem:[#allocation2 + $0xb38] sm:$0xff] }
 0x4c2   :  { %6158 = vmatpush1.bf16.msra.mxu0 %v7843_v29  ;;  %v2902_v22 = vld [vmem:[#allocation2 + $0xf18] sm:$0xff]  ;;  %v7940_v27 = vcombine.high %v2774_v58, %v2778_v0  ;;  %v7939_v56 = vcombine.low %v2774_v58, %v2778_v0 }
 0x4c3   :  { %6159 = vmatprep.subr.bf16.mxu0 %v7964_v11  ;;  %v2906_v44 = vld [vmem:[#allocation2 + $0xf38] sm:$0xff] }
 0x4c4   :  { %6201 = vmatpush1.bf16.msra.mxu1 %v7971_v30  ;;  %v8068_v43 = vcombine.high %v2902_v22, %v2906_v44  ;;  %v2766_v28 = vld [vmem:[#allocation2 + $0xad8] sm:$0xff]  ;;  %v8067_v62 = vcombine.low %v2902_v22, %v2906_v44 }
 0x4c5   :  { %6202 = vmatprep.subr.bf16.mxu1 %v8092_v38  ;;  %v2770_v26 = vld [vmem:[#allocation2 + $0xaf8] sm:$0xff] }
 0x4c6   :  { %6160 = vmatpush2.bf16.msra.mxu0 %v7963_v19  ;;  %v2894_v36 = vld [vmem:[#allocation2 + $0xed8] sm:$0xff]  ;;  %v7932_v8 = vcombine.high %v2766_v28, %v2770_v26  ;;  %v7931_v11 = vcombine.low %v2766_v28, %v2770_v26 }
 0x4c7   :  { %6161 = vmatprep.subr.bf16.mxu0 %v7956_v24  ;;  %v2898_v45 = vld [vmem:[#allocation2 + $0xef8] sm:$0xff] }
 0x4c8   :  { %6203 = vmatpush2.bf16.msra.mxu1 %v8091_v52  ;;  %v8060_v1 = vcombine.high %v2894_v36, %v2898_v45  ;;  %v2758_v14 = vld [vmem:[#allocation2 + $0xa98] sm:$0xff]  ;;  %v8059_v38 = vcombine.low %v2894_v36, %v2898_v45 }
 0x4c9   :  { %6204 = vmatprep.subr.bf16.mxu1 %v8084_v54  ;;  %v2762_v2 = vld [vmem:[#allocation2 + $0xab8] sm:$0xff] }
 0x4ca   :  { %6162 = vmatpush2.bf16.msra.mxu0 %v7955_v34  ;;  %v2886_v29 = vld [vmem:[#allocation2 + $0xe98] sm:$0xff]  ;;  %v7924_v33 = vcombine.high %v2758_v14, %v2762_v2  ;;  %v7923_v24 = vcombine.low %v2758_v14, %v2762_v2 }
 0x4cb   :  { %6163 = vmatprep.subr.bf16.mxu0 %v7948_v31  ;;  %v2890_v30 = vld [vmem:[#allocation2 + $0xeb8] sm:$0xff] }
 0x4cc   :  { %6205 = vmatpush2.bf16.msra.mxu1 %v8083_v37  ;;  %v8052_v51 = vcombine.high %v2886_v29, %v2890_v30  ;;  %v2750_v18 = vld [vmem:[#allocation2 + $0xa58] sm:$0xff]  ;;  %v8051_v54 = vcombine.low %v2886_v29, %v2890_v30 }
 0x4cd   :  { %6206 = vmatprep.subr.bf16.mxu1 %v8076_v53  ;;  %v2754_v39 = vld [vmem:[#allocation2 + $0xa78] sm:$0xff] }
 0x4ce   :  { %6164 = vmatpush2.bf16.msra.mxu0 %v7947_v63  ;;  %v2878_v19 = vld [vmem:[#allocation2 + $0xe58] sm:$0xff]  ;;  %v7916_v35 = vcombine.high %v2750_v18, %v2754_v39  ;;  %v7915_v31 = vcombine.low %v2750_v18, %v2754_v39 }
 0x4cf   :  { %6165 = vmatprep.subr.bf16.mxu0 %v7940_v27  ;;  %v2882_v52 = vld [vmem:[#allocation2 + $0xe78] sm:$0xff] }
 0x4d0   :  { %6207 = vmatpush2.bf16.msra.mxu1 %v8075_v21  ;;  %v8044_v59 = vcombine.high %v2878_v19, %v2882_v52  ;;  %v2742_v10 = vld [vmem:[#allocation2 + $0xa18] sm:$0xff]  ;;  %v8043_v53 = vcombine.low %v2878_v19, %v2882_v52 }
 0x4d1   :  { %6208 = vmatprep.subr.bf16.mxu1 %v8068_v43  ;;  %v2746_v25 = vld [vmem:[#allocation2 + $0xa38] sm:$0xff] }
 0x4d2   :  { %6166 = vmatpush2.bf16.msra.mxu0 %v7939_v56  ;;  %v2870_v34 = vld [vmem:[#allocation2 + $0xe18] sm:$0xff]  ;;  %v7908_v58 = vcombine.high %v2742_v10, %v2746_v25  ;;  %v7907_v22 = vcombine.low %v2742_v10, %v2746_v25 }
 0x4d3   :  { %6167 = vmatprep.subr.bf16.mxu0 %v7932_v8  ;;  %v2874_v37 = vld [vmem:[#allocation2 + $0xe38] sm:$0xff] }
 0x4d4   :  { %6209 = vmatpush2.bf16.msra.mxu1 %v8067_v62  ;;  %v8036_v0 = vcombine.high %v2870_v34, %v2874_v37  ;;  %v8035_v44 = vcombine.low %v2870_v34, %v2874_v37  ;;  %v8290_v43 = vld [vmem:[#allocation15] sm:$0xff] }
 0x4d5   :  { %6210 = vmatprep.subr.bf16.mxu1 %v8060_v1  ;;  %v2960_v28 = vrot.slane %v8290_v43, %v753_v40  ;;  %v2964_v36 = vrot.slane %v8290_v43, %v757_v41 }
 0x4d6   :  { %6168 = vmatpush2.bf16.msra.mxu0 %v7931_v11 }
 0x4d7   :  { %6169 = vmatprep.subr.bf16.mxu0 %v7924_v33 }
 0x4d8   :  { %6211 = vmatpush2.bf16.msra.mxu1 %v8059_v38 }
 0x4d9   :  { %6212 = vmatprep.subr.bf16.mxu1 %v8052_v51 }
 0x4da   :  { %6170 = vmatpush2.bf16.msra.mxu0 %v7923_v24 }
 0x4db   :  { %6171 = vmatprep.subr.bf16.mxu0 %v7916_v35 }
 0x4dc   :  { %6213 = vmatpush2.bf16.msra.mxu1 %v8051_v54 }
 0x4dd   :  { %6214 = vmatprep.subr.bf16.mxu1 %v8044_v59 }
 0x4de   :  { %6172 = vmatpush2.bf16.msra.mxu0 %v7915_v31 }
 0x4df   :  { %6173 = vmatprep.subr.bf16.mxu0 %v7908_v58 }
 0x4e0   :  { %6215 = vmatpush2.bf16.msra.mxu1 %v8043_v53 }
 0x4e1   :  { %6216 = vmatprep.subr.bf16.mxu1 %v8036_v0 }
 0x4e2   :  { %6174 = vmatpush2.bf16.msra.mxu0 %v7907_v22 }
 0x4e4   :  { %6217 = vmatpush2.bf16.msra.mxu1 %v8035_v44 }
 0x4e5   :  { %6176 = vmatmul.mubr.bf16.vlgmr.msra.gmra.mxu0 %v9012_v3  ;;  %v5919_v63 = vpop.f32.mrf.mxu0 }
 0x4e6   :  { %v5920_v56 = vadd.f32 %v5919_v63, %v2960_v28  ;;  %v2968_v63 = vrot.slane %v8290_v43, %v761_v9 }
 0x4e7   :  { %6219 = vmatmul.mubr.bf16.vlgmr.msra.gmra.mxu1 %v9018_v16  ;;  %v5962_v21 = vpop.f32.mrf.mxu1  ;;  %v5921_v27 = vpop.f32.mrf.mxu0 }
 0x4e8   :  { %v5922_v8 = vadd.f32 %v5921_v27, %v2964_v36  ;;  %v5963_v14 = vadd.f32 %v5962_v21, %v5920_v56  ;;  %v2972_v27 = vrot.slane %v8290_v43, %v765_v12 }
 0x4e9   :  { %v5964_v26 = vpop.f32.mrf.mxu1  ;;  %v5923_v45 = vpop.f32.mrf.mxu0 }
 0x4ea   :  { %v5924_v3 = vadd.f32 %v5923_v45, %v2960_v28  ;;  %v5965_v29 = vadd.f32 %v5964_v26, %v5922_v8 }
 0x4eb   :  { %v5966_v62 = vpop.f32.mrf.mxu1  ;;  %v5925_v1 = vpop.f32.mrf.mxu0 }
 0x4ec   :  { %v5926_v30 = vadd.f32 %v5925_v1, %v2964_v36  ;;  %v5967_v51 = vadd.f32 %v5966_v62, %v5924_v3 }
 0x4ed   :  { %v5968_v2 = vpop.f32.mrf.mxu1 }
 0x4ee   :  { %v5969_v19 = vadd.f32 %v5968_v2, %v5926_v30 }
 0x525   :  { %v6005_v16 = vpop.f32.mrf.mxu0 }
 0x526   :  { %v6006_v11 = vadd.f32 %v6005_v16, %v5963_v14 }
 0x527   :  { %v6048_v38 = vpop.f32.mrf.mxu1  ;;  %v6007_v33 = vpop.f32.mrf.mxu0 }
 0x528   :  { %v9084_v40 = vadd.f32 %v6048_v38, %v6006_v11  ;;  %v6008_v18 = vadd.f32 %v6007_v33, %v5965_v29 }
 0x529   :  { %v6050_v39 = vpop.f32.mrf.mxu1  ;;  %v6009_v41 = vpop.f32.mrf.mxu0 }
 0x52a   :  { %v6233_v52 = vmax.f32 %v9084_v40, 0.0  ;;  %v9087_v24 = vadd.f32 %v6050_v39, %v6008_v18  ;;  %v6010_v54 = vadd.f32 %v6009_v41, %v5967_v51 }
 0x52b   :  { %v6052_v35 = vpop.f32.mrf.mxu1  ;;  %v6011_v59 = vpop.f32.mrf.mxu0 }
 0x52c   :  { %v6234_v10 = vmax.f32 %v9087_v24, 0.0  ;;  %v9090_v25 = vadd.f32 %v6052_v35, %v6010_v54  ;;  %v6012_v34 = vadd.f32 %v6011_v59, %v5969_v19 }
 0x52d   :  { %v6054_v37 = vpop.f32.mrf.mxu1 }
 0x52e   :  { %v6241_v31 = vmax.f32 %v9090_v25, 0.0  ;;  %v9093_v53 = vadd.f32 %v6054_v37, %v6012_v34 }
 0x530   :  { %v6242_v58 = vmax.f32 %v9093_v53, 0.0 }
 0x565   :  { %v6091_v0 = vpop.f32.mrf.mxu0 }
 0x566   :  { %v6092_v26 = vadd.f32 %v6091_v0, %v2968_v63 }
 0x567   :  { %v6134_v22 = vpop.f32.mrf.mxu1  ;;  %v6093_v44 = vpop.f32.mrf.mxu0 }
 0x568   :  { %v6094_v45 = vadd.f32 %v6093_v44, %v2972_v27  ;;  %v6135_v62 = vadd.f32 %v6134_v22, %v6092_v26 }
 0x569   :  { %v6136_v21 = vpop.f32.mrf.mxu1  ;;  %v6095_v28 = vpop.f32.mrf.mxu0 }
 0x56a   :  { %v6096_v8 = vadd.f32 %v6095_v28, %v2968_v63  ;;  %v6137_v3 = vadd.f32 %v6136_v21, %v6094_v45 }
 0x56b   :  { %v6138_v36 = vpop.f32.mrf.mxu1  ;;  %v6097_v56 = vpop.f32.mrf.mxu0 }
 0x56c   :  { %v6098_v2 = vadd.f32 %v6097_v56, %v2972_v27  ;;  %v6139_v11 = vadd.f32 %v6138_v36, %v6096_v8 }
 0x56d   :  { %v6140_v1 = vpop.f32.mrf.mxu1 }
 0x56e   :  { %v6141_v43 = vadd.f32 %v6140_v1, %v6098_v2 }
 0x5a5   :  { %v6177_v14 = vpop.f32.mrf.mxu0 }
 0x5a6   :  { %v6178_v16 = vadd.f32 %v6177_v14, %v6135_v62 }
 0x5a7   :  { %v6220_v29 = vpop.f32.mrf.mxu1  ;;  %v6179_v30 = vpop.f32.mrf.mxu0 }
 0x5a8   :  { %v9100_v9 = vadd.f32 %v6220_v29, %v6178_v16  ;;  %v6180_v38 = vadd.f32 %v6179_v30, %v6137_v3 }
 0x5a9   :  { %v6222_v46 = vpop.f32.mrf.mxu1  ;;  %v6181_v12 = vpop.f32.mrf.mxu0 }
 0x5aa   :  { %v6235_v33 = vmax.f32 %v9100_v9, 0.0  ;;  %v9103_v51 = vadd.f32 %v6222_v46, %v6180_v38  ;;  %v6182_v18 = vadd.f32 %v6181_v12, %v6139_v11 }
 0x5ab   :  { %v6224_v39 = vpop.f32.mrf.mxu1  ;;  %v6183_v41 = vpop.f32.mrf.mxu0 }
 0x5ac   :  { %v6236_v19 = vmax.f32 %v9103_v51, 0.0  ;;  %v9106_v54 = vadd.f32 %v6224_v39, %v6182_v18  ;;  %v6184_v35 = vadd.f32 %v6183_v41, %v6141_v43 }
 0x5ad   :  { %v6226_v59 = vpop.f32.mrf.mxu1 }
 0x5ae   :  { %v6243_v34 = vmax.f32 %v9106_v54, 0.0  ;;  %v9109_v37 = vadd.f32 %v6226_v59, %v6184_v35 }
 0x5b0   :  { %v6244_v0 = vmax.f32 %v9109_v37, 0.0 }
 0x5b1   :  { %8715 = dma.done.wait [#allocation4 + $0x1], 16384 }
 0x5b2   :  { %8716 = vsyncadd [#allocation4 + $0x1], 4294950912  ;;  %v6377_v22 = vpack.c.bf16 %v6238_v17, %v6230_v5  ;;  %v6379_v44 = vpack.c.bf16 %v6240_v23, %v6232_v7  ;;  %v8291_v63 = vld [vmem:[#allocation3 + $0x74] ss:$8 sps:$4 sm:$0xff]   ;;  %v8295_v27 = vld [vmem:[#allocation3 + $0x70] ss:$8 sps:$4 sm:$0xff]   ;;  %v6381_v32 = vpack.c.bf16 %v6242_v58, %v6234_v10 }
 0x5b3   :  { %v8293_v21 = vld [vmem:[#allocation3 + $0x174] ss:$8 sps:$4 sm:$0xff]   ;;  %7036 = vmatprep.subr.bf16.mxu0 %v8291_v63  ;;  %v8296_v28 = vld [vmem:[#allocation3 + $0x170] ss:$8 sps:$4 sm:$0xff]   ;;  %v8297_v26 = vld [vmem:[#allocation3 + $0x64] ss:$8 sps:$4 sm:$0xff]  }
 0x5b4   :  { %7068 = vmatprep.mubr.bf16.mxu0 %v6377_v22  ;;  %7111 = vmatprep.mubr.bf16.mxu1 %v6379_v44  ;;  %v8299_v4 = vld [vmem:[#allocation3 + $0x164] ss:$8 sps:$4 sm:$0xff]   ;;  %v8301_v36 = vld [vmem:[#allocation3 + $0x60] ss:$8 sps:$4 sm:$0xff]   ;;  %v8303_v61 = vld [vmem:[#allocation3 + $0x54] ss:$8 sps:$4 sm:$0xff]  }
 0x5b5   :  { %7079 = vmatprep.subr.bf16.mxu1 %v8293_v21  ;;  %7037 = vmatpush1.bf16.msra.mxu0 %v8295_v27  ;;  %v8302_v5 = vld [vmem:[#allocation3 + $0x160] ss:$8 sps:$4 sm:$0xff]   ;;  %v8305_v17 = vld [vmem:[#allocation3 + $0x154] ss:$8 sps:$4 sm:$0xff]   ;;  %v8307_v55 = vld [vmem:[#allocation3 + $0x50] ss:$8 sps:$4 sm:$0xff]  }
 0x5b6   :  { %7080 = vmatpush1.bf16.msra.mxu1 %v8296_v28  ;;  %7038 = vmatprep.subr.bf16.mxu0 %v8297_v26  ;;  %v8308_v7 = vld [vmem:[#allocation3 + $0x150] ss:$8 sps:$4 sm:$0xff]   ;;  %v8309_v15 = vld [vmem:[#allocation3 + $0x44] ss:$8 sps:$4 sm:$0xff]   ;;  %v8313_v45 = vld [vmem:[#allocation3 + $0x40] ss:$8 sps:$4 sm:$0xff]  }
 0x5b7   :  { %7081 = vmatprep.subr.bf16.mxu1 %v8299_v4  ;;  %v8311_v23 = vld [vmem:[#allocation3 + $0x144] ss:$8 sps:$4 sm:$0xff]   ;;  %v8314_v56 = vld [vmem:[#allocation3 + $0x140] ss:$8 sps:$4 sm:$0xff]   ;;  %v8315_v62 = vld [vmem:[#allocation3 + $0x34] ss:$8 sps:$4 sm:$0xff]  }
 0x5b8   :  { %v8317_v8 = vld [vmem:[#allocation3 + $0x134] ss:$8 sps:$4 sm:$0xff]   ;;  %v8319_v1 = vld [vmem:[#allocation3 + $0x30] ss:$8 sps:$4 sm:$0xff]   ;;  %v8321_v3 = vld [vmem:[#allocation3 + $0x24] ss:$8 sps:$4 sm:$0xff]  }
 0x5b9   :  { %7039 = vmatpush1.bf16.msra.mxu0 %v8301_v36  ;;  %v8320_v14 = vld [vmem:[#allocation3 + $0x130] ss:$8 sps:$4 sm:$0xff]   ;;  %v8323_v2 = vld [vmem:[#allocation3 + $0x124] ss:$8 sps:$4 sm:$0xff]   ;;  %v8325_v16 = vld [vmem:[#allocation3 + $0x20] ss:$8 sps:$4 sm:$0xff]  }
 0x5ba   :  { %7082 = vmatpush1.bf16.msra.mxu1 %v8302_v5  ;;  %7040 = vmatprep.subr.bf16.mxu0 %v8303_v61  ;;  %v8326_v29 = vld [vmem:[#allocation3 + $0x120] ss:$8 sps:$4 sm:$0xff]   ;;  %v8327_v30 = vld [vmem:[#allocation3 + $0x14] ss:$8 sps:$4 sm:$0xff]   ;;  %v8331_v38 = vld [vmem:[#allocation3 + $0x10] ss:$8 sps:$4 sm:$0xff]  }
 0x5bb   :  { %7083 = vmatprep.subr.bf16.mxu1 %v8305_v17  ;;  %v8329_v11 = vld [vmem:[#allocation3 + $0x114] ss:$8 sps:$4 sm:$0xff]   ;;  %v8332_v46 = vld [vmem:[#allocation3 + $0x110] ss:$8 sps:$4 sm:$0xff]   ;;  %v8333_v12 = vld [vmem:[#allocation3 + $0x4] ss:$8 sps:$4 sm:$0xff]  }
 0x5bc   :  { %v8335_v43 = vld [vmem:[#allocation3 + $0x104] ss:$8 sps:$4 sm:$0xff]   ;;  %v8337_v18 = vld [vmem:[#allocation3] ss:$8 sps:$4 sm:$0xff]   ;;  %v8339_v41 = vld [vmem:[#allocation3 + $0xf4] ss:$8 sps:$4 sm:$0xff]  }
 0x5bd   :  { %7041 = vmatpush1.bf16.msra.mxu0 %v8307_v55  ;;  %v8338_v39 = vld [vmem:[#allocation3 + $0x100] ss:$8 sps:$4 sm:$0xff]   ;;  %v8341_v35 = vld [vmem:[#allocation3 + $0x1f4] ss:$8 sps:$4 sm:$0xff]   ;;  %v8343_v59 = vld [vmem:[#allocation3 + $0xf0] ss:$8 sps:$4 sm:$0xff]  }
 0x5be   :  { %7084 = vmatpush1.bf16.msra.mxu1 %v8308_v7  ;;  %7042 = vmatprep.subr.bf16.mxu0 %v8309_v15  ;;  %v8344_v22 = vld [vmem:[#allocation3 + $0x1f0] ss:$8 sps:$4 sm:$0xff]   ;;  %v8345_v44 = vld [vmem:[#allocation3 + $0xe4] ss:$8 sps:$4 sm:$0xff]   ;;  %v8349_v21 = vld [vmem:[#allocation3 + $0xe0] ss:$8 sps:$4 sm:$0xff]  }
 0x5bf   :  { %7085 = vmatprep.subr.bf16.mxu1 %v8311_v23  ;;  %v8347_v63 = vld [vmem:[#allocation3 + $0x1e4] ss:$8 sps:$4 sm:$0xff]   ;;  %v8350_v27 = vld [vmem:[#allocation3 + $0x1e0] ss:$8 sps:$4 sm:$0xff]   ;;  %v8351_v28 = vld [vmem:[#allocation3 + $0xd4] ss:$8 sps:$4 sm:$0xff]  }
 0x5c0   :  { %v8353_v26 = vld [vmem:[#allocation3 + $0x1d4] ss:$8 sps:$4 sm:$0xff]   ;;  %v8355_v4 = vld [vmem:[#allocation3 + $0xd0] ss:$8 sps:$4 sm:$0xff]   ;;  %v8357_v5 = vld [vmem:[#allocation3 + $0xc4] ss:$8 sps:$4 sm:$0xff]  }
 0x5c1   :  { %7043 = vmatpush1.bf16.msra.mxu0 %v8313_v45  ;;  %v8356_v36 = vld [vmem:[#allocation3 + $0x1d0] ss:$8 sps:$4 sm:$0xff]   ;;  %v8359_v61 = vld [vmem:[#allocation3 + $0x1c4] ss:$8 sps:$4 sm:$0xff]   ;;  %v8361_v17 = vld [vmem:[#allocation3 + $0xc0] ss:$8 sps:$4 sm:$0xff]  }
 0x5c2   :  { %7086 = vmatpush1.bf16.msra.mxu1 %v8314_v56  ;;  %7044 = vmatprep.subr.bf16.mxu0 %v8315_v62  ;;  %v8362_v55 = vld [vmem:[#allocation3 + $0x1c0] ss:$8 sps:$4 sm:$0xff]   ;;  %v8363_v7 = vld [vmem:[#allocation3 + $0xb4] ss:$8 sps:$4 sm:$0xff]   ;;  %v8367_v23 = vld [vmem:[#allocation3 + $0xb0] ss:$8 sps:$4 sm:$0xff]  }
 0x5c3   :  { %7087 = vmatprep.subr.bf16.mxu1 %v8317_v8  ;;  %v8365_v15 = vld [vmem:[#allocation3 + $0x1b4] ss:$8 sps:$4 sm:$0xff]   ;;  %v8368_v45 = vld [vmem:[#allocation3 + $0x1b0] ss:$8 sps:$4 sm:$0xff]   ;;  %v8369_v56 = vld [vmem:[#allocation3 + $0xa4] ss:$8 sps:$4 sm:$0xff]  }
 0x5c4   :  { %v8371_v62 = vld [vmem:[#allocation3 + $0x1a4] ss:$8 sps:$4 sm:$0xff]   ;;  %v8373_v8 = vld [vmem:[#allocation3 + $0xa0] ss:$8 sps:$4 sm:$0xff]   ;;  %v8401_v42 = vld [vmem:[#allocation3 + $0x254] ss:$8 sps:$4 sm:$0xff]  }
 0x5c5   :  { %7045 = vmatpush1.bf16.msra.mxu0 %v8319_v1  ;;  %v8374_v1 = vld [vmem:[#allocation3 + $0x1a0] ss:$8 sps:$4 sm:$0xff]   ;;  %v8399_v13 = vld [vmem:[#allocation3 + $0x250] ss:$8 sps:$4 sm:$0xff]   ;;  %v8407_v24 = vld [vmem:[#allocation3 + $0x244] ss:$8 sps:$4 sm:$0xff]  }
 0x5c6   :  { %7088 = vmatpush1.bf16.msra.mxu1 %v8320_v14  ;;  %7046 = vmatprep.subr.bf16.mxu0 %v8321_v3  ;;  %v8375_v14 = vld [vmem:[#allocation3 + $0x94] ss:$8 sps:$4 sm:$0xff]   ;;  %v8393_v6 = vld [vmem:[#allocation3 + $0x260] ss:$8 sps:$4 sm:$0xff]   ;;  %v8410_v10 = vld [vmem:[#allocation3 + $0x344] ss:$8 sps:$4 sm:$0xff]  }
 0x5c7   :  { %7089 = vmatprep.subr.bf16.mxu1 %v8323_v2  ;;  %v8377_v3 = vld [vmem:[#allocation3 + $0x194] ss:$8 sps:$4 sm:$0xff]   ;;  %v8379_v2 = vld [vmem:[#allocation3 + $0x90] ss:$8 sps:$4 sm:$0xff]   ;;  %v8405_v53 = vld [vmem:[#allocation3 + $0x240] ss:$8 sps:$4 sm:$0xff]  }
 0x5c8   :  { %v8408_v58 = vld [vmem:[#allocation3 + $0x340] ss:$8 sps:$4 sm:$0xff]   ;;  %v8413_v51 = vld [vmem:[#allocation3 + $0x234] ss:$8 sps:$4 sm:$0xff]   ;;  %v8411_v37 = vld [vmem:[#allocation3 + $0x230] ss:$8 sps:$4 sm:$0xff]  }
 0x5c9   :  { %7047 = vmatpush1.bf16.msra.mxu0 %v8325_v16  ;;  %v8380_v16 = vld [vmem:[#allocation3 + $0x190] ss:$8 sps:$4 sm:$0xff]   ;;  %v7212_v25 = vld [vmem:[#allocation18] sm:$0x3]  ;;  %s8736_s5 = smov [#allocation20]  }
 0x5ca   :  { %7090 = vmatpush1.bf16.msra.mxu1 %v8326_v29  ;;  %7048 = vmatprep.subr.bf16.mxu0 %v8327_v30  ;;  %v8381_v29 = vld [vmem:[#allocation3 + $0x84] ss:$8 sps:$4 sm:$0xff]   ;;  %s7262_s7 = sshll.u32 %s8736_s5, 4  ;;  %s7263_s7 = int_to_ptr.vmem [resolvable:$true] %s7262_s7 }
 0x5cb   :  { %7091 = vmatprep.subr.bf16.mxu1 %v8329_v11  ;;  %v8383_v30 = vld [vmem:[#allocation3 + $0x184] ss:$8 sps:$4 sm:$0xff]   ;;  %v8385_v11 = vld [vmem:[#allocation3 + $0x80] ss:$8 sps:$4 sm:$0xff]   ;;  %s8683_s13 = scalar_lea.vmem %s7263_s7, 1024  ;;  %p8688_p9 = scmp.lt.s32.totalorder %s7263_s7, %s7263_s7 }
 0x5cc   :  { %p8684_p8 = scmp.ne.s32.totalorder %s7263_s7, %s8683_s13  ;;  %p8689_p10 = scmp.lt.s32.totalorder %s8683_s13, %s8683_s13 }
 0x5cd   :  { %7049 = vmatpush1.bf16.msra.mxu0 %v8331_v38  ;;  %v8386_v38 = vld [vmem:[#allocation3 + $0x180] ss:$8 sps:$4 sm:$0xff]  }
 0x5ce   :  { %7092 = vmatpush1.bf16.msra.mxu1 %v8332_v46  ;;  %7050 = vmatprep.subr.bf16.mxu0 %v8333_v12  ;;  %v8389_v46 = vld [vmem:[#allocation3 + $0x274] ss:$8 sps:$4 sm:$0xff]   ;;  %p8690_p11 = por %p8689_p10, %p8688_p9 }
 0x5cf   :  { %7093 = vmatprep.subr.bf16.mxu1 %v8335_v43  ;;  %v8392_v12 = vld [vmem:[#allocation3 + $0x374] ss:$8 sps:$4 sm:$0xff]   ;;  %v6376_v43 = vpack.c.bf16 %v6237_v60, %v6229_v57  ;;  %v6383_v57 = vpack.c.bf16 %v6244_v0, %v6236_v19  ;;  %v8396_v60 = vld [vmem:[#allocation3 + $0x360] ss:$8 sps:$4 sm:$0xff]   ;;  %v8414_v0 = vld [vmem:[#allocation3 + $0x330] ss:$8 sps:$4 sm:$0xff]  }
 0x5d0   :  { %v8416_v19 = vld [vmem:[#allocation3 + $0x334] ss:$8 sps:$4 sm:$0xff]   ;;  %p8691_p12 = pnand %p8690_p11, %p8684_p8 }
 0x5d1   :  { %7051 = vmatpush1.bf16.msra.mxu0 %v8337_v18  ;;  %v6378_v18 = vpack.c.bf16 %v6239_v20, %v6231_v49  ;;  %v8404_v49 = vld [vmem:[#allocation3 + $0x354] ss:$8 sps:$4 sm:$0xff]   ;;  %v8402_v20 = vld [vmem:[#allocation3 + $0x350] ss:$8 sps:$4 sm:$0xff]  }
 0x5d2   :  { %7094 = vmatpush1.bf16.msra.mxu1 %v8338_v39  ;;  %7052 = vmatprep.subr.bf16.mxu0 %v8339_v41  ;;  %v8387_v39 = vld [vmem:[#allocation3 + $0x270] ss:$8 sps:$4 sm:$0xff]  }
 0x5d3   :  { %7095 = vmatprep.subr.bf16.mxu1 %v8341_v35  ;;  %v8390_v41 = vld [vmem:[#allocation3 + $0x370] ss:$8 sps:$4 sm:$0xff]   ;;  %v8395_v35 = vld [vmem:[#allocation3 + $0x264] ss:$8 sps:$4 sm:$0xff]  }
 0x5d5   :  { %7053 = vmatpush2.bf16.msra.mxu0 %v8343_v59  ;;  %v8398_v59 = vld [vmem:[#allocation3 + $0x364] ss:$8 sps:$4 sm:$0xff]  }
 0x5d6   :  { %7096 = vmatpush2.bf16.msra.mxu1 %v8344_v22  ;;  %7054 = vmatprep.subr.bf16.mxu0 %v8345_v44  ;;  %v8419_v22 = vld [vmem:[#allocation3 + $0x224] ss:$8 sps:$4 sm:$0xff]  }
 0x5d7   :  { %7097 = vmatprep.subr.bf16.mxu1 %v8347_v63  ;;  %v8422_v44 = vld [vmem:[#allocation3 + $0x324] ss:$8 sps:$4 sm:$0xff]   ;;  %v8417_v63 = vld [vmem:[#allocation3 + $0x220] ss:$8 sps:$4 sm:$0xff]  }
 0x5d9   :  { %7055 = vmatpush2.bf16.msra.mxu0 %v8349_v21  ;;  %v8420_v21 = vld [vmem:[#allocation3 + $0x320] ss:$8 sps:$4 sm:$0xff]  }
 0x5da   :  { %7098 = vmatpush2.bf16.msra.mxu1 %v8350_v27  ;;  %7056 = vmatprep.subr.bf16.mxu0 %v8351_v28  ;;  %v8425_v27 = vld [vmem:[#allocation3 + $0x214] ss:$8 sps:$4 sm:$0xff]  }
 0x5db   :  { %7099 = vmatprep.subr.bf16.mxu1 %v8353_v26  ;;  %v8428_v28 = vld [vmem:[#allocation3 + $0x314] ss:$8 sps:$4 sm:$0xff]   ;;  %v8423_v26 = vld [vmem:[#allocation3 + $0x210] ss:$8 sps:$4 sm:$0xff]  }
 0x5dd   :  { %7057 = vmatpush2.bf16.msra.mxu0 %v8355_v4  ;;  %v8426_v4 = vld [vmem:[#allocation3 + $0x310] ss:$8 sps:$4 sm:$0xff]  }
 0x5de   :  { %7100 = vmatpush2.bf16.msra.mxu1 %v8356_v36  ;;  %7058 = vmatprep.subr.bf16.mxu0 %v8357_v5  ;;  %v8431_v36 = vld [vmem:[#allocation3 + $0x204] ss:$8 sps:$4 sm:$0xff]  }
 0x5df   :  { %7101 = vmatprep.subr.bf16.mxu1 %v8359_v61  ;;  %v8434_v5 = vld [vmem:[#allocation3 + $0x304] ss:$8 sps:$4 sm:$0xff]   ;;  %v8429_v61 = vld [vmem:[#allocation3 + $0x200] ss:$8 sps:$4 sm:$0xff]  }
 0x5e1   :  { %7059 = vmatpush2.bf16.msra.mxu0 %v8361_v17  ;;  %v8432_v17 = vld [vmem:[#allocation3 + $0x300] ss:$8 sps:$4 sm:$0xff]  }
 0x5e2   :  { %7102 = vmatpush2.bf16.msra.mxu1 %v8362_v55  ;;  %7060 = vmatprep.subr.bf16.mxu0 %v8363_v7  ;;  %v8437_v55 = vld [vmem:[#allocation3 + $0x2f4] ss:$8 sps:$4 sm:$0xff]  }
 0x5e3   :  { %7103 = vmatprep.subr.bf16.mxu1 %v8365_v15  ;;  %v8440_v7 = vld [vmem:[#allocation3 + $0x3f4] ss:$8 sps:$4 sm:$0xff]   ;;  %v8435_v15 = vld [vmem:[#allocation3 + $0x2f0] ss:$8 sps:$4 sm:$0xff]  }
 0x5e5   :  { %7061 = vmatpush2.bf16.msra.mxu0 %v8367_v23  ;;  %v8438_v23 = vld [vmem:[#allocation3 + $0x3f0] ss:$8 sps:$4 sm:$0xff]  }
 0x5e6   :  { %7104 = vmatpush2.bf16.msra.mxu1 %v8368_v45  ;;  %7062 = vmatprep.subr.bf16.mxu0 %v8369_v56  ;;  %v8443_v45 = vld [vmem:[#allocation3 + $0x2e4] ss:$8 sps:$4 sm:$0xff]  }
 0x5e7   :  { %7105 = vmatprep.subr.bf16.mxu1 %v8371_v62  ;;  %v8446_v56 = vld [vmem:[#allocation3 + $0x3e4] ss:$8 sps:$4 sm:$0xff]   ;;  %v8441_v62 = vld [vmem:[#allocation3 + $0x2e0] ss:$8 sps:$4 sm:$0xff]  }
 0x5e9   :  { %7063 = vmatpush2.bf16.msra.mxu0 %v8373_v8  ;;  %v8444_v8 = vld [vmem:[#allocation3 + $0x3e0] ss:$8 sps:$4 sm:$0xff]  }
 0x5ea   :  { %7106 = vmatpush2.bf16.msra.mxu1 %v8374_v1  ;;  %7064 = vmatprep.subr.bf16.mxu0 %v8375_v14  ;;  %v8449_v1 = vld [vmem:[#allocation3 + $0x2d4] ss:$8 sps:$4 sm:$0xff]  }
 0x5eb   :  { %7107 = vmatprep.subr.bf16.mxu1 %v8377_v3  ;;  %v8452_v14 = vld [vmem:[#allocation3 + $0x3d4] ss:$8 sps:$4 sm:$0xff]   ;;  %v8447_v3 = vld [vmem:[#allocation3 + $0x2d0] ss:$8 sps:$4 sm:$0xff]  }
 0x5ed   :  { %7065 = vmatpush2.bf16.msra.mxu0 %v8379_v2  ;;  %v8450_v2 = vld [vmem:[#allocation3 + $0x3d0] ss:$8 sps:$4 sm:$0xff]  }
 0x5ee   :  { %7108 = vmatpush2.bf16.msra.mxu1 %v8380_v16  ;;  %7066 = vmatprep.subr.bf16.mxu0 %v8381_v29  ;;  %v8455_v16 = vld [vmem:[#allocation3 + $0x2c4] ss:$8 sps:$4 sm:$0xff]  }
 0x5ef   :  { %7109 = vmatprep.subr.bf16.mxu1 %v8383_v30  ;;  %v8458_v29 = vld [vmem:[#allocation3 + $0x3c4] ss:$8 sps:$4 sm:$0xff]   ;;  %v8453_v30 = vld [vmem:[#allocation3 + $0x2c0] ss:$8 sps:$4 sm:$0xff]  }
 0x5f1   :  { %7067 = vmatpush2.bf16.msra.mxu0 %v8385_v11  ;;  %v8456_v11 = vld [vmem:[#allocation3 + $0x3c0] ss:$8 sps:$4 sm:$0xff]  }
 0x5f2   :  { %7110 = vmatpush2.bf16.msra.mxu1 %v8386_v38  ;;  %7122 = vmatprep.subr.bf16.mxu0 %v8389_v46  ;;  %v8461_v38 = vld [vmem:[#allocation3 + $0x2b4] ss:$8 sps:$4 sm:$0xff]  }
 0x5f3   :  { %7165 = vmatprep.subr.bf16.mxu1 %v8392_v12  ;;  %v8464_v46 = vld [vmem:[#allocation3 + $0x3b4] ss:$8 sps:$4 sm:$0xff]   ;;  %v8459_v12 = vld [vmem:[#allocation3 + $0x2b0] ss:$8 sps:$4 sm:$0xff]  }
 0x5f4   :  { %7069 = vmatmul.mubr.bf16.vlgmr.msra.gmra.mxu0 %v6376_v43  ;;  %v8462_v43 = vld [vmem:[#allocation3 + $0x3b0] ss:$8 sps:$4 sm:$0xff]  }
 0x5f5   :  { %7112 = vmatmul.mubr.bf16.vlgmr.msra.gmra.mxu1 %v6378_v18  ;;  %7123 = vmatpush1.bf16.msra.mxu0 %v8387_v39  ;;  %v8467_v18 = vld [vmem:[#allocation3 + $0x2a4] ss:$8 sps:$4 sm:$0xff]  }
 0x5f6   :  { %7166 = vmatpush1.bf16.msra.mxu1 %v8390_v41  ;;  %7124 = vmatprep.subr.bf16.mxu0 %v8395_v35  ;;  %v8470_v39 = vld [vmem:[#allocation3 + $0x3a4] ss:$8 sps:$4 sm:$0xff]   ;;  %v8465_v41 = vld [vmem:[#allocation3 + $0x2a0] ss:$8 sps:$4 sm:$0xff]  }
 0x5f7   :  { %7167 = vmatprep.subr.bf16.mxu1 %v8398_v59  ;;  %7154 = vmatprep.mubr.bf16.mxu0 %v6381_v32  ;;  %v8468_v35 = vld [vmem:[#allocation3 + $0x3a0] ss:$8 sps:$4 sm:$0xff]   ;;  %v8473_v59 = vld [vmem:[#allocation3 + $0x294] ss:$8 sps:$4 sm:$0xff]  }
 0x5f8   :  { %7197 = vmatprep.mubr.bf16.mxu1 %v6383_v57  ;;  %v8476_v32 = vld [vmem:[#allocation3 + $0x394] ss:$8 sps:$4 sm:$0xff]   ;;  %v8471_v57 = vld [vmem:[#allocation3 + $0x290] ss:$8 sps:$4 sm:$0xff]  }
 0x5f9   :  { %7125 = vmatpush1.bf16.msra.mxu0 %v8393_v6  ;;  %v8474_v6 = vld [vmem:[#allocation3 + $0x390] ss:$8 sps:$4 sm:$0xff]  }
 0x5fa   :  { %7168 = vmatpush1.bf16.msra.mxu1 %v8396_v60  ;;  %7126 = vmatprep.subr.bf16.mxu0 %v8401_v42  ;;  %v8479_v60 = vld [vmem:[#allocation3 + $0x284] ss:$8 sps:$4 sm:$0xff]  }
 0x5fb   :  { %7169 = vmatprep.subr.bf16.mxu1 %v8404_v49  ;;  %v8482_v42 = vld [vmem:[#allocation3 + $0x384] ss:$8 sps:$4 sm:$0xff]   ;;  %v8477_v49 = vld [vmem:[#allocation3 + $0x280] ss:$8 sps:$4 sm:$0xff]  }
 0x5fd   :  { %7127 = vmatpush1.bf16.msra.mxu0 %v8399_v13  ;;  %v8480_v13 = vld [vmem:[#allocation3 + $0x380] ss:$8 sps:$4 sm:$0xff]  }
 0x5fe   :  { %7170 = vmatpush1.bf16.msra.mxu1 %v8402_v20  ;;  %7128 = vmatprep.subr.bf16.mxu0 %v8407_v24  ;;  %v6380_v20 = vpack.c.bf16 %v6241_v31, %v6233_v52  ;;  %v6382_v24 = vpack.c.bf16 %v6243_v34, %v6235_v33 }
 0x5ff   :  { %7171 = vmatprep.subr.bf16.mxu1 %v8410_v10 }
 0x601   :  { %7129 = vmatpush1.bf16.msra.mxu0 %v8405_v53 }
 0x602   :  { %7172 = vmatpush1.bf16.msra.mxu1 %v8408_v58  ;;  %7130 = vmatprep.subr.bf16.mxu0 %v8413_v51  ;;  %v6384_v58 = vld [vmem:[#allocation17] sm:$0x3] }
 0x603   :  { %7173 = vmatprep.subr.bf16.mxu1 %v8416_v19  ;;  %v6393_v40 = vrot.slane %v6384_v58, %v8853_v50 }
 0x605   :  { %7131 = vmatpush1.bf16.msra.mxu0 %v8411_v37  ;;  %v6389_v37 = vrot.slane %v6384_v58, %v8847_v47 }
 0x606   :  { %7174 = vmatpush1.bf16.msra.mxu1 %v8414_v0  ;;  %7132 = vmatprep.subr.bf16.mxu0 %v8419_v22  ;;  %v7213_v0 = vunpack.c.l.bf16 %v7212_v25 }
 0x607   :  { %7175 = vmatprep.subr.bf16.mxu1 %v8422_v44 }
 0x609   :  { %7133 = vmatpush1.bf16.msra.mxu0 %v8417_v63 }
 0x60a   :  { %7176 = vmatpush1.bf16.msra.mxu1 %v8420_v21  ;;  %7134 = vmatprep.subr.bf16.mxu0 %v8425_v27  ;;  %v7218_v27 = vrot.slane %v7213_v0, %v8847_v47 }
 0x60b   :  { %7177 = vmatprep.subr.bf16.mxu1 %v8428_v28  ;;  %v7222_v28 = vrot.slane %v7213_v0, %v8850_v48 }
 0x60d   :  { %7135 = vmatpush1.bf16.msra.mxu0 %v8423_v26 }
 0x60e   :  { %7178 = vmatpush1.bf16.msra.mxu1 %v8426_v4  ;;  %7136 = vmatprep.subr.bf16.mxu0 %v8431_v36 }
 0x60f   :  { %7179 = vmatprep.subr.bf16.mxu1 %v8434_v5 }
 0x611   :  { %7137 = vmatpush1.bf16.msra.mxu0 %v8429_v61 }
 0x612   :  { %7180 = vmatpush1.bf16.msra.mxu1 %v8432_v17  ;;  %7138 = vmatprep.subr.bf16.mxu0 %v8437_v55 }
 0x613   :  { %7181 = vmatprep.subr.bf16.mxu1 %v8440_v7 }
 0x615   :  { %7139 = vmatpush2.bf16.msra.mxu0 %v8435_v15 }
 0x616   :  { %7182 = vmatpush2.bf16.msra.mxu1 %v8438_v23  ;;  %7140 = vmatprep.subr.bf16.mxu0 %v8443_v45  ;;  %v7228_v23 = vrot.slane %v7218_v27, %v8847_v47  ;;  %v7232_v45 = vrot.slane %v7222_v28, %v8847_v47 }
 0x617   :  { %7183 = vmatprep.subr.bf16.mxu1 %v8446_v56 }
 0x619   :  { %7141 = vmatpush2.bf16.msra.mxu0 %v8441_v62 }
 0x61a   :  { %7184 = vmatpush2.bf16.msra.mxu1 %v8444_v8  ;;  %7142 = vmatprep.subr.bf16.mxu0 %v8449_v1 }
 0x61b   :  { %7185 = vmatprep.subr.bf16.mxu1 %v8452_v14 }
 0x61d   :  { %7143 = vmatpush2.bf16.msra.mxu0 %v8447_v3 }
 0x61e   :  { %7186 = vmatpush2.bf16.msra.mxu1 %v8450_v2  ;;  %7144 = vmatprep.subr.bf16.mxu0 %v8455_v16 }
 0x61f   :  { %7187 = vmatprep.subr.bf16.mxu1 %v8458_v29 }
 0x621   :  { %7145 = vmatpush2.bf16.msra.mxu0 %v8453_v30 }
 0x622   :  { %7188 = vmatpush2.bf16.msra.mxu1 %v8456_v11  ;;  %7146 = vmatprep.subr.bf16.mxu0 %v8461_v38 }
 0x623   :  { %7189 = vmatprep.subr.bf16.mxu1 %v8464_v46 }
 0x625   :  { %7147 = vmatpush2.bf16.msra.mxu0 %v8459_v12 }
 0x626   :  { %7190 = vmatpush2.bf16.msra.mxu1 %v8462_v43  ;;  %7148 = vmatprep.subr.bf16.mxu0 %v8467_v18 }
 0x627   :  { %7191 = vmatprep.subr.bf16.mxu1 %v8470_v39 }
 0x629   :  { %7149 = vmatpush2.bf16.msra.mxu0 %v8465_v41 }
 0x62a   :  { %7192 = vmatpush2.bf16.msra.mxu1 %v8468_v35  ;;  %7150 = vmatprep.subr.bf16.mxu0 %v8473_v59 }
 0x62b   :  { %7193 = vmatprep.subr.bf16.mxu1 %v8476_v32 }
 0x62d   :  { %7151 = vmatpush2.bf16.msra.mxu0 %v8471_v57 }
 0x62e   :  { %7194 = vmatpush2.bf16.msra.mxu1 %v8474_v6  ;;  %7152 = vmatprep.subr.bf16.mxu0 %v8479_v60 }
 0x62f   :  { %7195 = vmatprep.subr.bf16.mxu1 %v8482_v42 }
 0x631   :  { %7153 = vmatpush2.bf16.msra.mxu0 %v8477_v49 }
 0x632   :  { %7196 = vmatpush2.bf16.msra.mxu1 %v8480_v13 }
 0x634   :  { %7155 = vmatmul.mubr.bf16.vlgmr.msra.gmra.mxu0 %v6380_v20 }
 0x635   :  { %7198 = vmatmul.mubr.bf16.vlgmr.msra.gmra.mxu1 %v6382_v24 }
 0x6b4   :  { %v7070_v10 = vpop.f32.mrf.mxu0 }
 0x6b5   :  { %v7113_v53 = vpop.f32.mrf.mxu1  ;;  %v7071_v9 = vadd.f32 %v7070_v10, %v6389_v37 }
 0x6b6   :  { %v7072_v51 = vpop.f32.mrf.mxu0 }
 0x6b7   :  { %v7115_v19 = vpop.f32.mrf.mxu1  ;;  %v7073_v54 = vadd.f32 %v7072_v51, %v6393_v40  ;;  %v7114_v22 = vadd.f32 %v7113_v53, %v7071_v9 }
 0x6b8   :  { %v7074_v52 = vpop.f32.mrf.mxu0 }
 0x6b9   :  { %v7117_v31 = vpop.f32.mrf.mxu1  ;;  %v7075_v44 = vadd.f32 %v7074_v52, %v6389_v37  ;;  %v7116_v26 = vadd.f32 %v7115_v19, %v7073_v54 }
 0x6ba   :  { %v7076_v33 = vpop.f32.mrf.mxu0 }
 0x6bb   :  { %v7119_v34 = vpop.f32.mrf.mxu1  ;;  %v7077_v4 = vadd.f32 %v7076_v33, %v6393_v40  ;;  %v7118_v61 = vadd.f32 %v7117_v31, %v7075_v44 }
 0x6bd   :  { %v7120_v56 = vadd.f32 %v7119_v34, %v7077_v4 }
 0x6f4   :  { %v7156_v63 = vpop.f32.mrf.mxu0 }
 0x6f5   :  { %v7199_v21 = vpop.f32.mrf.mxu1  ;;  %v7157_v36 = vadd.f32 %v7156_v63, %v7114_v22 }
 0x6f6   :  { %v7158_v50 = vpop.f32.mrf.mxu0 }
 0x6f7   :  { %v7201_v5 = vpop.f32.mrf.mxu1  ;;  %v7200_v17 = vadd.f32 %v7199_v21, %v7157_v36  ;;  %v7159_v55 = vadd.f32 %v7158_v50, %v7116_v26 }
 0x6f8   :  { %v7160_v7 = vpop.f32.mrf.mxu0 }
 0x6f9   :  { %v7203_v15 = vpop.f32.mrf.mxu1  ;;  %v7208_v62 = vmax.f32 %v7200_v17, 0.0  ;;  %v7202_v8 = vadd.f32 %v7201_v5, %v7159_v55  ;;  %v7161_v1 = vadd.f32 %v7160_v7, %v7118_v61 }
 0x6fa   :  { %v7162_v14 = vpop.f32.mrf.mxu0 }
 0x6fb   :  { %v7209_v48 = vmax.f32 %v7202_v8, 0.0  ;;  %v7204_v3 = vadd.f32 %v7203_v15, %v7161_v1  ;;  %v7163_v2 = vadd.f32 %v7162_v14, %v7120_v56  ;;  %v7205_v16 = vpop.f32.mrf.mxu1  ;;  %v7233_v11 = vmul.f32 %v7228_v23, %v7208_v62 }
 0x6fd   :  { %v7210_v29 = vmax.f32 %v7204_v3, 0.0  ;;  %v7206_v30 = vadd.f32 %v7205_v16, %v7163_v2  ;;  %v7234_v38 = vmul.f32 %v7232_v45, %v7209_v48 }
 0x6ff   :  { %v7211_v46 = vmax.f32 %v7206_v30, 0.0  ;;  %v7237_v12 = vadd.f32 %v7234_v38, %v7233_v11  ;;  %v7235_v43 = vmul.f32 %v7228_v23, %v7210_v29 }
 0x701   :  { %v7236_v18 = vmul.f32 %v7232_v45, %v7211_v46  ;;  %7238 = vadd.xlane.f32.xlu0 %v7237_v12 }
 0x703   :  { %v7240_v39 = vadd.f32 %v7236_v18, %v7235_v43 }
 0x705   :  { %7241 = vadd.xlane.f32.xlu0 %v7240_v39 }
 0x706   :  { %8694 = shalt.err (!%p8691_p12)
}
 0x707   :  { %7268 = dma.vmem_to_hbm [thread:$0]  %s7263_s7, 1024, %s9174_s12, [#allocation8], %s8723_s14, %s8723_s14, %s8724_s15   ;;  %v8221_v47 = vld [vmem:[#allocation5] ss:$0 sm:$0xff]  ;;  %vm7252_vm0 = vcmask 7168  }
 0x78a   :  { %v7239_v41 = vpop.xlane.xlu0 %7238 }
 0x78b   :  { %v7250_v35 = vadd.f32 %v8221_v47, %v7239_v41 }
 0x78d   :  { %7253 = vst.msk [vmem:[%s9173_s11] sm:$0xff] %vm7252_vm0, %v7250_v35 }
 0x78e   :  { %v7242_v59 = vpop.xlane.xlu0 %7241 }
 0x78f   :  { %v7251_v32 = vadd.f32 %v8221_v47, %v7242_v59 }
 0x791   :  { %7254 = vst.msk [vmem:[%s9173_s11 + $0x8] sm:$0xff] %vm7252_vm0, %v7251_v32 }
 0x792   :  { %8717 = dma.done.wait [#allocation8], 1024  }
 0x793   :  { %8718 = vsyncadd [#allocation8], 4294966272 }
 0x794   :  { %7274 = vsyncpa [#allocation7], 1 }
 0x795   :  { %7275 = vsyncpa [#allocation10], 1 }
 0x796   :  { %7276 = vsyncpa [#allocation13], 1 }
 0x797   :  { %7277 = vsyncpa [#allocation16], 1 }
 0x798   :  { %7278 = vsyncpa [#allocation19], 1 }
 0x799   :  { %7279 = vsyncpa [#allocation8], 1 }
 0x79a   :  { %7280 = vsyncmov [#allocation4] }
 0x79d   :  { %s7281_s12 = vpop.sfrf %7280 }
 0x79e   :  { %p8222_p13 = scmp.ne.s32.totalorder %s7281_s12, 0 }
 0x7a0   :  { %7285 = shalt.err (%p8222_p13)  }
 0x7a1   :  { %7287 = vsyncmov [#allocation4 + $0x1] }
 0x7a4   :  { %s7288_s14 = vpop.sfrf %7287 }
 0x7a5   :  { %p8223_p0 = scmp.ne.s32.totalorder %s7288_s14, 0 }
 0x7a7   :  { %7292 = shalt.err (%p8223_p0)  }

</bundles_post_ra>
